<compile_context>
chip_gen: v5e
topology: v5e:2x2
jax: 0.10.0
libtpu: 0.0.40
codegen_flags: <defaults>
</compile_context>

<pallas_src>
import functools

import jax
import jax.numpy as jnp
from jax.experimental import pallas as pl
from jax.experimental.pallas import tpu as pltpu


# ---------------------------------------------------------------------------
# Helpers: padding / weight layout
# ---------------------------------------------------------------------------

def _round_up(x, m):
    return (x + m - 1) // m * m


def _choose_time_chunk(seq_len, target):
    """Largest divisor of seq_len that is <= target (keeps recurrence exact)."""
    tc = max(1, min(target, seq_len))
    while seq_len % tc != 0:
        tc -= 1
    return tc


def _pad_gate_weight(w, in_dim_pad, H, H_pad):
    """w: (4H, in_dim) PyTorch layout -> (in_dim_pad, 4*H_pad).

    Transposed (so the MXU consumes it directly, no in-kernel .T) and
    zero-padded per gate so each gate occupies a lane-aligned H_pad block."""
    _, in_dim = w.shape
    w4 = w.reshape(4, H, in_dim)
    out = jnp.zeros((4, H_pad, in_dim_pad), w.dtype)
    out = out.at[:, :H, :in_dim].set(w4)
    return out.transpose(2, 0, 1).reshape(in_dim_pad, 4 * H_pad)


def _pad_gate_bias(b, H, H_pad):
    b4 = b.reshape(4, H)
    out = jnp.zeros((4, H_pad), b.dtype).at[:, :H].set(b4)
    return out.reshape(4 * H_pad)


# ---------------------------------------------------------------------------
# Fused multi-layer LSTM recurrence kernel
# ---------------------------------------------------------------------------

def _encoder_lstm_kernel(xp_ref, w_hh_ref, w_ih_ref, b_ref,
                         hN_ref, cN_ref, h_sc, c_sc,
                         *, num_layers, time_chunk, batch_block, hidden_pad):
    t = pl.program_id(1)            # time-chunk index (sequential recurrence)
    Hp = hidden_pad
    Bb = batch_block
    Tc = time_chunk

    @pl.when(t == 0)
    def _():
        h_sc[...] = jnp.zeros_like(h_sc)
        c_sc[...] = jnp.zeros_like(c_sc)

    # Layer-0 input projection for this time chunk was hoisted to the wrapper
    # (one big MXU-friendly matmul over all S*B).  Flatten to (Tc*Bb, 4*Hp).
    xp_flat = xp_ref[...].reshape(Tc * Bb, 4 * Hp)

    prev_outs = None
    for layer in range(num_layers):
        if layer > 0:
            # Inter-layer input projection: one chunk-wide matmul
            # (Tc*Bb, Hp) @ (Hp, 4Hp) instead of Tc tiny per-step matmuls.
            xp_flat = (jnp.dot(prev_outs, w_ih_ref[layer],
                               preferred_element_type=jnp.float32)
                       + b_ref[layer])
        w_hh_l = w_hh_ref[layer]            # (Hp, 4Hp), pre-transposed
        h = h_sc[layer]                     # (Bb, Hp) f32
        c = c_sc[layer]
        outs = []
        for i in range(Tc):                 # short static inner loop (unrolled)
            gates = xp_flat[i * Bb:(i + 1) * Bb, :] + jnp.dot(
                h, w_hh_l, preferred_element_type=jnp.float32)
            # Gate order i, f, g, o; each slice is a full lane-aligned block.
            i_g = jax.nn.sigmoid(gates[:, 0 * Hp:1 * Hp])
            f_g = jax.nn.sigmoid(gates[:, 1 * Hp:2 * Hp])
            g_g = jnp.tanh(gates[:, 2 * Hp:3 * Hp])
            o_g = jax.nn.sigmoid(gates[:, 3 * Hp:4 * Hp])
            c = f_g * c + i_g * g_g
            h = o_g * jnp.tanh(c)
            outs.append(h)
        h_sc[layer] = h
        c_sc[layer] = c
        if layer + 1 < num_layers:
            # Chunk activations for the next layer stay on-chip (no HBM trips).
            prev_outs = jnp.concatenate(outs, axis=0)      # (Tc*Bb, Hp)

    # Only final states are needed; write resident outputs once, on last chunk.
    @pl.when(t == pl.num_programs(1) - 1)
    def _():
        hN_ref[...] = h_sc[...]
        cN_ref[...] = c_sc[...]


def encoder_lstm_pallas(xp0, w_hh_all, w_ih_rest, b_rest,
                        *, time_chunk, batch_block, hidden_pad):
    """xp0: (S, B_pad, 4*Hp) layer-0 input projections (bias folded in).
    w_hh_all / w_ih_rest: (L, Hp, 4*Hp) pre-transposed, gate-padded.
    b_rest: (L, 1, 4*Hp) biases for layers >= 1 (slot 0 unused).
    Returns (h_n, c_n): each (L, B_pad, Hp)."""
    S, B_pad, G = xp0.shape
    L, Hp, _ = w_hh_all.shape
    Bb = batch_block
    Tc = time_chunk
    n_b = B_pad // Bb
    n_t = S // Tc

    kernel = functools.partial(
        _encoder_lstm_kernel, num_layers=L, time_chunk=Tc,
        batch_block=Bb, hidden_pad=Hp)

    out_shape = (
        jax.ShapeDtypeStruct((L, B_pad, Hp), jnp.float32),
        jax.ShapeDtypeStruct((L, B_pad, Hp), jnp.float32),
    )

    grid_spec = pltpu.PrefetchScalarGridSpec(
        num_scalar_prefetch=0,
        grid=(n_b, n_t),
        in_specs=[
            pl.BlockSpec((Tc, Bb, G), lambda b, t: (t, b, 0)),     # x proj chunk
            pl.BlockSpec((L, Hp, G), lambda b, t: (0, 0, 0)),      # W_hh (resident)
            pl.BlockSpec((L, Hp, G), lambda b, t: (0, 0, 0)),      # W_ih layers>=1
            pl.BlockSpec((L, 1, G), lambda b, t: (0, 0, 0)),       # biases layers>=1
        ],
        out_specs=[
            pl.BlockSpec((L, Bb, Hp), lambda b, t: (0, b, 0)),
            pl.BlockSpec((L, Bb, Hp), lambda b, t: (0, b, 0)),
        ],
        scratch_shapes=[
            pltpu.VMEM((L, Bb, Hp), jnp.float32),   # h state (all layers)
            pltpu.VMEM((L, Bb, Hp), jnp.float32),   # c state (all layers)
        ],
    )

    return pl.pallas_call(
        kernel,
        out_shape=out_shape,
        grid_spec=grid_spec,
        compiler_params=pltpu.CompilerParams(
            # batch blocks are independent (megacore-parallel),
            # time chunks are a sequential recurrence.
            dimension_semantics=("parallel", "arbitrary")),
    )(xp0, w_hh_all, w_ih_rest, b_rest)


# ---------------------------------------------------------------------------
# Encoder forward (embedding + dropout glue + fused LSTM kernel)
# ---------------------------------------------------------------------------

def init_encoder_params(key, input_size, embedding_size, hidden_size, num_layers):
    """Deterministic parameter init (shapes follow nn.Embedding / nn.LSTM)."""
    params = {}
    key, ek = jax.random.split(key)
    params["embedding"] = jax.random.normal(
        ek, (input_size, embedding_size), jnp.float32)

    scale = 1.0 / jnp.sqrt(hidden_size)
    layers = []
    for layer in range(num_layers):
        in_dim = embedding_size if layer == 0 else hidden_size
        key, k1, k2, k3, k4 = jax.random.split(key, 5)
        w_ih = jax.random.uniform(k1, (4 * hidden_size, in_dim), jnp.float32,
                                  -scale, scale)
        w_hh = jax.random.uniform(k2, (4 * hidden_size, hidden_size), jnp.float32,
                                  -scale, scale)
        b_ih = jax.random.uniform(k3, (4 * hidden_size,), jnp.float32, -scale, scale)
        b_hh = jax.random.uniform(k4, (4 * hidden_size,), jnp.float32, -scale, scale)
        layers.append({"w_ih": w_ih, "w_hh": w_hh, "b": b_ih + b_hh})
    params["lstm"] = layers
    return params


def encoder_forward(params, x_tokens, *, time_chunk=8, batch_block=8):
    """x_tokens: (seq_len, batch) int32 -> (hidden, cell),
    each (num_layers, batch, hidden_size)."""
    # Embedding lookup (gather) -- plain-JAX glue.
    emb = jnp.take(params["embedding"], x_tokens, axis=0)        # (S, B, E)
    # Dropout: identity in eval mode (inference), matching nn.Dropout/nn.LSTM.
    S, B, _ = emb.shape
    layers = params["lstm"]
    L = len(layers)
    H = layers[0]["w_hh"].shape[1]
    E = layers[0]["w_ih"].shape[1]

    Hp = _round_up(H, 128)          # lane-aligned gate blocks
    Bb = batch_block                # sublane-aligned batch block
    B_pad = _round_up(B, Bb)
    G = 4 * Hp
    Tc = _choose_time_chunk(S, time_chunk)

    # Layer-0 input projection hoisted out of the recurrence (one big matmul).
    w_ih0_p = _pad_gate_weight(layers[0]["w_ih"], E, H, Hp)       # (E, G)
    b0_p = _pad_gate_bias(layers[0]["b"], H, Hp)                  # (G,)
    xp0 = jnp.einsum("sbe,eg->sbg", emb, w_ih0_p,
                     preferred_element_type=jnp.float32) + b0_p   # (S, B, G)
    if B_pad != B:
        xp0 = jnp.pad(xp0, ((0, 0), (0, B_pad - B), (0, 0)))

    # Pre-transposed, gate-padded recurrent / inter-layer weights (stacked).
    w_hh_all = jnp.stack(
        [_pad_gate_weight(lp["w_hh"], Hp, H, Hp) for lp in layers])        # (L,Hp,G)
    w_ih_rest = jnp.stack(
        [jnp.zeros((Hp, G), jnp.float32)] +
        [_pad_gate_weight(lp["w_ih"], Hp, H, Hp) for lp in layers[1:]])    # (L,Hp,G)
    b_rest = jnp.stack(
        [jnp.zeros((1, G), jnp.float32)] +
        [_pad_gate_bias(lp["b"], H, Hp).reshape(1, G) for lp in layers[1:]])  # (L,1,G)

    h_n, c_n = encoder_lstm_pallas(
        xp0, w_hh_all, w_ih_rest, b_rest,
        time_chunk=Tc, batch_block=Bb, hidden_pad=Hp)

    return h_n[:, :B, :H], c_n[:, :B, :H]


def encoder_forward_ref(params, x_tokens):
    """Pure-JAX reference (lax.scan) for correctness checking."""
    emb = jnp.take(params["embedding"], x_tokens, axis=0)
    layer_in = emb
    hiddens, cells = [], []
    for lp in params["lstm"]:
        H = lp["w_hh"].shape[1]
        B = layer_in.shape[1]

        def step(carry, x_t, lp=lp, H=H):
            h, c = carry
            gates = x_t @ lp["w_ih"].T + h @ lp["w_hh"].T + lp["b"]
            i = jax.nn.sigmoid(gates[:, 0*H:1*H])
            f = jax.nn.sigmoid(gates[:, 1*H:2*H])
            g = jnp.tanh(gates[:, 2*H:3*H])
            o = jax.nn.sigmoid(gates[:, 3*H:4*H])
            c = f * c + i * g
            h = o * jnp.tanh(c)
            return (h, c), h

        init = (jnp.zeros((B, H), jnp.float32), jnp.zeros((B, H), jnp.float32))
        (h_n, c_n), y = jax.lax.scan(step, init, layer_in)
        layer_in = y
        hiddens.append(h_n)
        cells.append(c_n)
    return jnp.stack(hiddens, axis=0), jnp.stack(cells, axis=0)


if __name__ == "__main__":
    # Small shapes consistent with the module's forward.
    input_size = 16       # vocab size
    embedding_size = 32
    hidden_size = 32
    num_layers = 2
    dropout_p = 0.1       # inactive in eval mode
    seq_len, batch = 8, 2

    key = jax.random.PRNGKey(0)
    pkey, xkey = jax.random.split(key)
    params = init_encoder_params(pkey, input_size, embedding_size,
                                 hidden_size, num_layers)
    x_tokens = jax.random.randint(xkey, (seq_len, batch), 0, input_size,
                                  dtype=jnp.int32)

    hidden, cell = encoder_forward(params, x_tokens)
    hidden = jax.block_until_ready(hidden)
    cell = jax.block_until_ready(cell)

    # Verify against pure-JAX reference.
    h_ref, c_ref = encoder_forward_ref(params, x_tokens)
    assert hidden.shape == (num_layers, batch, hidden_size)
    assert cell.shape == (num_layers, batch, hidden_size)
    assert jnp.allclose(hidden, h_ref, atol=1e-4, rtol=1e-4), (
        float(jnp.max(jnp.abs(hidden - h_ref))))
    assert jnp.allclose(cell, c_ref, atol=1e-4, rtol=1e-4), (
        float(jnp.max(jnp.abs(cell - c_ref))))

    print("KERNEL_OK")
</pallas_src>

<mosaic_0001>
module attributes {stable_mosaic.version = 11 : i64} {
  func.func @_encoder_lstm_kernel(%arg0: i32, %arg1: i32, %arg2: memref<8x8x512xf32, #tpu.memory_space<vmem>>, %arg3: memref<2x128x512xf32, #tpu.memory_space<vmem>>, %arg4: memref<2x128x512xf32, #tpu.memory_space<vmem>>, %arg5: memref<2x1x512xf32, #tpu.memory_space<vmem>>, %arg6: memref<2x8x128xf32, #tpu.memory_space<vmem>>, %arg7: memref<2x8x128xf32, #tpu.memory_space<vmem>>, %arg8: memref<2x8x128xf32, #tpu.memory_space<vmem>>, %arg9: memref<2x8x128xf32, #tpu.memory_space<vmem>>) attributes {dimension_semantics = [#tpu.dimension_semantics<parallel>, #tpu.dimension_semantics<arbitrary>], iteration_bounds = array<i64: 1, 1>, scalar_prefetch = 0 : i64, scratch_operands = 2 : i64, tpu.core_type = #tpu.core_type<tc>, window_params = [{transform_indices = @transform_0, window_bounds = array<i64: 8, 8, 512>}, {pipeline_mode = #tpu.pipeline_mode<synchronous>, transform_indices = @transform_1, window_bounds = array<i64: 2, 128, 512>}, {pipeline_mode = #tpu.pipeline_mode<synchronous>, transform_indices = @transform_2, window_bounds = array<i64: 2, 128, 512>}, {pipeline_mode = #tpu.pipeline_mode<synchronous>, transform_indices = @transform_3, window_bounds = array<i64: 2, 1, 512>}, {transform_indices = @transform_4, window_bounds = array<i64: 2, 8, 128>}, {transform_indices = @transform_5, window_bounds = array<i64: 2, 8, 128>}]} {
    %c0_i32 = arith.constant 0 : i32
    %0 = arith.cmpi eq, %arg1, %c0_i32 : i32
    %1 = arith.extui %0 : i1 to i32
    %c0_i32_0 = arith.constant 0 : i32
    %2 = arith.cmpi ne, %1, %c0_i32_0 : i32
    scf.if %2 {
      %cst_104 = arith.constant 0.000000e+00 : f32
      %488 = vector.broadcast %cst_104 : f32 to vector<2x8x128xf32>
      %c0_105 = arith.constant 0 : index
      %c0_106 = arith.constant 0 : index
      %c0_107 = arith.constant 0 : index
      %489 = vector.load %arg8[%c0_105, %c0_106, %c0_107] : memref<2x8x128xf32, #tpu.memory_space<vmem>>, vector<2x8x128xf32>
      tpu.vector_store %arg8[%c0_105, %c0_106, %c0_107], %488 {strides = array<i32>} : memref<2x8x128xf32, #tpu.memory_space<vmem>>, vector<2x8x128xf32>,
      %cst_108 = arith.constant 0.000000e+00 : f32
      %490 = vector.broadcast %cst_108 : f32 to vector<2x8x128xf32>
      %c0_109 = arith.constant 0 : index
      %c0_110 = arith.constant 0 : index
      %c0_111 = arith.constant 0 : index
      %491 = vector.load %arg9[%c0_109, %c0_110, %c0_111] : memref<2x8x128xf32, #tpu.memory_space<vmem>>, vector<2x8x128xf32>
      tpu.vector_store %arg9[%c0_109, %c0_110, %c0_111], %490 {strides = array<i32>} : memref<2x8x128xf32, #tpu.memory_space<vmem>>, vector<2x8x128xf32>,
    } else {
    }
    %c0 = arith.constant 0 : index
    %c0_1 = arith.constant 0 : index
    %c0_2 = arith.constant 0 : index
    %3 = vector.load %arg2[%c0, %c0_1, %c0_2] : memref<8x8x512xf32, #tpu.memory_space<vmem>>, vector<8x8x512xf32>
    %4 = vector.shape_cast %3 : vector<8x8x512xf32> to vector<64x512xf32>
    %c0_3 = arith.constant 0 : index
    %c0_4 = arith.constant 0 : index
    %c0_5 = arith.constant 0 : index
    %5 = vector.load %arg3[%c0_3, %c0_4, %c0_5] : memref<2x128x512xf32, #tpu.memory_space<vmem>>, vector<1x128x512xf32>
    %6 = vector.shape_cast %5 : vector<1x128x512xf32> to vector<128x512xf32>
    %c0_6 = arith.constant 0 : index
    %c0_7 = arith.constant 0 : index
    %c0_8 = arith.constant 0 : index
    %7 = vector.load %arg8[%c0_6, %c0_7, %c0_8] : memref<2x8x128xf32, #tpu.memory_space<vmem>>, vector<1x8x128xf32>
    %8 = vector.shape_cast %7 : vector<1x8x128xf32> to vector<8x128xf32>
    %c0_9 = arith.constant 0 : index
    %c0_10 = arith.constant 0 : index
    %c0_11 = arith.constant 0 : index
    %9 = vector.load %arg9[%c0_9, %c0_10, %c0_11] : memref<2x8x128xf32, #tpu.memory_space<vmem>>, vector<1x8x128xf32>
    %10 = vector.shape_cast %9 : vector<1x8x128xf32> to vector<8x128xf32>
    %11 = vector.extract_strided_slice %4 {offsets = [0, 0], sizes = [8, 512], strides = [1, 1]} : vector<64x512xf32> to vector<8x512xf32>
    %cst = arith.constant dense<0.000000e+00> : vector<8x512xf32>
    %12 = tpu.matmul %8, %6, %cst {dimension_numbers = #tpu.dot_dimension_numbers<[1], [0], [0], [1], [0, 0, 1, 1], [], []>} : vector<8x128xf32>, vector<128x512xf32>, vector<8x512xf32> -> vector<8x512xf32>
    %13 = arith.addf %11, %12 : vector<8x512xf32>
    %14 = vector.extract_strided_slice %13 {offsets = [0, 0], sizes = [8, 128], strides = [1, 1]} : vector<8x512xf32> to vector<8x128xf32>
    %15 = arith.negf %14 : vector<8x128xf32>
    %16 = math.exp %15 : vector<8x128xf32>
    %cst_12 = arith.constant 1.000000e+00 : f32
    %17 = vector.broadcast %cst_12 : f32 to vector<8x128xf32>
    %18 = arith.addf %17, %16 : vector<8x128xf32>
    %19 = arith.divf %17, %18 : vector<8x128xf32>
    %20 = vector.extract_strided_slice %13 {offsets = [0, 128], sizes = [8, 128], strides = [1, 1]} : vector<8x512xf32> to vector<8x128xf32>
    %21 = arith.negf %20 : vector<8x128xf32>
    %22 = math.exp %21 : vector<8x128xf32>
    %cst_13 = arith.constant 1.000000e+00 : f32
    %23 = vector.broadcast %cst_13 : f32 to vector<8x128xf32>
    %24 = arith.addf %23, %22 : vector<8x128xf32>
    %25 = arith.divf %23, %24 : vector<8x128xf32>
    %26 = vector.extract_strided_slice %13 {offsets = [0, 256], sizes = [8, 128], strides = [1, 1]} : vector<8x512xf32> to vector<8x128xf32>
    %27 = math.tanh %26 : vector<8x128xf32>
    %28 = vector.extract_strided_slice %13 {offsets = [0, 384], sizes = [8, 128], strides = [1, 1]} : vector<8x512xf32> to vector<8x128xf32>
    %29 = arith.negf %28 : vector<8x128xf32>
    %30 = math.exp %29 : vector<8x128xf32>
    %cst_14 = arith.constant 1.000000e+00 : f32
    %31 = vector.broadcast %cst_14 : f32 to vector<8x128xf32>
    %32 = arith.addf %31, %30 : vector<8x128xf32>
    %33 = arith.divf %31, %32 : vector<8x128xf32>
    %34 = arith.mulf %25, %10 : vector<8x128xf32>
    %35 = arith.mulf %19, %27 : vector<8x128xf32>
    %36 = arith.addf %34, %35 : vector<8x128xf32>
    %37 = math.tanh %36 : vector<8x128xf32>
    %38 = arith.mulf %33, %37 : vector<8x128xf32>
    %39 = vector.extract_strided_slice %4 {offsets = [8, 0], sizes = [8, 512], strides = [1, 1]} : vector<64x512xf32> to vector<8x512xf32>
    %cst_15 = arith.constant dense<0.000000e+00> : vector<8x512xf32>
    %40 = tpu.matmul %38, %6, %cst_15 {dimension_numbers = #tpu.dot_dimension_numbers<[1], [0], [0], [1], [0, 0, 1, 1], [], []>} : vector<8x128xf32>, vector<128x512xf32>, vector<8x512xf32> -> vector<8x512xf32>
    %41 = arith.addf %39, %40 : vector<8x512xf32>
    %42 = vector.extract_strided_slice %41 {offsets = [0, 0], sizes = [8, 128], strides = [1, 1]} : vector<8x512xf32> to vector<8x128xf32>
    %43 = arith.negf %42 : vector<8x128xf32>
    %44 = math.exp %43 : vector<8x128xf32>
    %cst_16 = arith.constant 1.000000e+00 : f32
    %45 = vector.broadcast %cst_16 : f32 to vector<8x128xf32>
    %46 = arith.addf %45, %44 : vector<8x128xf32>
    %47 = arith.divf %45, %46 : vector<8x128xf32>
    %48 = vector.extract_strided_slice %41 {offsets = [0, 128], sizes = [8, 128], strides = [1, 1]} : vector<8x512xf32> to vector<8x128xf32>
    %49 = arith.negf %48 : vector<8x128xf32>
    %50 = math.exp %49 : vector<8x128xf32>
    %cst_17 = arith.constant 1.000000e+00 : f32
    %51 = vector.broadcast %cst_17 : f32 to vector<8x128xf32>
    %52 = arith.addf %51, %50 : vector<8x128xf32>
    %53 = arith.divf %51, %52 : vector<8x128xf32>
    %54 = vector.extract_strided_slice %41 {offsets = [0, 256], sizes = [8, 128], strides = [1, 1]} : vector<8x512xf32> to vector<8x128xf32>
    %55 = math.tanh %54 : vector<8x128xf32>
    %56 = vector.extract_strided_slice %41 {offsets = [0, 384], sizes = [8, 128], strides = [1, 1]} : vector<8x512xf32> to vector<8x128xf32>
    %57 = arith.negf %56 : vector<8x128xf32>
    %58 = math.exp %57 : vector<8x128xf32>
    %cst_18 = arith.constant 1.000000e+00 : f32
    %59 = vector.broadcast %cst_18 : f32 to vector<8x128xf32>
    %60 = arith.addf %59, %58 : vector<8x128xf32>
    %61 = arith.divf %59, %60 : vector<8x128xf32>
    %62 = arith.mulf %53, %36 : vector<8x128xf32>
    %63 = arith.mulf %47, %55 : vector<8x128xf32>
    %64 = arith.addf %62, %63 : vector<8x128xf32>
    %65 = math.tanh %64 : vector<8x128xf32>
    %66 = arith.mulf %61, %65 : vector<8x128xf32>
    %67 = vector.extract_strided_slice %4 {offsets = [16, 0], sizes = [8, 512], strides = [1, 1]} : vector<64x512xf32> to vector<8x512xf32>
    %cst_19 = arith.constant dense<0.000000e+00> : vector<8x512xf32>
    %68 = tpu.matmul %66, %6, %cst_19 {dimension_numbers = #tpu.dot_dimension_numbers<[1], [0], [0], [1], [0, 0, 1, 1], [], []>} : vector<8x128xf32>, vector<128x512xf32>, vector<8x512xf32> -> vector<8x512xf32>
    %69 = arith.addf %67, %68 : vector<8x512xf32>
    %70 = vector.extract_strided_slice %69 {offsets = [0, 0], sizes = [8, 128], strides = [1, 1]} : vector<8x512xf32> to vector<8x128xf32>
    %71 = arith.negf %70 : vector<8x128xf32>
    %72 = math.exp %71 : vector<8x128xf32>
    %cst_20 = arith.constant 1.000000e+00 : f32
    %73 = vector.broadcast %cst_20 : f32 to vector<8x128xf32>
    %74 = arith.addf %73, %72 : vector<8x128xf32>
    %75 = arith.divf %73, %74 : vector<8x128xf32>
    %76 = vector.extract_strided_slice %69 {offsets = [0, 128], sizes = [8, 128], strides = [1, 1]} : vector<8x512xf32> to vector<8x128xf32>
    %77 = arith.negf %76 : vector<8x128xf32>
    %78 = math.exp %77 : vector<8x128xf32>
    %cst_21 = arith.constant 1.000000e+00 : f32
    %79 = vector.broadcast %cst_21 : f32 to vector<8x128xf32>
    %80 = arith.addf %79, %78 : vector<8x128xf32>
    %81 = arith.divf %79, %80 : vector<8x128xf32>
    %82 = vector.extract_strided_slice %69 {offsets = [0, 256], sizes = [8, 128], strides = [1, 1]} : vector<8x512xf32> to vector<8x128xf32>
    %83 = math.tanh %82 : vector<8x128xf32>
    %84 = vector.extract_strided_slice %69 {offsets = [0, 384], sizes = [8, 128], strides = [1, 1]} : vector<8x512xf32> to vector<8x128xf32>
    %85 = arith.negf %84 : vector<8x128xf32>
    %86 = math.exp %85 : vector<8x128xf32>
    %cst_22 = arith.constant 1.000000e+00 : f32
    %87 = vector.broadcast %cst_22 : f32 to vector<8x128xf32>
    %88 = arith.addf %87, %86 : vector<8x128xf32>
    %89 = arith.divf %87, %88 : vector<8x128xf32>
    %90 = arith.mulf %81, %64 : vector<8x128xf32>
    %91 = arith.mulf %75, %83 : vector<8x128xf32>
    %92 = arith.addf %90, %91 : vector<8x128xf32>
    %93 = math.tanh %92 : vector<8x128xf32>
    %94 = arith.mulf %89, %93 : vector<8x128xf32>
    %95 = vector.extract_strided_slice %4 {offsets = [24, 0], sizes = [8, 512], strides = [1, 1]} : vector<64x512xf32> to vector<8x512xf32>
    %cst_23 = arith.constant dense<0.000000e+00> : vector<8x512xf32>
    %96 = tpu.matmul %94, %6, %cst_23 {dimension_numbers = #tpu.dot_dimension_numbers<[1], [0], [0], [1], [0, 0, 1, 1], [], []>} : vector<8x128xf32>, vector<128x512xf32>, vector<8x512xf32> -> vector<8x512xf32>
    %97 = arith.addf %95, %96 : vector<8x512xf32>
    %98 = vector.extract_strided_slice %97 {offsets = [0, 0], sizes = [8, 128], strides = [1, 1]} : vector<8x512xf32> to vector<8x128xf32>
    %99 = arith.negf %98 : vector<8x128xf32>
    %100 = math.exp %99 : vector<8x128xf32>
    %cst_24 = arith.constant 1.000000e+00 : f32
    %101 = vector.broadcast %cst_24 : f32 to vector<8x128xf32>
    %102 = arith.addf %101, %100 : vector<8x128xf32>
    %103 = arith.divf %101, %102 : vector<8x128xf32>
    %104 = vector.extract_strided_slice %97 {offsets = [0, 128], sizes = [8, 128], strides = [1, 1]} : vector<8x512xf32> to vector<8x128xf32>
    %105 = arith.negf %104 : vector<8x128xf32>
    %106 = math.exp %105 : vector<8x128xf32>
    %cst_25 = arith.constant 1.000000e+00 : f32
    %107 = vector.broadcast %cst_25 : f32 to vector<8x128xf32>
    %108 = arith.addf %107, %106 : vector<8x128xf32>
    %109 = arith.divf %107, %108 : vector<8x128xf32>
    %110 = vector.extract_strided_slice %97 {offsets = [0, 256], sizes = [8, 128], strides = [1, 1]} : vector<8x512xf32> to vector<8x128xf32>
    %111 = math.tanh %110 : vector<8x128xf32>
    %112 = vector.extract_strided_slice %97 {offsets = [0, 384], sizes = [8, 128], strides = [1, 1]} : vector<8x512xf32> to vector<8x128xf32>
    %113 = arith.negf %112 : vector<8x128xf32>
    %114 = math.exp %113 : vector<8x128xf32>
    %cst_26 = arith.constant 1.000000e+00 : f32
    %115 = vector.broadcast %cst_26 : f32 to vector<8x128xf32>
    %116 = arith.addf %115, %114 : vector<8x128xf32>
    %117 = arith.divf %115, %116 : vector<8x128xf32>
    %118 = arith.mulf %109, %92 : vector<8x128xf32>
    %119 = arith.mulf %103, %111 : vector<8x128xf32>
    %120 = arith.addf %118, %119 : vector<8x128xf32>
    %121 = math.tanh %120 : vector<8x128xf32>
    %122 = arith.mulf %117, %121 : vector<8x128xf32>
    %123 = vector.extract_strided_slice %4 {offsets = [32, 0], sizes = [8, 512], strides = [1, 1]} : vector<64x512xf32> to vector<8x512xf32>
    %cst_27 = arith.constant dense<0.000000e+00> : vector<8x512xf32>
    %124 = tpu.matmul %122, %6, %cst_27 {dimension_numbers = #tpu.dot_dimension_numbers<[1], [0], [0], [1], [0, 0, 1, 1], [], []>} : vector<8x128xf32>, vector<128x512xf32>, vector<8x512xf32> -> vector<8x512xf32>
    %125 = arith.addf %123, %124 : vector<8x512xf32>
    %126 = vector.extract_strided_slice %125 {offsets = [0, 0], sizes = [8, 128], strides = [1, 1]} : vector<8x512xf32> to vector<8x128xf32>
    %127 = arith.negf %126 : vector<8x128xf32>
    %128 = math.exp %127 : vector<8x128xf32>
    %cst_28 = arith.constant 1.000000e+00 : f32
    %129 = vector.broadcast %cst_28 : f32 to vector<8x128xf32>
    %130 = arith.addf %129, %128 : vector<8x128xf32>
    %131 = arith.divf %129, %130 : vector<8x128xf32>
    %132 = vector.extract_strided_slice %125 {offsets = [0, 128], sizes = [8, 128], strides = [1, 1]} : vector<8x512xf32> to vector<8x128xf32>
    %133 = arith.negf %132 : vector<8x128xf32>
    %134 = math.exp %133 : vector<8x128xf32>
    %cst_29 = arith.constant 1.000000e+00 : f32
    %135 = vector.broadcast %cst_29 : f32 to vector<8x128xf32>
    %136 = arith.addf %135, %134 : vector<8x128xf32>
    %137 = arith.divf %135, %136 : vector<8x128xf32>
    %138 = vector.extract_strided_slice %125 {offsets = [0, 256], sizes = [8, 128], strides = [1, 1]} : vector<8x512xf32> to vector<8x128xf32>
    %139 = math.tanh %138 : vector<8x128xf32>
    %140 = vector.extract_strided_slice %125 {offsets = [0, 384], sizes = [8, 128], strides = [1, 1]} : vector<8x512xf32> to vector<8x128xf32>
    %141 = arith.negf %140 : vector<8x128xf32>
    %142 = math.exp %141 : vector<8x128xf32>
    %cst_30 = arith.constant 1.000000e+00 : f32
    %143 = vector.broadcast %cst_30 : f32 to vector<8x128xf32>
    %144 = arith.addf %143, %142 : vector<8x128xf32>
    %145 = arith.divf %143, %144 : vector<8x128xf32>
    %146 = arith.mulf %137, %120 : vector<8x128xf32>
    %147 = arith.mulf %131, %139 : vector<8x128xf32>
    %148 = arith.addf %146, %147 : vector<8x128xf32>
    %149 = math.tanh %148 : vector<8x128xf32>
    %150 = arith.mulf %145, %149 : vector<8x128xf32>
    %151 = vector.extract_strided_slice %4 {offsets = [40, 0], sizes = [8, 512], strides = [1, 1]} : vector<64x512xf32> to vector<8x512xf32>
    %cst_31 = arith.constant dense<0.000000e+00> : vector<8x512xf32>
    %152 = tpu.matmul %150, %6, %cst_31 {dimension_numbers = #tpu.dot_dimension_numbers<[1], [0], [0], [1], [0, 0, 1, 1], [], []>} : vector<8x128xf32>, vector<128x512xf32>, vector<8x512xf32> -> vector<8x512xf32>
    %153 = arith.addf %151, %152 : vector<8x512xf32>
    %154 = vector.extract_strided_slice %153 {offsets = [0, 0], sizes = [8, 128], strides = [1, 1]} : vector<8x512xf32> to vector<8x128xf32>
    %155 = arith.negf %154 : vector<8x128xf32>
    %156 = math.exp %155 : vector<8x128xf32>
    %cst_32 = arith.constant 1.000000e+00 : f32
    %157 = vector.broadcast %cst_32 : f32 to vector<8x128xf32>
    %158 = arith.addf %157, %156 : vector<8x128xf32>
    %159 = arith.divf %157, %158 : vector<8x128xf32>
    %160 = vector.extract_strided_slice %153 {offsets = [0, 128], sizes = [8, 128], strides = [1, 1]} : vector<8x512xf32> to vector<8x128xf32>
    %161 = arith.negf %160 : vector<8x128xf32>
    %162 = math.exp %161 : vector<8x128xf32>
    %cst_33 = arith.constant 1.000000e+00 : f32
    %163 = vector.broadcast %cst_33 : f32 to vector<8x128xf32>
    %164 = arith.addf %163, %162 : vector<8x128xf32>
    %165 = arith.divf %163, %164 : vector<8x128xf32>
    %166 = vector.extract_strided_slice %153 {offsets = [0, 256], sizes = [8, 128], strides = [1, 1]} : vector<8x512xf32> to vector<8x128xf32>
    %167 = math.tanh %166 : vector<8x128xf32>
    %168 = vector.extract_strided_slice %153 {offsets = [0, 384], sizes = [8, 128], strides = [1, 1]} : vector<8x512xf32> to vector<8x128xf32>
    %169 = arith.negf %168 : vector<8x128xf32>
    %170 = math.exp %169 : vector<8x128xf32>
    %cst_34 = arith.constant 1.000000e+00 : f32
    %171 = vector.broadcast %cst_34 : f32 to vector<8x128xf32>
    %172 = arith.addf %171, %170 : vector<8x128xf32>
    %173 = arith.divf %171, %172 : vector<8x128xf32>
    %174 = arith.mulf %165, %148 : vector<8x128xf32>
    %175 = arith.mulf %159, %167 : vector<8x128xf32>
    %176 = arith.addf %174, %175 : vector<8x128xf32>
    %177 = math.tanh %176 : vector<8x128xf32>
    %178 = arith.mulf %173, %177 : vector<8x128xf32>
    %179 = vector.extract_strided_slice %4 {offsets = [48, 0], sizes = [8, 512], strides = [1, 1]} : vector<64x512xf32> to vector<8x512xf32>
    %cst_35 = arith.constant dense<0.000000e+00> : vector<8x512xf32>
    %180 = tpu.matmul %178, %6, %cst_35 {dimension_numbers = #tpu.dot_dimension_numbers<[1], [0], [0], [1], [0, 0, 1, 1], [], []>} : vector<8x128xf32>, vector<128x512xf32>, vector<8x512xf32> -> vector<8x512xf32>
    %181 = arith.addf %179, %180 : vector<8x512xf32>
    %182 = vector.extract_strided_slice %181 {offsets = [0, 0], sizes = [8, 128], strides = [1, 1]} : vector<8x512xf32> to vector<8x128xf32>
    %183 = arith.negf %182 : vector<8x128xf32>
    %184 = math.exp %183 : vector<8x128xf32>
    %cst_36 = arith.constant 1.000000e+00 : f32
    %185 = vector.broadcast %cst_36 : f32 to vector<8x128xf32>
    %186 = arith.addf %185, %184 : vector<8x128xf32>
    %187 = arith.divf %185, %186 : vector<8x128xf32>
    %188 = vector.extract_strided_slice %181 {offsets = [0, 128], sizes = [8, 128], strides = [1, 1]} : vector<8x512xf32> to vector<8x128xf32>
    %189 = arith.negf %188 : vector<8x128xf32>
    %190 = math.exp %189 : vector<8x128xf32>
    %cst_37 = arith.constant 1.000000e+00 : f32
    %191 = vector.broadcast %cst_37 : f32 to vector<8x128xf32>
    %192 = arith.addf %191, %190 : vector<8x128xf32>
    %193 = arith.divf %191, %192 : vector<8x128xf32>
    %194 = vector.extract_strided_slice %181 {offsets = [0, 256], sizes = [8, 128], strides = [1, 1]} : vector<8x512xf32> to vector<8x128xf32>
    %195 = math.tanh %194 : vector<8x128xf32>
    %196 = vector.extract_strided_slice %181 {offsets = [0, 384], sizes = [8, 128], strides = [1, 1]} : vector<8x512xf32> to vector<8x128xf32>
    %197 = arith.negf %196 : vector<8x128xf32>
    %198 = math.exp %197 : vector<8x128xf32>
    %cst_38 = arith.constant 1.000000e+00 : f32
    %199 = vector.broadcast %cst_38 : f32 to vector<8x128xf32>
    %200 = arith.addf %199, %198 : vector<8x128xf32>
    %201 = arith.divf %199, %200 : vector<8x128xf32>
    %202 = arith.mulf %193, %176 : vector<8x128xf32>
    %203 = arith.mulf %187, %195 : vector<8x128xf32>
    %204 = arith.addf %202, %203 : vector<8x128xf32>
    %205 = math.tanh %204 : vector<8x128xf32>
    %206 = arith.mulf %201, %205 : vector<8x128xf32>
    %207 = vector.extract_strided_slice %4 {offsets = [56, 0], sizes = [8, 512], strides = [1, 1]} : vector<64x512xf32> to vector<8x512xf32>
    %cst_39 = arith.constant dense<0.000000e+00> : vector<8x512xf32>
    %208 = tpu.matmul %206, %6, %cst_39 {dimension_numbers = #tpu.dot_dimension_numbers<[1], [0], [0], [1], [0, 0, 1, 1], [], []>} : vector<8x128xf32>, vector<128x512xf32>, vector<8x512xf32> -> vector<8x512xf32>
    %209 = arith.addf %207, %208 : vector<8x512xf32>
    %210 = vector.extract_strided_slice %209 {offsets = [0, 0], sizes = [8, 128], strides = [1, 1]} : vector<8x512xf32> to vector<8x128xf32>
    %211 = arith.negf %210 : vector<8x128xf32>
    %212 = math.exp %211 : vector<8x128xf32>
    %cst_40 = arith.constant 1.000000e+00 : f32
    %213 = vector.broadcast %cst_40 : f32 to vector<8x128xf32>
    %214 = arith.addf %213, %212 : vector<8x128xf32>
    %215 = arith.divf %213, %214 : vector<8x128xf32>
    %216 = vector.extract_strided_slice %209 {offsets = [0, 128], sizes = [8, 128], strides = [1, 1]} : vector<8x512xf32> to vector<8x128xf32>
    %217 = arith.negf %216 : vector<8x128xf32>
    %218 = math.exp %217 : vector<8x128xf32>
    %cst_41 = arith.constant 1.000000e+00 : f32
    %219 = vector.broadcast %cst_41 : f32 to vector<8x128xf32>
    %220 = arith.addf %219, %218 : vector<8x128xf32>
    %221 = arith.divf %219, %220 : vector<8x128xf32>
    %222 = vector.extract_strided_slice %209 {offsets = [0, 256], sizes = [8, 128], strides = [1, 1]} : vector<8x512xf32> to vector<8x128xf32>
    %223 = math.tanh %222 : vector<8x128xf32>
    %224 = vector.extract_strided_slice %209 {offsets = [0, 384], sizes = [8, 128], strides = [1, 1]} : vector<8x512xf32> to vector<8x128xf32>
    %225 = arith.negf %224 : vector<8x128xf32>
    %226 = math.exp %225 : vector<8x128xf32>
    %cst_42 = arith.constant 1.000000e+00 : f32
    %227 = vector.broadcast %cst_42 : f32 to vector<8x128xf32>
    %228 = arith.addf %227, %226 : vector<8x128xf32>
    %229 = arith.divf %227, %228 : vector<8x128xf32>
    %230 = arith.mulf %221, %204 : vector<8x128xf32>
    %231 = arith.mulf %215, %223 : vector<8x128xf32>
    %232 = arith.addf %230, %231 : vector<8x128xf32>
    %233 = math.tanh %232 : vector<8x128xf32>
    %234 = arith.mulf %229, %233 : vector<8x128xf32>
    %c0_43 = arith.constant 0 : index
    %c0_44 = arith.constant 0 : index
    %c0_45 = arith.constant 0 : index
    %235 = vector.load %arg8[%c0_43, %c0_44, %c0_45] : memref<2x8x128xf32, #tpu.memory_space<vmem>>, vector<1x8x128xf32>
    %236 = vector.shape_cast %235 : vector<1x8x128xf32> to vector<8x128xf32>
    %237 = vector.shape_cast %234 : vector<8x128xf32> to vector<1x8x128xf32>
    tpu.vector_store %arg8[%c0_43, %c0_44, %c0_45], %237 {strides = array<i32>} : memref<2x8x128xf32, #tpu.memory_space<vmem>>, vector<1x8x128xf32>,
    %c0_46 = arith.constant 0 : index
    %c0_47 = arith.constant 0 : index
    %c0_48 = arith.constant 0 : index
    %238 = vector.load %arg9[%c0_46, %c0_47, %c0_48] : memref<2x8x128xf32, #tpu.memory_space<vmem>>, vector<1x8x128xf32>
    %239 = vector.shape_cast %238 : vector<1x8x128xf32> to vector<8x128xf32>
    %240 = vector.shape_cast %232 : vector<8x128xf32> to vector<1x8x128xf32>
    tpu.vector_store %arg9[%c0_46, %c0_47, %c0_48], %240 {strides = array<i32>} : memref<2x8x128xf32, #tpu.memory_space<vmem>>, vector<1x8x128xf32>,
    %241 = tpu.concatenate %38, %66, %94, %122, %150, %178, %206, %234 in 0 : vector<8x128xf32>, vector<8x128xf32>, vector<8x128xf32>, vector<8x128xf32>, vector<8x128xf32>, vector<8x128xf32>, vector<8x128xf32>, vector<8x128xf32> -> vector<64x128xf32>
    %c1 = arith.constant 1 : index
    %c0_49 = arith.constant 0 : index
    %c0_50 = arith.constant 0 : index
    %242 = vector.load %arg4[%c1, %c0_49, %c0_50] : memref<2x128x512xf32, #tpu.memory_space<vmem>>, vector<1x128x512xf32>
    %243 = vector.shape_cast %242 : vector<1x128x512xf32> to vector<128x512xf32>
    %cst_51 = arith.constant dense<0.000000e+00> : vector<64x512xf32>
    %244 = tpu.matmul %241, %243, %cst_51 {dimension_numbers = #tpu.dot_dimension_numbers<[1], [0], [0], [1], [0, 0, 1, 1], [], []>} : vector<64x128xf32>, vector<128x512xf32>, vector<64x512xf32> -> vector<64x512xf32>
    %c1_52 = arith.constant 1 : index
    %c0_53 = arith.constant 0 : index
    %c0_54 = arith.constant 0 : index
    %245 = vector.load %arg5[%c1_52, %c0_53, %c0_54] : memref<2x1x512xf32, #tpu.memory_space<vmem>>, vector<1x1x512xf32>
    %246 = vector.shape_cast %245 : vector<1x1x512xf32> to vector<1x512xf32>
    %247 = vector.broadcast %246 : vector<1x512xf32> to vector<64x512xf32>
    %248 = arith.addf %244, %247 : vector<64x512xf32>
    %c1_55 = arith.constant 1 : index
    %c0_56 = arith.constant 0 : index
    %c0_57 = arith.constant 0 : index
    %249 = vector.load %arg3[%c1_55, %c0_56, %c0_57] : memref<2x128x512xf32, #tpu.memory_space<vmem>>, vector<1x128x512xf32>
    %250 = vector.shape_cast %249 : vector<1x128x512xf32> to vector<128x512xf32>
    %c1_58 = arith.constant 1 : index
    %c0_59 = arith.constant 0 : index
    %c0_60 = arith.constant 0 : index
    %251 = vector.load %arg8[%c1_58, %c0_59, %c0_60] : memref<2x8x128xf32, #tpu.memory_space<vmem>>, vector<1x8x128xf32>
    %252 = vector.shape_cast %251 : vector<1x8x128xf32> to vector<8x128xf32>
    %c1_61 = arith.constant 1 : index
    %c0_62 = arith.constant 0 : index
    %c0_63 = arith.constant 0 : index
    %253 = vector.load %arg9[%c1_61, %c0_62, %c0_63] : memref<2x8x128xf32, #tpu.memory_space<vmem>>, vector<1x8x128xf32>
    %254 = vector.shape_cast %253 : vector<1x8x128xf32> to vector<8x128xf32>
    %255 = vector.extract_strided_slice %248 {offsets = [0, 0], sizes = [8, 512], strides = [1, 1]} : vector<64x512xf32> to vector<8x512xf32>
    %cst_64 = arith.constant dense<0.000000e+00> : vector<8x512xf32>
    %256 = tpu.matmul %252, %250, %cst_64 {dimension_numbers = #tpu.dot_dimension_numbers<[1], [0], [0], [1], [0, 0, 1, 1], [], []>} : vector<8x128xf32>, vector<128x512xf32>, vector<8x512xf32> -> vector<8x512xf32>
    %257 = arith.addf %255, %256 : vector<8x512xf32>
    %258 = vector.extract_strided_slice %257 {offsets = [0, 0], sizes = [8, 128], strides = [1, 1]} : vector<8x512xf32> to vector<8x128xf32>
    %259 = arith.negf %258 : vector<8x128xf32>
    %260 = math.exp %259 : vector<8x128xf32>
    %cst_65 = arith.constant 1.000000e+00 : f32
    %261 = vector.broadcast %cst_65 : f32 to vector<8x128xf32>
    %262 = arith.addf %261, %260 : vector<8x128xf32>
    %263 = arith.divf %261, %262 : vector<8x128xf32>
    %264 = vector.extract_strided_slice %257 {offsets = [0, 128], sizes = [8, 128], strides = [1, 1]} : vector<8x512xf32> to vector<8x128xf32>
    %265 = arith.negf %264 : vector<8x128xf32>
    %266 = math.exp %265 : vector<8x128xf32>
    %cst_66 = arith.constant 1.000000e+00 : f32
    %267 = vector.broadcast %cst_66 : f32 to vector<8x128xf32>
    %268 = arith.addf %267, %266 : vector<8x128xf32>
    %269 = arith.divf %267, %268 : vector<8x128xf32>
    %270 = vector.extract_strided_slice %257 {offsets = [0, 256], sizes = [8, 128], strides = [1, 1]} : vector<8x512xf32> to vector<8x128xf32>
    %271 = math.tanh %270 : vector<8x128xf32>
    %272 = vector.extract_strided_slice %257 {offsets = [0, 384], sizes = [8, 128], strides = [1, 1]} : vector<8x512xf32> to vector<8x128xf32>
    %273 = arith.negf %272 : vector<8x128xf32>
    %274 = math.exp %273 : vector<8x128xf32>
    %cst_67 = arith.constant 1.000000e+00 : f32
    %275 = vector.broadcast %cst_67 : f32 to vector<8x128xf32>
    %276 = arith.addf %275, %274 : vector<8x128xf32>
    %277 = arith.divf %275, %276 : vector<8x128xf32>
    %278 = arith.mulf %269, %254 : vector<8x128xf32>
    %279 = arith.mulf %263, %271 : vector<8x128xf32>
    %280 = arith.addf %278, %279 : vector<8x128xf32>
    %281 = math.tanh %280 : vector<8x128xf32>
    %282 = arith.mulf %277, %281 : vector<8x128xf32>
    %283 = vector.extract_strided_slice %248 {offsets = [8, 0], sizes = [8, 512], strides = [1, 1]} : vector<64x512xf32> to vector<8x512xf32>
    %cst_68 = arith.constant dense<0.000000e+00> : vector<8x512xf32>
    %284 = tpu.matmul %282, %250, %cst_68 {dimension_numbers = #tpu.dot_dimension_numbers<[1], [0], [0], [1], [0, 0, 1, 1], [], []>} : vector<8x128xf32>, vector<128x512xf32>, vector<8x512xf32> -> vector<8x512xf32>
    %285 = arith.addf %283, %284 : vector<8x512xf32>
    %286 = vector.extract_strided_slice %285 {offsets = [0, 0], sizes = [8, 128], strides = [1, 1]} : vector<8x512xf32> to vector<8x128xf32>
    %287 = arith.negf %286 : vector<8x128xf32>
    %288 = math.exp %287 : vector<8x128xf32>
    %cst_69 = arith.constant 1.000000e+00 : f32
    %289 = vector.broadcast %cst_69 : f32 to vector<8x128xf32>
    %290 = arith.addf %289, %288 : vector<8x128xf32>
    %291 = arith.divf %289, %290 : vector<8x128xf32>
    %292 = vector.extract_strided_slice %285 {offsets = [0, 128], sizes = [8, 128], strides = [1, 1]} : vector<8x512xf32> to vector<8x128xf32>
    %293 = arith.negf %292 : vector<8x128xf32>
    %294 = math.exp %293 : vector<8x128xf32>
    %cst_70 = arith.constant 1.000000e+00 : f32
    %295 = vector.broadcast %cst_70 : f32 to vector<8x128xf32>
    %296 = arith.addf %295, %294 : vector<8x128xf32>
    %297 = arith.divf %295, %296 : vector<8x128xf32>
    %298 = vector.extract_strided_slice %285 {offsets = [0, 256], sizes = [8, 128], strides = [1, 1]} : vector<8x512xf32> to vector<8x128xf32>
    %299 = math.tanh %298 : vector<8x128xf32>
    %300 = vector.extract_strided_slice %285 {offsets = [0, 384], sizes = [8, 128], strides = [1, 1]} : vector<8x512xf32> to vector<8x128xf32>
    %301 = arith.negf %300 : vector<8x128xf32>
    %302 = math.exp %301 : vector<8x128xf32>
    %cst_71 = arith.constant 1.000000e+00 : f32
    %303 = vector.broadcast %cst_71 : f32 to vector<8x128xf32>
    %304 = arith.addf %303, %302 : vector<8x128xf32>
    %305 = arith.divf %303, %304 : vector<8x128xf32>
    %306 = arith.mulf %297, %280 : vector<8x128xf32>
    %307 = arith.mulf %291, %299 : vector<8x128xf32>
    %308 = arith.addf %306, %307 : vector<8x128xf32>
    %309 = math.tanh %308 : vector<8x128xf32>
    %310 = arith.mulf %305, %309 : vector<8x128xf32>
    %311 = vector.extract_strided_slice %248 {offsets = [16, 0], sizes = [8, 512], strides = [1, 1]} : vector<64x512xf32> to vector<8x512xf32>
    %cst_72 = arith.constant dense<0.000000e+00> : vector<8x512xf32>
    %312 = tpu.matmul %310, %250, %cst_72 {dimension_numbers = #tpu.dot_dimension_numbers<[1], [0], [0], [1], [0, 0, 1, 1], [], []>} : vector<8x128xf32>, vector<128x512xf32>, vector<8x512xf32> -> vector<8x512xf32>
    %313 = arith.addf %311, %312 : vector<8x512xf32>
    %314 = vector.extract_strided_slice %313 {offsets = [0, 0], sizes = [8, 128], strides = [1, 1]} : vector<8x512xf32> to vector<8x128xf32>
    %315 = arith.negf %314 : vector<8x128xf32>
    %316 = math.exp %315 : vector<8x128xf32>
    %cst_73 = arith.constant 1.000000e+00 : f32
    %317 = vector.broadcast %cst_73 : f32 to vector<8x128xf32>
    %318 = arith.addf %317, %316 : vector<8x128xf32>
    %319 = arith.divf %317, %318 : vector<8x128xf32>
    %320 = vector.extract_strided_slice %313 {offsets = [0, 128], sizes = [8, 128], strides = [1, 1]} : vector<8x512xf32> to vector<8x128xf32>
    %321 = arith.negf %320 : vector<8x128xf32>
    %322 = math.exp %321 : vector<8x128xf32>
    %cst_74 = arith.constant 1.000000e+00 : f32
    %323 = vector.broadcast %cst_74 : f32 to vector<8x128xf32>
    %324 = arith.addf %323, %322 : vector<8x128xf32>
    %325 = arith.divf %323, %324 : vector<8x128xf32>
    %326 = vector.extract_strided_slice %313 {offsets = [0, 256], sizes = [8, 128], strides = [1, 1]} : vector<8x512xf32> to vector<8x128xf32>
    %327 = math.tanh %326 : vector<8x128xf32>
    %328 = vector.extract_strided_slice %313 {offsets = [0, 384], sizes = [8, 128], strides = [1, 1]} : vector<8x512xf32> to vector<8x128xf32>
    %329 = arith.negf %328 : vector<8x128xf32>
    %330 = math.exp %329 : vector<8x128xf32>
    %cst_75 = arith.constant 1.000000e+00 : f32
    %331 = vector.broadcast %cst_75 : f32 to vector<8x128xf32>
    %332 = arith.addf %331, %330 : vector<8x128xf32>
    %333 = arith.divf %331, %332 : vector<8x128xf32>
    %334 = arith.mulf %325, %308 : vector<8x128xf32>
    %335 = arith.mulf %319, %327 : vector<8x128xf32>
    %336 = arith.addf %334, %335 : vector<8x128xf32>
    %337 = math.tanh %336 : vector<8x128xf32>
    %338 = arith.mulf %333, %337 : vector<8x128xf32>
    %339 = vector.extract_strided_slice %248 {offsets = [24, 0], sizes = [8, 512], strides = [1, 1]} : vector<64x512xf32> to vector<8x512xf32>
    %cst_76 = arith.constant dense<0.000000e+00> : vector<8x512xf32>
    %340 = tpu.matmul %338, %250, %cst_76 {dimension_numbers = #tpu.dot_dimension_numbers<[1], [0], [0], [1], [0, 0, 1, 1], [], []>} : vector<8x128xf32>, vector<128x512xf32>, vector<8x512xf32> -> vector<8x512xf32>
    %341 = arith.addf %339, %340 : vector<8x512xf32>
    %342 = vector.extract_strided_slice %341 {offsets = [0, 0], sizes = [8, 128], strides = [1, 1]} : vector<8x512xf32> to vector<8x128xf32>
    %343 = arith.negf %342 : vector<8x128xf32>
    %344 = math.exp %343 : vector<8x128xf32>
    %cst_77 = arith.constant 1.000000e+00 : f32
    %345 = vector.broadcast %cst_77 : f32 to vector<8x128xf32>
    %346 = arith.addf %345, %344 : vector<8x128xf32>
    %347 = arith.divf %345, %346 : vector<8x128xf32>
    %348 = vector.extract_strided_slice %341 {offsets = [0, 128], sizes = [8, 128], strides = [1, 1]} : vector<8x512xf32> to vector<8x128xf32>
    %349 = arith.negf %348 : vector<8x128xf32>
    %350 = math.exp %349 : vector<8x128xf32>
    %cst_78 = arith.constant 1.000000e+00 : f32
    %351 = vector.broadcast %cst_78 : f32 to vector<8x128xf32>
    %352 = arith.addf %351, %350 : vector<8x128xf32>
    %353 = arith.divf %351, %352 : vector<8x128xf32>
    %354 = vector.extract_strided_slice %341 {offsets = [0, 256], sizes = [8, 128], strides = [1, 1]} : vector<8x512xf32> to vector<8x128xf32>
    %355 = math.tanh %354 : vector<8x128xf32>
    %356 = vector.extract_strided_slice %341 {offsets = [0, 384], sizes = [8, 128], strides = [1, 1]} : vector<8x512xf32> to vector<8x128xf32>
    %357 = arith.negf %356 : vector<8x128xf32>
    %358 = math.exp %357 : vector<8x128xf32>
    %cst_79 = arith.constant 1.000000e+00 : f32
    %359 = vector.broadcast %cst_79 : f32 to vector<8x128xf32>
    %360 = arith.addf %359, %358 : vector<8x128xf32>
    %361 = arith.divf %359, %360 : vector<8x128xf32>
    %362 = arith.mulf %353, %336 : vector<8x128xf32>
    %363 = arith.mulf %347, %355 : vector<8x128xf32>
    %364 = arith.addf %362, %363 : vector<8x128xf32>
    %365 = math.tanh %364 : vector<8x128xf32>
    %366 = arith.mulf %361, %365 : vector<8x128xf32>
    %367 = vector.extract_strided_slice %248 {offsets = [32, 0], sizes = [8, 512], strides = [1, 1]} : vector<64x512xf32> to vector<8x512xf32>
    %cst_80 = arith.constant dense<0.000000e+00> : vector<8x512xf32>
    %368 = tpu.matmul %366, %250, %cst_80 {dimension_numbers = #tpu.dot_dimension_numbers<[1], [0], [0], [1], [0, 0, 1, 1], [], []>} : vector<8x128xf32>, vector<128x512xf32>, vector<8x512xf32> -> vector<8x512xf32>
    %369 = arith.addf %367, %368 : vector<8x512xf32>
    %370 = vector.extract_strided_slice %369 {offsets = [0, 0], sizes = [8, 128], strides = [1, 1]} : vector<8x512xf32> to vector<8x128xf32>
    %371 = arith.negf %370 : vector<8x128xf32>
    %372 = math.exp %371 : vector<8x128xf32>
    %cst_81 = arith.constant 1.000000e+00 : f32
    %373 = vector.broadcast %cst_81 : f32 to vector<8x128xf32>
    %374 = arith.addf %373, %372 : vector<8x128xf32>
    %375 = arith.divf %373, %374 : vector<8x128xf32>
    %376 = vector.extract_strided_slice %369 {offsets = [0, 128], sizes = [8, 128], strides = [1, 1]} : vector<8x512xf32> to vector<8x128xf32>
    %377 = arith.negf %376 : vector<8x128xf32>
    %378 = math.exp %377 : vector<8x128xf32>
    %cst_82 = arith.constant 1.000000e+00 : f32
    %379 = vector.broadcast %cst_82 : f32 to vector<8x128xf32>
    %380 = arith.addf %379, %378 : vector<8x128xf32>
    %381 = arith.divf %379, %380 : vector<8x128xf32>
    %382 = vector.extract_strided_slice %369 {offsets = [0, 256], sizes = [8, 128], strides = [1, 1]} : vector<8x512xf32> to vector<8x128xf32>
    %383 = math.tanh %382 : vector<8x128xf32>
    %384 = vector.extract_strided_slice %369 {offsets = [0, 384], sizes = [8, 128], strides = [1, 1]} : vector<8x512xf32> to vector<8x128xf32>
    %385 = arith.negf %384 : vector<8x128xf32>
    %386 = math.exp %385 : vector<8x128xf32>
    %cst_83 = arith.constant 1.000000e+00 : f32
    %387 = vector.broadcast %cst_83 : f32 to vector<8x128xf32>
    %388 = arith.addf %387, %386 : vector<8x128xf32>
    %389 = arith.divf %387, %388 : vector<8x128xf32>
    %390 = arith.mulf %381, %364 : vector<8x128xf32>
    %391 = arith.mulf %375, %383 : vector<8x128xf32>
    %392 = arith.addf %390, %391 : vector<8x128xf32>
    %393 = math.tanh %392 : vector<8x128xf32>
    %394 = arith.mulf %389, %393 : vector<8x128xf32>
    %395 = vector.extract_strided_slice %248 {offsets = [40, 0], sizes = [8, 512], strides = [1, 1]} : vector<64x512xf32> to vector<8x512xf32>
    %cst_84 = arith.constant dense<0.000000e+00> : vector<8x512xf32>
    %396 = tpu.matmul %394, %250, %cst_84 {dimension_numbers = #tpu.dot_dimension_numbers<[1], [0], [0], [1], [0, 0, 1, 1], [], []>} : vector<8x128xf32>, vector<128x512xf32>, vector<8x512xf32> -> vector<8x512xf32>
    %397 = arith.addf %395, %396 : vector<8x512xf32>
    %398 = vector.extract_strided_slice %397 {offsets = [0, 0], sizes = [8, 128], strides = [1, 1]} : vector<8x512xf32> to vector<8x128xf32>
    %399 = arith.negf %398 : vector<8x128xf32>
    %400 = math.exp %399 : vector<8x128xf32>
    %cst_85 = arith.constant 1.000000e+00 : f32
    %401 = vector.broadcast %cst_85 : f32 to vector<8x128xf32>
    %402 = arith.addf %401, %400 : vector<8x128xf32>
    %403 = arith.divf %401, %402 : vector<8x128xf32>
    %404 = vector.extract_strided_slice %397 {offsets = [0, 128], sizes = [8, 128], strides = [1, 1]} : vector<8x512xf32> to vector<8x128xf32>
    %405 = arith.negf %404 : vector<8x128xf32>
    %406 = math.exp %405 : vector<8x128xf32>
    %cst_86 = arith.constant 1.000000e+00 : f32
    %407 = vector.broadcast %cst_86 : f32 to vector<8x128xf32>
    %408 = arith.addf %407, %406 : vector<8x128xf32>
    %409 = arith.divf %407, %408 : vector<8x128xf32>
    %410 = vector.extract_strided_slice %397 {offsets = [0, 256], sizes = [8, 128], strides = [1, 1]} : vector<8x512xf32> to vector<8x128xf32>
    %411 = math.tanh %410 : vector<8x128xf32>
    %412 = vector.extract_strided_slice %397 {offsets = [0, 384], sizes = [8, 128], strides = [1, 1]} : vector<8x512xf32> to vector<8x128xf32>
    %413 = arith.negf %412 : vector<8x128xf32>
    %414 = math.exp %413 : vector<8x128xf32>
    %cst_87 = arith.constant 1.000000e+00 : f32
    %415 = vector.broadcast %cst_87 : f32 to vector<8x128xf32>
    %416 = arith.addf %415, %414 : vector<8x128xf32>
    %417 = arith.divf %415, %416 : vector<8x128xf32>
    %418 = arith.mulf %409, %392 : vector<8x128xf32>
    %419 = arith.mulf %403, %411 : vector<8x128xf32>
    %420 = arith.addf %418, %419 : vector<8x128xf32>
    %421 = math.tanh %420 : vector<8x128xf32>
    %422 = arith.mulf %417, %421 : vector<8x128xf32>
    %423 = vector.extract_strided_slice %248 {offsets = [48, 0], sizes = [8, 512], strides = [1, 1]} : vector<64x512xf32> to vector<8x512xf32>
    %cst_88 = arith.constant dense<0.000000e+00> : vector<8x512xf32>
    %424 = tpu.matmul %422, %250, %cst_88 {dimension_numbers = #tpu.dot_dimension_numbers<[1], [0], [0], [1], [0, 0, 1, 1], [], []>} : vector<8x128xf32>, vector<128x512xf32>, vector<8x512xf32> -> vector<8x512xf32>
    %425 = arith.addf %423, %424 : vector<8x512xf32>
    %426 = vector.extract_strided_slice %425 {offsets = [0, 0], sizes = [8, 128], strides = [1, 1]} : vector<8x512xf32> to vector<8x128xf32>
    %427 = arith.negf %426 : vector<8x128xf32>
    %428 = math.exp %427 : vector<8x128xf32>
    %cst_89 = arith.constant 1.000000e+00 : f32
    %429 = vector.broadcast %cst_89 : f32 to vector<8x128xf32>
    %430 = arith.addf %429, %428 : vector<8x128xf32>
    %431 = arith.divf %429, %430 : vector<8x128xf32>
    %432 = vector.extract_strided_slice %425 {offsets = [0, 128], sizes = [8, 128], strides = [1, 1]} : vector<8x512xf32> to vector<8x128xf32>
    %433 = arith.negf %432 : vector<8x128xf32>
    %434 = math.exp %433 : vector<8x128xf32>
    %cst_90 = arith.constant 1.000000e+00 : f32
    %435 = vector.broadcast %cst_90 : f32 to vector<8x128xf32>
    %436 = arith.addf %435, %434 : vector<8x128xf32>
    %437 = arith.divf %435, %436 : vector<8x128xf32>
    %438 = vector.extract_strided_slice %425 {offsets = [0, 256], sizes = [8, 128], strides = [1, 1]} : vector<8x512xf32> to vector<8x128xf32>
    %439 = math.tanh %438 : vector<8x128xf32>
    %440 = vector.extract_strided_slice %425 {offsets = [0, 384], sizes = [8, 128], strides = [1, 1]} : vector<8x512xf32> to vector<8x128xf32>
    %441 = arith.negf %440 : vector<8x128xf32>
    %442 = math.exp %441 : vector<8x128xf32>
    %cst_91 = arith.constant 1.000000e+00 : f32
    %443 = vector.broadcast %cst_91 : f32 to vector<8x128xf32>
    %444 = arith.addf %443, %442 : vector<8x128xf32>
    %445 = arith.divf %443, %444 : vector<8x128xf32>
    %446 = arith.mulf %437, %420 : vector<8x128xf32>
    %447 = arith.mulf %431, %439 : vector<8x128xf32>
    %448 = arith.addf %446, %447 : vector<8x128xf32>
    %449 = math.tanh %448 : vector<8x128xf32>
    %450 = arith.mulf %445, %449 : vector<8x128xf32>
    %451 = vector.extract_strided_slice %248 {offsets = [56, 0], sizes = [8, 512], strides = [1, 1]} : vector<64x512xf32> to vector<8x512xf32>
    %cst_92 = arith.constant dense<0.000000e+00> : vector<8x512xf32>
    %452 = tpu.matmul %450, %250, %cst_92 {dimension_numbers = #tpu.dot_dimension_numbers<[1], [0], [0], [1], [0, 0, 1, 1], [], []>} : vector<8x128xf32>, vector<128x512xf32>, vector<8x512xf32> -> vector<8x512xf32>
    %453 = arith.addf %451, %452 : vector<8x512xf32>
    %454 = vector.extract_strided_slice %453 {offsets = [0, 0], sizes = [8, 128], strides = [1, 1]} : vector<8x512xf32> to vector<8x128xf32>
    %455 = arith.negf %454 : vector<8x128xf32>
    %456 = math.exp %455 : vector<8x128xf32>
    %cst_93 = arith.constant 1.000000e+00 : f32
    %457 = vector.broadcast %cst_93 : f32 to vector<8x128xf32>
    %458 = arith.addf %457, %456 : vector<8x128xf32>
    %459 = arith.divf %457, %458 : vector<8x128xf32>
    %460 = vector.extract_strided_slice %453 {offsets = [0, 128], sizes = [8, 128], strides = [1, 1]} : vector<8x512xf32> to vector<8x128xf32>
    %461 = arith.negf %460 : vector<8x128xf32>
    %462 = math.exp %461 : vector<8x128xf32>
    %cst_94 = arith.constant 1.000000e+00 : f32
    %463 = vector.broadcast %cst_94 : f32 to vector<8x128xf32>
    %464 = arith.addf %463, %462 : vector<8x128xf32>
    %465 = arith.divf %463, %464 : vector<8x128xf32>
    %466 = vector.extract_strided_slice %453 {offsets = [0, 256], sizes = [8, 128], strides = [1, 1]} : vector<8x512xf32> to vector<8x128xf32>
    %467 = math.tanh %466 : vector<8x128xf32>
    %468 = vector.extract_strided_slice %453 {offsets = [0, 384], sizes = [8, 128], strides = [1, 1]} : vector<8x512xf32> to vector<8x128xf32>
    %469 = arith.negf %468 : vector<8x128xf32>
    %470 = math.exp %469 : vector<8x128xf32>
    %cst_95 = arith.constant 1.000000e+00 : f32
    %471 = vector.broadcast %cst_95 : f32 to vector<8x128xf32>
    %472 = arith.addf %471, %470 : vector<8x128xf32>
    %473 = arith.divf %471, %472 : vector<8x128xf32>
    %474 = arith.mulf %465, %448 : vector<8x128xf32>
    %475 = arith.mulf %459, %467 : vector<8x128xf32>
    %476 = arith.addf %474, %475 : vector<8x128xf32>
    %477 = math.tanh %476 : vector<8x128xf32>
    %478 = arith.mulf %473, %477 : vector<8x128xf32>
    %c1_96 = arith.constant 1 : index
    %c0_97 = arith.constant 0 : index
    %c0_98 = arith.constant 0 : index
    %479 = vector.load %arg8[%c1_96, %c0_97, %c0_98] : memref<2x8x128xf32, #tpu.memory_space<vmem>>, vector<1x8x128xf32>
    %480 = vector.shape_cast %479 : vector<1x8x128xf32> to vector<8x128xf32>
    %481 = vector.shape_cast %478 : vector<8x128xf32> to vector<1x8x128xf32>
    tpu.vector_store %arg8[%c1_96, %c0_97, %c0_98], %481 {strides = array<i32>} : memref<2x8x128xf32, #tpu.memory_space<vmem>>, vector<1x8x128xf32>,
    %c1_99 = arith.constant 1 : index
    %c0_100 = arith.constant 0 : index
    %c0_101 = arith.constant 0 : index
    %482 = vector.load %arg9[%c1_99, %c0_100, %c0_101] : memref<2x8x128xf32, #tpu.memory_space<vmem>>, vector<1x8x128xf32>
    %483 = vector.shape_cast %482 : vector<1x8x128xf32> to vector<8x128xf32>
    %484 = vector.shape_cast %476 : vector<8x128xf32> to vector<1x8x128xf32>
    tpu.vector_store %arg9[%c1_99, %c0_100, %c0_101], %484 {strides = array<i32>} : memref<2x8x128xf32, #tpu.memory_space<vmem>>, vector<1x8x128xf32>,
    %c0_i32_102 = arith.constant 0 : i32
    %485 = arith.cmpi eq, %arg1, %c0_i32_102 : i32
    %486 = arith.extui %485 : i1 to i32
    %c0_i32_103 = arith.constant 0 : i32
    %487 = arith.cmpi ne, %486, %c0_i32_103 : i32
    scf.if %487 {
      %c0_104 = arith.constant 0 : index
      %c0_105 = arith.constant 0 : index
      %c0_106 = arith.constant 0 : index
      %488 = vector.load %arg8[%c0_104, %c0_105, %c0_106] : memref<2x8x128xf32, #tpu.memory_space<vmem>>, vector<2x8x128xf32>
      %c0_107 = arith.constant 0 : index
      %c0_108 = arith.constant 0 : index
      %c0_109 = arith.constant 0 : index
      %489 = vector.load %arg6[%c0_107, %c0_108, %c0_109] : memref<2x8x128xf32, #tpu.memory_space<vmem>>, vector<2x8x128xf32>
      tpu.vector_store %arg6[%c0_107, %c0_108, %c0_109], %488 {strides = array<i32>} : memref<2x8x128xf32, #tpu.memory_space<vmem>>, vector<2x8x128xf32>,
      %c0_110 = arith.constant 0 : index
      %c0_111 = arith.constant 0 : index
      %c0_112 = arith.constant 0 : index
      %490 = vector.load %arg9[%c0_110, %c0_111, %c0_112] : memref<2x8x128xf32, #tpu.memory_space<vmem>>, vector<2x8x128xf32>
      %c0_113 = arith.constant 0 : index
      %c0_114 = arith.constant 0 : index
      %c0_115 = arith.constant 0 : index
      %491 = vector.load %arg7[%c0_113, %c0_114, %c0_115] : memref<2x8x128xf32, #tpu.memory_space<vmem>>, vector<2x8x128xf32>
      tpu.vector_store %arg7[%c0_113, %c0_114, %c0_115], %490 {strides = array<i32>} : memref<2x8x128xf32, #tpu.memory_space<vmem>>, vector<2x8x128xf32>,
    } else {
    }
    return
  }
  func.func @transform_0(%arg0: i32, %arg1: i32) -> (i32, i32, i32) {
    %c0_i32 = arith.constant 0 : i32
    %c0_i32_0 = arith.constant 0 : i32
    return %arg1, %arg0, %c0_i32 : i32, i32, i32
  }
  func.func @transform_1(%arg0: i32, %arg1: i32) -> (i32, i32, i32) {
    %c0_i32 = arith.constant 0 : i32
    %c0_i32_0 = arith.constant 0 : i32
    %c0_i32_1 = arith.constant 0 : i32
    %c0_i32_2 = arith.constant 0 : i32
    return %c0_i32, %c0_i32_0, %c0_i32_1 : i32, i32, i32
  }
  func.func @transform_2(%arg0: i32, %arg1: i32) -> (i32, i32, i32) {
    %c0_i32 = arith.constant 0 : i32
    %c0_i32_0 = arith.constant 0 : i32
    %c0_i32_1 = arith.constant 0 : i32
    %c0_i32_2 = arith.constant 0 : i32
    return %c0_i32, %c0_i32_0, %c0_i32_1 : i32, i32, i32
  }
  func.func @transform_3(%arg0: i32, %arg1: i32) -> (i32, i32, i32) {
    %c0_i32 = arith.constant 0 : i32
    %c0_i32_0 = arith.constant 0 : i32
    %c0_i32_1 = arith.constant 0 : i32
    %c0_i32_2 = arith.constant 0 : i32
    return %c0_i32, %c0_i32_0, %c0_i32_1 : i32, i32, i32
  }
  func.func @transform_4(%arg0: i32, %arg1: i32) -> (i32, i32, i32) {
    %c0_i32 = arith.constant 0 : i32
    %c0_i32_0 = arith.constant 0 : i32
    %c0_i32_1 = arith.constant 0 : i32
    return %c0_i32, %arg0, %c0_i32_0 : i32, i32, i32
  }
  func.func @transform_5(%arg0: i32, %arg1: i32) -> (i32, i32, i32) {
    %c0_i32 = arith.constant 0 : i32
    %c0_i32_0 = arith.constant 0 : i32
    %c0_i32_1 = arith.constant 0 : i32
    return %c0_i32, %arg0, %c0_i32_0 : i32, i32, i32
  }
}

</mosaic_0001>

<bundles_post_ra>
// kernel: tpu_custom_call.1
= control target key start
LH: loop header
LB: loop body
LE: loop exit
PB: predicated region body
PF: predicated region fallthrough
CT: control target
= control target key end

     0   :  { %11 = vsyncpa [#allocation5], 0  ;;  %s5393_s0 = inlined_call_operand.hbm [shape: f32[8,8,512], index: 0, kind: input, shape index: {}]   ;;  %s5394_s1 = inlined_call_operand.hbm [shape: f32[2,128,512], index: 1, kind: input, shape index: {}]   ;;  %s5395_s2 = inlined_call_operand.hbm [shape: f32[2,128,512], index: 2, kind: input, shape index: {}]   ;;  %s5396_s3 = inlined_call_operand.hbm [shape: f32[2,1,512], index: 3, kind: input, shape index: {}]   ;;  %s5397_s4 = inlined_call_operand.hbm [shape: f32[2,8,128], index: 4, kind: output, shape index: {0}]   ;;  %s5398_s5 = inlined_call_operand.hbm [shape: f32[2,8,128], index: 5, kind: output, shape index: {1}]  }
   0x1   :  { %12 = vsyncpa [#allocation8], 0 }
   0x2   :  { %13 = vsyncpa [#allocation11], 0 }
   0x3   :  { %14 = vsyncpa [#allocation6], 0 }
   0x4   :  { %15 = vsyncpa [#allocation14], 0  ;;  %s33_s20 = sshll.u32 %s5394_s1, 4  ;;  %s3504_s21 = smov [#allocation7]   ;;  %s34_s20 = int_to_ptr.hbm [resolvable:$true] %s33_s20 }
   0x5   :  { %s35_s22 = sshll.u32 %s3504_s21, 4  ;;  %s20_s25 = sshll.u32 %s5393_s0, 4  ;;  %s36_s22 = int_to_ptr.vmem [resolvable:$true] %s35_s22  ;;  %s21_s25 = int_to_ptr.hbm [resolvable:$true] %s20_s25 }
   0x6   :  { %s3505_s26 = smov 512   ;;  %s3506_s27 = smov 32  }
   0x7   :  { %41 = dma.hbm_to_vmem [thread:$0]  %s34_s20, 16384, %s36_s22, [#allocation8], %s3505_s26, %s3505_s26, %s3506_s27  }
   0x8   :  { %s3507_s28 = smov [#allocation4]   ;;  %s46_s7 = sshll.u32 %s5395_s2, 4  ;;  %s47_s7 = int_to_ptr.hbm [resolvable:$true] %s46_s7 }
   0x9   :  { %s22_s29 = sshll.u32 %s3507_s28, 4  ;;  %s59_s9 = sshll.u32 %s5396_s3, 4  ;;  %s23_s29 = int_to_ptr.vmem [resolvable:$true] %s22_s29  ;;  %s60_s9 = int_to_ptr.hbm [resolvable:$true] %s59_s9 }
   0xa   :  { %28 = dma.hbm_to_vmem [thread:$0]  %s21_s25, 4096, %s23_s29, [#allocation5], %s3505_s26, %s3505_s26, %s3506_s27  }
   0xb   :  { %s3508_s10 = smov [#allocation9]   ;;  %s3509_s0 = smov [#allocation10]  }
   0xc   :  { %s48_s11 = sshll.u32 %s3508_s10, 4  ;;  %s61_s12 = sshll.u32 %s3509_s0, 4  ;;  %s49_s11 = int_to_ptr.vmem [resolvable:$true] %s48_s11  ;;  %s62_s12 = int_to_ptr.vmem [resolvable:$true] %s61_s12 }
   0xd   :  { %54 = dma.hbm_to_vmem [thread:$0]  %s47_s7, 16384, %s49_s11, [#allocation8], %s3505_s26, %s3505_s26, %s3506_s27  }
   0xe   :  { %s3510_s13 = smov 64   ;;  %s3511_s14 = smov 4  }
   0xf   :  { %67 = dma.hbm_to_vmem [thread:$0]  %s60_s9, 128, %s62_s12, [#allocation11], %s3510_s13, %s3510_s13, %s3511_s14  }
  0x10   :  { %3494 = dma.done.wait [#allocation5], 4096  }
  0x11   :  { %3495 = vsyncadd [#allocation5], 4294963200 }
  0x12   :  { %3496 = dma.done.wait [#allocation8], 32768  }
  0x13   :  { %3497 = vsyncadd [#allocation8], 4294934528 }
  0x14   :  { %3498 = dma.done.wait [#allocation11], 128  }
  0x15   :  { %3499 = vsyncadd [#allocation11], 4294967168  ;;  %v3559_v0 = vld [vmem:[#allocation7 + $0x1e0] sm:$0xff]  ;;  %v3561_v1 = vld [vmem:[#allocation7 + $0x1e8] sm:$0xff]  ;;  %v5399_v60 = vmov 0.0   ;;  %s3513_s2 = smov [#allocation13]  }
  0x16   :  { %v3563_v2 = vld [vmem:[#allocation7 + $0x1f8] sm:$0xff]  ;;  %190 = vmatpush.msra.mxu0 %v3559_v0  ;;  %210 = vmatpush.msra.mxu1 %v3561_v1  ;;  %v3567_v3 = vld [vmem:[#allocation7 + $0x1c0] sm:$0xff]  ;;  %v3569_v4 = vld [vmem:[#allocation7 + $0x1c8] sm:$0xff]  ;;  %s2883_s3 = sshll.u32 %s3513_s2, 4  ;;  %s2885_s17 = sshll.u32 %s5398_s5, 4  ;;  %s2884_s3 = int_to_ptr.vmem [resolvable:$true] %s2883_s3  ;;  %s2886_s17 = int_to_ptr.hbm [resolvable:$true] %s2885_s17 }
  0x17   :  { %v3571_v5 = vld [vmem:[#allocation7 + $0x1d8] sm:$0xff]  ;;  %250 = vmatpush.msra.mxu3 %v3563_v2  ;;  %v3574_v6 = vld [vmem:[#allocation7 + $0x1a0] sm:$0xff]  ;;  %v3576_v7 = vld [vmem:[#allocation7 + $0x1a8] sm:$0xff]  ;;  %s3514_s18 = smov 128   ;;  %s3515_s19 = smov 8  }
  0x18   :  { %5645 = vst [vmem:[#allocation20_spill] sm:$0xff] %v3571_v5  ;;  %191 = vmatpush.msra.mxu0 %v3567_v3  ;;  %211 = vmatpush.msra.mxu1 %v3569_v4  ;;  %v3580_v8 = vld [vmem:[#allocation7 + $0x1b8] sm:$0xff]  ;;  %v3583_v9 = vld [vmem:[#allocation7 + $0x180] sm:$0xff]  ;;  %v3585_v10 = vld [vmem:[#allocation7 + $0x188] sm:$0xff]  ;;  %s3516_s5 = smov [#allocation12]   ;;  %s2872_s23 = sshll.u32 %s5397_s4, 4  ;;  %s2873_s23 = int_to_ptr.hbm [resolvable:$true] %s2872_s23 }
  0x19   :  { %251 = vmatpush.msra.mxu3 %v3571_v5  ;;  %v3589_v11 = vld [vmem:[#allocation7 + $0x198] sm:$0xff]  ;;  %v3592_v12 = vld [vmem:[#allocation7 + $0x160] sm:$0xff]  ;;  %v3594_v13 = vld [vmem:[#allocation7 + $0x168] sm:$0xff]  ;;  %s2870_s20 = sshll.u32 %s3516_s5, 4  ;;  %s2871_s20 = int_to_ptr.vmem [resolvable:$true] %s2870_s20 }
  0x1a   :  { %192 = vmatpush.msra.mxu0 %v3574_v6  ;;  %212 = vmatpush.msra.mxu1 %v3576_v7  ;;  %v3598_v14 = vld [vmem:[#allocation7 + $0x178] sm:$0xff]  ;;  %v3601_v15 = vld [vmem:[#allocation7 + $0x140] sm:$0xff]  ;;  %v3603_v16 = vld [vmem:[#allocation7 + $0x148] sm:$0xff] }
  0x1b   :  { %252 = vmatpush.msra.mxu3 %v3580_v8  ;;  %v3605_v17 = vld [vmem:[#allocation7 + $0x1f0] sm:$0xff]  ;;  %v3609_v18 = vld [vmem:[#allocation7 + $0x158] sm:$0xff]  ;;  %v3614_v20 = vld [vmem:[#allocation7 + $0x120] sm:$0xff] }
  0x1c   :  { %193 = vmatpush.msra.mxu0 %v3583_v9  ;;  %213 = vmatpush.msra.mxu1 %v3585_v10  ;;  %v3611_v19 = vld [vmem:[#allocation7 + $0x1d0] sm:$0xff]  ;;  %v3616_v21 = vld [vmem:[#allocation7 + $0x128] sm:$0xff]  ;;  %v3621_v22 = vld [vmem:[#allocation7 + $0x138] sm:$0xff] }
  0x1d   :  { %253 = vmatpush.msra.mxu3 %v3589_v11  ;;  %230 = vmatpush.msra.mxu2 %v3605_v17  ;;  %v3623_v23 = vld [vmem:[#allocation7 + $0x1b0] sm:$0xff]  ;;  %v3626_v24 = vld [vmem:[#allocation7 + $0x100] sm:$0xff]  ;;  %v3628_v25 = vld [vmem:[#allocation7 + $0x108] sm:$0xff] }
  0x1e   :  { %194 = vmatpush.msra.mxu0 %v3592_v12  ;;  %214 = vmatpush.msra.mxu1 %v3594_v13  ;;  %v3633_v26 = vld [vmem:[#allocation7 + $0x118] sm:$0xff]  ;;  %v3635_v27 = vld [vmem:[#allocation7 + $0x190] sm:$0xff]  ;;  %v3638_v28 = vld [vmem:[#allocation7 + $0xe0] sm:$0xff] }
  0x1f   :  { %254 = vmatpush.msra.mxu3 %v3598_v14  ;;  %231 = vmatpush.msra.mxu2 %v3611_v19  ;;  %v3640_v29 = vld [vmem:[#allocation7 + $0xe8] sm:$0xff]  ;;  %v3645_v30 = vld [vmem:[#allocation7 + $0xf8] sm:$0xff]  ;;  %v3647_v31 = vld [vmem:[#allocation7 + $0x170] sm:$0xff] }
  0x20   :  { %195 = vmatpush.msra.mxu0 %v3601_v15  ;;  %215 = vmatpush.msra.mxu1 %v3603_v16  ;;  %v3650_v32 = vld [vmem:[#allocation7 + $0xc0] sm:$0xff]  ;;  %v3652_v33 = vld [vmem:[#allocation7 + $0xc8] sm:$0xff]  ;;  %v3657_v34 = vld [vmem:[#allocation7 + $0xd8] sm:$0xff] }
  0x21   :  { %255 = vmatpush.msra.mxu3 %v3609_v18  ;;  %232 = vmatpush.msra.mxu2 %v3623_v23  ;;  %5646 = vst [vmem:[#allocation21_spill] sm:$0xff] %v3657_v34  ;;  %v3659_v35 = vld [vmem:[#allocation7 + $0x150] sm:$0xff]  ;;  %v3662_v36 = vld [vmem:[#allocation7 + $0xa0] sm:$0xff]  ;;  %v3664_v37 = vld [vmem:[#allocation7 + $0xa8] sm:$0xff] }
  0x22   :  { %196 = vmatpush.msra.mxu0 %v3614_v20  ;;  %216 = vmatpush.msra.mxu1 %v3616_v21  ;;  %5647 = vst [vmem:[#allocation22_spill] sm:$0xff] %v3662_v36  ;;  %v3669_v38 = vld [vmem:[#allocation7 + $0xb8] sm:$0xff]  ;;  %v3671_v39 = vld [vmem:[#allocation7 + $0x130] sm:$0xff]  ;;  %v3674_v40 = vld [vmem:[#allocation7 + $0x80] sm:$0xff] }
  0x23   :  { %256 = vmatpush.msra.mxu3 %v3621_v22  ;;  %233 = vmatpush.msra.mxu2 %v3635_v27  ;;  %5648 = vst [vmem:[#allocation23_spill] sm:$0xff] %v3664_v37  ;;  %v3676_v41 = vld [vmem:[#allocation7 + $0x88] sm:$0xff]  ;;  %v3681_v42 = vld [vmem:[#allocation7 + $0x98] sm:$0xff]  ;;  %v3683_v43 = vld [vmem:[#allocation7 + $0x110] sm:$0xff] }
  0x24   :  { %197 = vmatpush.msra.mxu0 %v3626_v24  ;;  %217 = vmatpush.msra.mxu1 %v3628_v25  ;;  %5649 = vst [vmem:[#allocation24_spill] sm:$0xff] %v3669_v38  ;;  %v3686_v44 = vld [vmem:[#allocation7 + $0x60] sm:$0xff]  ;;  %v3688_v45 = vld [vmem:[#allocation7 + $0x68] sm:$0xff]  ;;  %v3693_v46 = vld [vmem:[#allocation7 + $0x78] sm:$0xff] }
  0x25   :  { %257 = vmatpush.msra.mxu3 %v3633_v26  ;;  %234 = vmatpush.msra.mxu2 %v3647_v31  ;;  %5650 = vst [vmem:[#allocation25_spill] sm:$0xff] %v3674_v40  ;;  %v3695_v47 = vld [vmem:[#allocation7 + $0xf0] sm:$0xff]  ;;  %v3698_v48 = vld [vmem:[#allocation7 + $0x40] sm:$0xff]  ;;  %v3700_v49 = vld [vmem:[#allocation7 + $0x48] sm:$0xff] }
  0x26   :  { %198 = vmatpush.msra.mxu0 %v3638_v28  ;;  %218 = vmatpush.msra.mxu1 %v3640_v29  ;;  %5651 = vst [vmem:[#allocation26_spill] sm:$0xff] %v3676_v41  ;;  %v3705_v50 = vld [vmem:[#allocation7 + $0x58] sm:$0xff]  ;;  %v3707_v51 = vld [vmem:[#allocation7 + $0xd0] sm:$0xff]  ;;  %v3710_v52 = vld [vmem:[#allocation7 + $0x20] sm:$0xff] }
  0x27   :  { %258 = vmatpush.msra.mxu3 %v3645_v30  ;;  %235 = vmatpush.msra.mxu2 %v3659_v35  ;;  %5652 = vst [vmem:[#allocation27_spill] sm:$0xff] %v3681_v42  ;;  %v3712_v53 = vld [vmem:[#allocation7 + $0x28] sm:$0xff]  ;;  %v3717_v54 = vld [vmem:[#allocation7 + $0x38] sm:$0xff]  ;;  %v3719_v55 = vld [vmem:[#allocation7 + $0xb0] sm:$0xff] }
  0x28   :  { %199 = vmatpush.msra.mxu0 %v3650_v32  ;;  %219 = vmatpush.msra.mxu1 %v3652_v33  ;;  %5653 = vst [vmem:[#allocation28_spill] sm:$0xff] %v3686_v44  ;;  %v3722_v56 = vld [vmem:[#allocation7] sm:$0xff]  ;;  %v3724_v57 = vld [vmem:[#allocation7 + $0x8] sm:$0xff]  ;;  %v3729_v58 = vld [vmem:[#allocation7 + $0x18] sm:$0xff] }
  0x29   :  { %259 = vmatpush.msra.mxu3 %v3657_v34  ;;  %5654 = vst [vmem:[#allocation29_spill] sm:$0xff] %v3688_v45  ;;  %236 = vmatpush.msra.mxu2 %v3671_v39  ;;  %v3735_v59 = vld [vmem:[#allocation7 + $0x90] sm:$0xff] }
  0x2a   :  { %200 = vmatpush.msra.mxu0 %v3662_v36  ;;  %220 = vmatpush.msra.mxu1 %v3664_v37  ;;  %5655 = vst [vmem:[#allocation30_spill] sm:$0xff] %v3693_v46  ;;  %v3741_v61 = vld [vmem:[#allocation7 + $0x70] sm:$0xff] }
  0x2b   :  { %260 = vmatpush.msra.mxu3 %v3669_v38  ;;  %5656 = vst [vmem:[#allocation31_spill] sm:$0xff] %v3698_v48  ;;  %237 = vmatpush.msra.mxu2 %v3683_v43  ;;  %v3745_v62 = vld [vmem:[#allocation7 + $0x50] sm:$0xff] }
  0x2c   :  { %201 = vmatpush.msra.mxu0 %v3674_v40  ;;  %221 = vmatpush.msra.mxu1 %v3676_v41  ;;  %5657 = vst [vmem:[#allocation32_spill] sm:$0xff] %v3700_v49  ;;  %v3751_v63 = vld [vmem:[#allocation7 + $0x30] sm:$0xff] }
  0x2d   :  { %261 = vmatpush.msra.mxu3 %v3681_v42  ;;  %5658 = vst [vmem:[#allocation33_spill] sm:$0xff] %v3705_v50  ;;  %238 = vmatpush.msra.mxu2 %v3695_v47 }
  0x2e   :  { %202 = vmatpush.msra.mxu0 %v3686_v44  ;;  %222 = vmatpush.msra.mxu1 %v3688_v45  ;;  %5659 = vst [vmem:[#allocation34_spill] sm:$0xff] %v3707_v51 }
  0x2f   :  { %262 = vmatpush.msra.mxu3 %v3693_v46  ;;  %5660 = vst [vmem:[#allocation35_spill] sm:$0xff] %v3710_v52  ;;  %239 = vmatpush.msra.mxu2 %v3707_v51 }
  0x30   :  { %5661 = vst [vmem:[#allocation36_spill] sm:$0xff] %v3712_v53  ;;  %203 = vmatpush.msra.mxu0 %v3698_v48  ;;  %223 = vmatpush.msra.mxu1 %v3700_v49 }
  0x31   :  { %5662 = vst [vmem:[#allocation37_spill] sm:$0xff] %v3717_v54  ;;  %263 = vmatpush.msra.mxu3 %v3705_v50  ;;  %240 = vmatpush.msra.mxu2 %v3719_v55 }
  0x32   :  { %5663 = vst [vmem:[#allocation38_spill] sm:$0xff] %v3719_v55  ;;  %204 = vmatpush.msra.mxu0 %v3710_v52  ;;  %224 = vmatpush.msra.mxu1 %v3712_v53 }
  0x33   :  { %5664 = vst [vmem:[#allocation39_spill] sm:$0xff] %v3722_v56  ;;  %264 = vmatpush.msra.mxu3 %v3717_v54  ;;  %241 = vmatpush.msra.mxu2 %v3735_v59 }
  0x34   :  { %5665 = vst [vmem:[#allocation40_spill] sm:$0xff] %v3724_v57  ;;  %205 = vmatpush.msra.mxu0 %v3722_v56  ;;  %225 = vmatpush.msra.mxu1 %v3724_v57 }
  0x35   :  { %5666 = vst [vmem:[#allocation41_spill] sm:$0xff] %v3729_v58  ;;  %265 = vmatpush.msra.mxu3 %v3729_v58  ;;  %206 = vmatmul.f32.vlgmr.msra.gmra.mxu0 %v5399_v60 }
  0x36   :  { %5667 = vst [vmem:[#allocation42_spill] sm:$0xff] %v3735_v59  ;;  %226 = vmatmul.f32.vlgmr.msra.gmra.mxu1 %v5399_v60  ;;  %266 = vmatmul.f32.vlgmr.msra.gmra.mxu3 %v5399_v60  ;;  %v3757_v60 = vld [vmem:[#allocation7 + $0x10] sm:$0xff] }
  0x37   :  { %5668 = vst [vmem:[#allocation43_spill] sm:$0xff] %v3741_v61  ;;  %337 = vmatpush.msrb.mxu0 %v3559_v0  ;;  %357 = vmatpush.msrb.mxu1 %v3561_v1 }
  0x38   :  { %5669 = vst [vmem:[#allocation44_spill] sm:$0xff] %v3745_v62  ;;  %397 = vmatpush.msrb.mxu3 %v3563_v2  ;;  %242 = vmatpush.msra.mxu2 %v3741_v61 }
  0x39   :  { %338 = vmatpush.msrb.mxu0 %v3567_v3  ;;  %5670 = vst [vmem:[#allocation45_spill] sm:$0xff] %v3751_v63  ;;  %358 = vmatpush.msrb.mxu1 %v3569_v4 }
  0x3a   :  { %398 = vmatpush.msrb.mxu3 %v3571_v5  ;;  %243 = vmatpush.msra.mxu2 %v3745_v62  ;;  %5671 = vst [vmem:[#allocation46_spill] sm:$0xff] %v3757_v60  ;;  %v5672_v5 = vmov 0.0  }
  0x3b   :  { %339 = vmatpush.msrb.mxu0 %v3574_v6  ;;  %359 = vmatpush.msrb.mxu1 %v3576_v7 }
  0x3c   :  { %399 = vmatpush.msrb.mxu3 %v3580_v8  ;;  %244 = vmatpush.msra.mxu2 %v3751_v63 }
  0x3d   :  { %340 = vmatpush.msrb.mxu0 %v3583_v9  ;;  %360 = vmatpush.msrb.mxu1 %v3585_v10 }
  0x3e   :  { %400 = vmatpush.msrb.mxu3 %v3589_v11  ;;  %245 = vmatpush.msra.mxu2 %v3757_v60 }
  0x3f   :  { %341 = vmatpush.msrb.mxu0 %v3592_v12  ;;  %246 = vmatmul.f32.vlgmr.msra.gmra.mxu2 %v5672_v5  ;;  %v5673_v5 = vld [vmem:[#allocation20_spill] sm:$0xff] }
  0x40   :  { %361 = vmatpush.msrb.mxu1 %v3594_v13  ;;  %377 = vmatpush.msrb.mxu2 %v3605_v17 }
  0x41   :  { %401 = vmatpush.msrb.mxu3 %v3598_v14  ;;  %342 = vmatpush.msrb.mxu0 %v3601_v15 }
  0x42   :  { %362 = vmatpush.msrb.mxu1 %v3603_v16  ;;  %378 = vmatpush.msrb.mxu2 %v3611_v19 }
  0x43   :  { %402 = vmatpush.msrb.mxu3 %v3609_v18  ;;  %343 = vmatpush.msrb.mxu0 %v3614_v20 }
  0x44   :  { %363 = vmatpush.msrb.mxu1 %v3616_v21  ;;  %379 = vmatpush.msrb.mxu2 %v3623_v23 }
  0x45   :  { %403 = vmatpush.msrb.mxu3 %v3621_v22  ;;  %344 = vmatpush.msrb.mxu0 %v3626_v24 }
  0x46   :  { %364 = vmatpush.msrb.mxu1 %v3628_v25  ;;  %380 = vmatpush.msrb.mxu2 %v3635_v27 }
  0x47   :  { %404 = vmatpush.msrb.mxu3 %v3633_v26  ;;  %345 = vmatpush.msrb.mxu0 %v3638_v28 }
  0x48   :  { %365 = vmatpush.msrb.mxu1 %v3640_v29  ;;  %381 = vmatpush.msrb.mxu2 %v3647_v31 }
  0x49   :  { %405 = vmatpush.msrb.mxu3 %v3645_v30  ;;  %346 = vmatpush.msrb.mxu0 %v3650_v32 }
  0x4a   :  { %366 = vmatpush.msrb.mxu1 %v3652_v33  ;;  %382 = vmatpush.msrb.mxu2 %v3659_v35 }
  0x4b   :  { %406 = vmatpush.msrb.mxu3 %v3657_v34  ;;  %347 = vmatpush.msrb.mxu0 %v3662_v36 }
  0x4c   :  { %367 = vmatpush.msrb.mxu1 %v3664_v37  ;;  %383 = vmatpush.msrb.mxu2 %v3671_v39 }
  0x4d   :  { %407 = vmatpush.msrb.mxu3 %v3669_v38  ;;  %348 = vmatpush.msrb.mxu0 %v3674_v40 }
  0x4e   :  { %368 = vmatpush.msrb.mxu1 %v3676_v41  ;;  %384 = vmatpush.msrb.mxu2 %v3683_v43 }
  0x4f   :  { %408 = vmatpush.msrb.mxu3 %v3681_v42  ;;  %349 = vmatpush.msrb.mxu0 %v3686_v44 }
  0x50   :  { %369 = vmatpush.msrb.mxu1 %v3688_v45  ;;  %385 = vmatpush.msrb.mxu2 %v3695_v47 }
  0x51   :  { %409 = vmatpush.msrb.mxu3 %v3693_v46  ;;  %350 = vmatpush.msrb.mxu0 %v3698_v48 }
  0x52   :  { %370 = vmatpush.msrb.mxu1 %v3700_v49  ;;  %386 = vmatpush.msrb.mxu2 %v3707_v51 }
  0x53   :  { %410 = vmatpush.msrb.mxu3 %v3705_v50  ;;  %351 = vmatpush.msrb.mxu0 %v3710_v52 }
  0x54   :  { %371 = vmatpush.msrb.mxu1 %v3712_v53  ;;  %387 = vmatpush.msrb.mxu2 %v3719_v55 }
  0x55   :  { %411 = vmatpush.msrb.mxu3 %v3717_v54  ;;  %352 = vmatpush.msrb.mxu0 %v3722_v56 }
  0x56   :  { %372 = vmatpush.msrb.mxu1 %v3724_v57  ;;  %388 = vmatpush.msrb.mxu2 %v3735_v59 }
  0x57   :  { %412 = vmatpush.msrb.mxu3 %v3729_v58  ;;  %484 = vmatpush.msra.mxu0 %v3559_v0 }
  0x58   :  { %504 = vmatpush.msra.mxu1 %v3561_v1  ;;  %389 = vmatpush.msrb.mxu2 %v3741_v61 }
  0x59   :  { %544 = vmatpush.msra.mxu3 %v3563_v2  ;;  %485 = vmatpush.msra.mxu0 %v3567_v3 }
  0x5a   :  { %505 = vmatpush.msra.mxu1 %v3569_v4  ;;  %390 = vmatpush.msrb.mxu2 %v3745_v62 }
  0x5b   :  { %545 = vmatpush.msra.mxu3 %v5673_v5  ;;  %486 = vmatpush.msra.mxu0 %v3574_v6 }
  0x5c   :  { %506 = vmatpush.msra.mxu1 %v3576_v7  ;;  %391 = vmatpush.msrb.mxu2 %v3751_v63 }
  0x5d   :  { %546 = vmatpush.msra.mxu3 %v3580_v8  ;;  %487 = vmatpush.msra.mxu0 %v3583_v9 }
  0x5e   :  { %507 = vmatpush.msra.mxu1 %v3585_v10  ;;  %392 = vmatpush.msrb.mxu2 %v3757_v60 }
  0x5f   :  { %547 = vmatpush.msra.mxu3 %v3589_v11  ;;  %488 = vmatpush.msra.mxu0 %v3592_v12 }
  0x60   :  { %524 = vmatpush.msra.mxu2 %v3605_v17  ;;  %508 = vmatpush.msra.mxu1 %v3594_v13 }
  0x61   :  { %548 = vmatpush.msra.mxu3 %v3598_v14  ;;  %489 = vmatpush.msra.mxu0 %v3601_v15 }
  0x62   :  { %525 = vmatpush.msra.mxu2 %v3611_v19  ;;  %509 = vmatpush.msra.mxu1 %v3603_v16 }
  0x63   :  { %549 = vmatpush.msra.mxu3 %v3609_v18  ;;  %490 = vmatpush.msra.mxu0 %v3614_v20 }
  0x64   :  { %526 = vmatpush.msra.mxu2 %v3623_v23  ;;  %510 = vmatpush.msra.mxu1 %v3616_v21 }
  0x65   :  { %550 = vmatpush.msra.mxu3 %v3621_v22  ;;  %491 = vmatpush.msra.mxu0 %v3626_v24 }
  0x66   :  { %527 = vmatpush.msra.mxu2 %v3635_v27  ;;  %511 = vmatpush.msra.mxu1 %v3628_v25 }
  0x67   :  { %551 = vmatpush.msra.mxu3 %v3633_v26  ;;  %492 = vmatpush.msra.mxu0 %v3638_v28 }
  0x68   :  { %528 = vmatpush.msra.mxu2 %v3647_v31  ;;  %512 = vmatpush.msra.mxu1 %v3640_v29 }
  0x69   :  { %552 = vmatpush.msra.mxu3 %v3645_v30  ;;  %493 = vmatpush.msra.mxu0 %v3650_v32 }
  0x6a   :  { %529 = vmatpush.msra.mxu2 %v3659_v35  ;;  %513 = vmatpush.msra.mxu1 %v3652_v33 }
  0x6b   :  { %553 = vmatpush.msra.mxu3 %v3657_v34  ;;  %494 = vmatpush.msra.mxu0 %v3662_v36 }
  0x6c   :  { %530 = vmatpush.msra.mxu2 %v3671_v39  ;;  %514 = vmatpush.msra.mxu1 %v3664_v37 }
  0x6d   :  { %554 = vmatpush.msra.mxu3 %v3669_v38  ;;  %495 = vmatpush.msra.mxu0 %v3674_v40 }
  0x6e   :  { %531 = vmatpush.msra.mxu2 %v3683_v43  ;;  %515 = vmatpush.msra.mxu1 %v3676_v41 }
  0x6f   :  { %555 = vmatpush.msra.mxu3 %v3681_v42  ;;  %496 = vmatpush.msra.mxu0 %v3686_v44 }
  0x70   :  { %532 = vmatpush.msra.mxu2 %v3695_v47  ;;  %516 = vmatpush.msra.mxu1 %v3688_v45 }
  0x71   :  { %556 = vmatpush.msra.mxu3 %v3693_v46  ;;  %497 = vmatpush.msra.mxu0 %v3698_v48 }
  0x72   :  { %533 = vmatpush.msra.mxu2 %v3707_v51  ;;  %517 = vmatpush.msra.mxu1 %v3700_v49 }
  0x73   :  { %557 = vmatpush.msra.mxu3 %v3705_v50  ;;  %498 = vmatpush.msra.mxu0 %v3710_v52  ;;  %v92_v52 = vld [vmem:[#allocation4] sm:$0xff] }
  0x74   :  { %534 = vmatpush.msra.mxu2 %v3719_v55  ;;  %518 = vmatpush.msra.mxu1 %v3712_v53  ;;  %v93_v53 = vld [vmem:[#allocation4 + $0x8] sm:$0xff] }
  0x75   :  { %558 = vmatpush.msra.mxu3 %v3717_v54  ;;  %499 = vmatpush.msra.mxu0 %v3722_v56 }
  0x76   :  { %535 = vmatpush.msra.mxu2 %v3735_v59  ;;  %519 = vmatpush.msra.mxu1 %v3724_v57  ;;  %v95_v57 = vld [vmem:[#allocation4 + $0x18] sm:$0xff] }
  0x77   :  { %559 = vmatpush.msra.mxu3 %v3729_v58 }
  0x78   :  { %536 = vmatpush.msra.mxu2 %v3741_v61 }
  0x7a   :  { %537 = vmatpush.msra.mxu2 %v3745_v62 }
  0x7c   :  { %538 = vmatpush.msra.mxu2 %v3751_v63 }
  0x7e   :  { %539 = vmatpush.msra.mxu2 %v3757_v60  ;;  %v94_v60 = vld [vmem:[#allocation4 + $0x10] sm:$0xff] }
  0xb2   :  { %v207_v50 = vpop.f32.mrf.mxu0 }
  0xb3   :  { %v270_v54 = vadd.f32 %v207_v50, %v92_v52  ;;  %v227_v49 = vpop.f32.mrf.mxu1 }
  0xb4   :  { %v271_v48 = vadd.f32 %v227_v49, %v93_v53 }
  0xb5   :  { %v2905_v46 = vmul.f32 -1.442695, %v270_v54 }
  0xb6   :  { %v2906_v56 = vmul.f32 -1.442695, %v271_v48 }
  0xb7   :  { %2966 = vpow2.f32 %v2905_v46 }
  0xb8   :  { %2968 = vpow2.f32 %v2906_v56 }
  0xb9   :  { %v267_v58 = vpop.f32.mrf.mxu3 }
  0xba   :  { %v273_v45 = vadd.f32 %v267_v58, %v95_v57 }
  0xbc   :  { %v2907_v61 = vmul.f32 -1.442695, %v273_v45 }
  0xbd   :  { %v2967_v44 = vpop.eup %2966 }
  0xbe   :  { %v2969_v62 = vpop.eup %2968  ;;  %v277_v42 = vadd.f32 1.0, %v2967_v44  ;;  %2970 = vpow2.f32 %v2907_v61 }
  0xbf   :  { %v296_v63 = vadd.f32 1.0, %v2969_v62 }
  0xc0   :  { %2972 = vrcp.f32 %v277_v42  ;;  %v289_v57 = vand.u32 2147483648, %v277_v42  ;;  %v287_v61 = vand.u32 2147483647, %v277_v42  ;;  %vm283_vm2 = vweird.f32 %v277_v42 }
  0xc1   :  { %2974 = vrcp.f32 %v296_v63  ;;  %v308_v58 = vand.u32 2147483648, %v296_v63  ;;  %v306_v41 = vand.u32 2147483647, %v296_v63  ;;  %vm302_vm3 = vweird.f32 %v296_v63 }
  0xc2   :  { %v247_v59 = vpop.f32.mrf.mxu2  ;;  %vm288_vm5 = vcmp.eq.f32.partialorder %v287_v61, 8.507059e+37  ;;  %v5682_v61 = vld [vmem:[#allocation26_spill] sm:$0xff] }
  0xc3   :  { %v272_v52 = vadd.f32 %v247_v59, %v94_v60  ;;  %vm307_vm7 = vcmp.eq.f32.partialorder %v306_v41, 8.507059e+37 }
  0xc4   :  { %v2971_v50 = vpop.eup %2970 }
  0xc5   :  { %v316_v49 = vadd.f32 1.0, %v2971_v50  ;;  %v290_v50 = vor.u32 1.1754944e-38, %v289_v57 }
  0xc6   :  { %v2973_v53 = vpop.eup %2972 }
  0xc7   :  { %v2975_v48 = vpop.eup %2974  ;;  %v279_v46 = vmul.f32 %v2973_v53, %v277_v42  ;;  %2976 = vrcp.f32 %v316_v49  ;;  %vm284_vm0 = vweird.f32 %v2973_v53  ;;  %vm322_vm9 = vweird.f32 %v316_v49 }
  0xc8   :  { %v298_v54 = vmul.f32 %v2975_v48, %v296_v63  ;;  %2978 = vtanh.f32 %v272_v52  ;;  %vm303_vm1 = vweird.f32 %v2975_v48  ;;  %vm285_vm4 = vmor %vm283_vm2, %vm284_vm0  ;;  %v309_v52 = vor.u32 1.1754944e-38, %v308_v58 }
  0xc9   :  { %v280_v56 = vsub.f32 1.0, %v279_v46  ;;  %vm304_vm6 = vmor %vm302_vm3, %vm303_vm1  ;;  %v328_v63 = vand.u32 2147483648, %v316_v49  ;;  %v326_v57 = vand.u32 2147483647, %v316_v49 }
  0xca   :  { %v299_v45 = vsub.f32 1.0, %v298_v54 }
  0xcb   :  { %v281_v44 = vmul.f32 %v2973_v53, %v280_v56  ;;  %vm327_vm11 = vcmp.eq.f32.partialorder %v326_v57, 8.507059e+37  ;;  %v5694_v57 = vld [vmem:[#allocation36_spill] sm:$0xff] }
  0xcc   :  { %v300_v62 = vmul.f32 %v2975_v48, %v299_v45 }
  0xcd   :  { %v2977_v40 = vpop.eup %2976  ;;  %v282_v38 = vadd.f32 %v2973_v53, %v281_v44 }
  0xce   :  { %v2979_v59 = vpop.eup %2978  ;;  %v318_v60 = vmul.f32 %v2977_v40, %v316_v49  ;;  %v301_v55 = vadd.f32 %v2975_v48, %v300_v62  ;;  %vm323_vm8 = vweird.f32 %v2977_v40  ;;  %v5680_v49 = vld [vmem:[#allocation24_spill] sm:$0xff]  ;;  %v5683_v62 = vld [vmem:[#allocation42_spill] sm:$0xff] }
  0xcf   :  { %v286_v46 = vsel %vm285_vm4, %v2973_v53, %v282_v38  ;;  %vm324_vm10 = vmor %vm322_vm9, %vm323_vm8  ;;  %v329_v53 = vor.u32 1.1754944e-38, %v328_v63  ;;  %v5693_v63 = vld [vmem:[#allocation35_spill] sm:$0xff] }
  0xd0   :  { %v319_v54 = vsub.f32 1.0, %v318_v60  ;;  %v291_v56 = vsel %vm288_vm5, %v290_v50, %v286_v46  ;;  %v305_v37 = vsel %vm304_vm6, %v2975_v48, %v301_v55  ;;  %v5681_v48 = vld [vmem:[#allocation25_spill] sm:$0xff]  ;;  %v5685_v60 = vld [vmem:[#allocation28_spill] sm:$0xff]  ;;  %v5688_v46 = vld [vmem:[#allocation30_spill] sm:$0xff] }
  0xd1   :  { %v310_v45 = vsel %vm307_vm7, %v309_v52, %v305_v37  ;;  %v333_v36 = vmul.f32 %v2979_v59, %v291_v56  ;;  %v5677_v37 = vld [vmem:[#allocation22_spill] sm:$0xff]  ;;  %v5684_v59 = vld [vmem:[#allocation27_spill] sm:$0xff]  ;;  %v5686_v50 = vld [vmem:[#allocation29_spill] sm:$0xff] }
  0xd2   :  { %v320_v34 = vmul.f32 %v2977_v40, %v319_v54  ;;  %v332_v51 = vmul.f32 0.0, %v310_v45  ;;  %v5687_v52 = vld [vmem:[#allocation43_spill] sm:$0xff]  ;;  %v5690_v56 = vld [vmem:[#allocation32_spill] sm:$0xff] }
  0xd3   :  { %v5689_v54 = vld [vmem:[#allocation31_spill] sm:$0xff]  ;;  %v5691_v45 = vld [vmem:[#allocation44_spill] sm:$0xff] }
  0xd4   :  { %v3883_v44 = vadd.f32 %v333_v36, %v332_v51  ;;  %v321_v42 = vadd.f32 %v2977_v40, %v320_v34  ;;  %v5675_v34 = vld [vmem:[#allocation34_spill] sm:$0xff]  ;;  %v5676_v36 = vld [vmem:[#allocation21_spill] sm:$0xff] }
  0xd5   :  { %v5679_v51 = vld [vmem:[#allocation38_spill] sm:$0xff] }
  0xd6   :  { %2980 = vtanh.f32 %v3883_v44  ;;  %v325_v38 = vsel %vm324_vm10, %v2977_v40, %v321_v42  ;;  %v5678_v40 = vld [vmem:[#allocation23_spill] sm:$0xff]  ;;  %v5692_v42 = vld [vmem:[#allocation33_spill] sm:$0xff] }
  0xd7   :  { %v330_v55 = vsel %vm327_vm11, %v329_v53, %v325_v38  ;;  %v5695_v38 = vld [vmem:[#allocation45_spill] sm:$0xff] }
  0xd8   :  { %v5696_v53 = vld [vmem:[#allocation37_spill] sm:$0xff] }
  0xdc   :  { %v2981_v58 = vpop.eup %2980 }
  0xdd   :  { %v3886_v41 = vmul.f32 %v2981_v58, %v330_v55  ;;  %v5697_v58 = vld [vmem:[#allocation39_spill] sm:$0xff]  ;;  %v5698_v55 = vld [vmem:[#allocation40_spill] sm:$0xff] }
  0xdf   :  { %5674 = vst [vmem:[#allocation20_spill] sm:$0xff] %v3886_v41  ;;  %353 = vmatmul.f32.vlgmr.msrb.gmra.mxu0 %v3886_v41  ;;  %373 = vmatmul.f32.vlgmr.msrb.gmra.mxu1 %v3886_v41 }
  0xe0   :  { %393 = vmatmul.f32.vlgmr.msrb.gmra.mxu2 %v3886_v41  ;;  %413 = vmatmul.f32.vlgmr.msrb.gmra.mxu3 %v3886_v41  ;;  %v5699_v41 = vld [vmem:[#allocation46_spill] sm:$0xff] }
  0xe1   :  { %631 = vmatpush.msrb.mxu0 %v3559_v0  ;;  %651 = vmatpush.msrb.mxu1 %v3561_v1 }
  0xe2   :  { %671 = vmatpush.msrb.mxu2 %v3605_v17  ;;  %691 = vmatpush.msrb.mxu3 %v3563_v2 }
  0xe3   :  { %632 = vmatpush.msrb.mxu0 %v3567_v3  ;;  %652 = vmatpush.msrb.mxu1 %v3569_v4 }
  0xe4   :  { %672 = vmatpush.msrb.mxu2 %v3611_v19  ;;  %692 = vmatpush.msrb.mxu3 %v5673_v5 }
  0xe5   :  { %633 = vmatpush.msrb.mxu0 %v3574_v6  ;;  %653 = vmatpush.msrb.mxu1 %v3576_v7 }
  0xe6   :  { %673 = vmatpush.msrb.mxu2 %v3623_v23  ;;  %693 = vmatpush.msrb.mxu3 %v3580_v8 }
  0xe7   :  { %634 = vmatpush.msrb.mxu0 %v3583_v9  ;;  %654 = vmatpush.msrb.mxu1 %v3585_v10 }
  0xe8   :  { %674 = vmatpush.msrb.mxu2 %v3635_v27  ;;  %694 = vmatpush.msrb.mxu3 %v3589_v11 }
  0xe9   :  { %635 = vmatpush.msrb.mxu0 %v3592_v12  ;;  %655 = vmatpush.msrb.mxu1 %v3594_v13 }
  0xea   :  { %675 = vmatpush.msrb.mxu2 %v3647_v31  ;;  %695 = vmatpush.msrb.mxu3 %v3598_v14 }
  0xeb   :  { %636 = vmatpush.msrb.mxu0 %v3601_v15  ;;  %656 = vmatpush.msrb.mxu1 %v3603_v16 }
  0xec   :  { %676 = vmatpush.msrb.mxu2 %v3659_v35  ;;  %696 = vmatpush.msrb.mxu3 %v3609_v18 }
  0xed   :  { %637 = vmatpush.msrb.mxu0 %v3614_v20  ;;  %657 = vmatpush.msrb.mxu1 %v3616_v21 }
  0xee   :  { %677 = vmatpush.msrb.mxu2 %v3671_v39  ;;  %697 = vmatpush.msrb.mxu3 %v3621_v22 }
  0xef   :  { %638 = vmatpush.msrb.mxu0 %v3626_v24  ;;  %658 = vmatpush.msrb.mxu1 %v3628_v25 }
  0xf0   :  { %678 = vmatpush.msrb.mxu2 %v3683_v43  ;;  %698 = vmatpush.msrb.mxu3 %v3633_v26 }
  0xf1   :  { %639 = vmatpush.msrb.mxu0 %v3638_v28  ;;  %659 = vmatpush.msrb.mxu1 %v3640_v29 }
  0xf2   :  { %679 = vmatpush.msrb.mxu2 %v3695_v47  ;;  %699 = vmatpush.msrb.mxu3 %v3645_v30 }
  0xf3   :  { %640 = vmatpush.msrb.mxu0 %v3650_v32  ;;  %660 = vmatpush.msrb.mxu1 %v3652_v33 }
  0xf4   :  { %680 = vmatpush.msrb.mxu2 %v5675_v34  ;;  %700 = vmatpush.msrb.mxu3 %v5676_v36 }
  0xf5   :  { %641 = vmatpush.msrb.mxu0 %v5677_v37  ;;  %661 = vmatpush.msrb.mxu1 %v5678_v40 }
  0xf6   :  { %681 = vmatpush.msrb.mxu2 %v5679_v51  ;;  %701 = vmatpush.msrb.mxu3 %v5680_v49 }
  0xf7   :  { %642 = vmatpush.msrb.mxu0 %v5681_v48  ;;  %662 = vmatpush.msrb.mxu1 %v5682_v61 }
  0xf8   :  { %682 = vmatpush.msrb.mxu2 %v5683_v62  ;;  %702 = vmatpush.msrb.mxu3 %v5684_v59 }
  0xf9   :  { %643 = vmatpush.msrb.mxu0 %v5685_v60  ;;  %663 = vmatpush.msrb.mxu1 %v5686_v50 }
  0xfa   :  { %683 = vmatpush.msrb.mxu2 %v5687_v52  ;;  %703 = vmatpush.msrb.mxu3 %v5688_v46 }
  0xfb   :  { %644 = vmatpush.msrb.mxu0 %v5689_v54  ;;  %664 = vmatpush.msrb.mxu1 %v5690_v56  ;;  %v5700_v54 = vld [vmem:[#allocation41_spill] sm:$0xff]  ;;  %v96_v56 = vld [vmem:[#allocation4 + $0x20] sm:$0xff] }
  0xfc   :  { %684 = vmatpush.msrb.mxu2 %v5691_v45  ;;  %704 = vmatpush.msrb.mxu3 %v5692_v42  ;;  %v97_v45 = vld [vmem:[#allocation4 + $0x28] sm:$0xff] }
  0xfd   :  { %645 = vmatpush.msrb.mxu0 %v5693_v63  ;;  %665 = vmatpush.msrb.mxu1 %v5694_v57 }
  0xfe   :  { %685 = vmatpush.msrb.mxu2 %v5695_v38  ;;  %705 = vmatpush.msrb.mxu3 %v5696_v53  ;;  %v99_v38 = vld [vmem:[#allocation4 + $0x38] sm:$0xff] }
  0xff   :  { %646 = vmatpush.msrb.mxu0 %v5697_v58  ;;  %666 = vmatpush.msrb.mxu1 %v5698_v55 }
 0x100   :  { %686 = vmatpush.msrb.mxu2 %v5699_v41  ;;  %706 = vmatpush.msrb.mxu3 %v5700_v54  ;;  %v98_v54 = vld [vmem:[#allocation4 + $0x30] sm:$0xff] }
 0x15c   :  { %v354_v46 = vpop.f32.mrf.mxu0  ;;  %v374_v42 = vpop.f32.mrf.mxu1 }
 0x15d   :  { %v417_v52 = vadd.f32 %v354_v46, %v96_v56  ;;  %v418_v63 = vadd.f32 %v374_v42, %v97_v45 }
 0x15f   :  { %v2908_v50 = vmul.f32 -1.442695, %v417_v52  ;;  %v2909_v57 = vmul.f32 -1.442695, %v418_v63 }
 0x161   :  { %2982 = vpow2.f32 %v2908_v50 }
 0x162   :  { %2984 = vpow2.f32 %v2909_v57 }
 0x163   :  { %v414_v53 = vpop.f32.mrf.mxu3  ;;  %v394_v61 = vpop.f32.mrf.mxu2 }
 0x164   :  { %v420_v60 = vadd.f32 %v414_v53, %v99_v38  ;;  %v419_v52 = vadd.f32 %v394_v61, %v98_v54 }
 0x166   :  { %v2910_v58 = vmul.f32 -1.442695, %v420_v60 }
 0x167   :  { %v2983_v59 = vpop.eup %2982 }
 0x168   :  { %v2985_v55 = vpop.eup %2984  ;;  %v424_v62 = vadd.f32 1.0, %v2983_v59  ;;  %2986 = vpow2.f32 %v2910_v58 }
 0x169   :  { %v443_v41 = vadd.f32 1.0, %v2985_v55 }
 0x16a   :  { %2988 = vrcp.f32 %v424_v62  ;;  %v436_v60 = vand.u32 2147483648, %v424_v62  ;;  %v434_v53 = vand.u32 2147483647, %v424_v62  ;;  %vm430_vm14 = vweird.f32 %v424_v62 }
 0x16b   :  { %2990 = vrcp.f32 %v443_v41  ;;  %v455_v38 = vand.u32 2147483648, %v443_v41  ;;  %v453_v55 = vand.u32 2147483647, %v443_v41  ;;  %vm449_vm15 = vweird.f32 %v443_v41 }
 0x16c   :  { %vm435_vm2 = vcmp.eq.f32.partialorder %v434_v53, 8.507059e+37 }
 0x16d   :  { %vm454_vm3 = vcmp.eq.f32.partialorder %v453_v55, 8.507059e+37 }
 0x16e   :  { %v2987_v48 = vpop.eup %2986 }
 0x16f   :  { %v463_v46 = vadd.f32 1.0, %v2987_v48  ;;  %v437_v48 = vor.u32 1.1754944e-38, %v436_v60 }
 0x170   :  { %v2989_v56 = vpop.eup %2988 }
 0x171   :  { %v2991_v45 = vpop.eup %2990  ;;  %v426_v50 = vmul.f32 %v2989_v56, %v424_v62  ;;  %2992 = vrcp.f32 %v463_v46  ;;  %vm431_vm12 = vweird.f32 %v2989_v56  ;;  %v475_v60 = vand.u32 2147483648, %v463_v46 }
 0x172   :  { %v445_v42 = vmul.f32 %v2991_v45, %v443_v41  ;;  %2994 = vtanh.f32 %v419_v52  ;;  %vm450_vm13 = vweird.f32 %v2991_v45  ;;  %vm432_vm0 = vmor %vm430_vm14, %vm431_vm12  ;;  %vm469_vm5 = vweird.f32 %v463_v46 }
 0x173   :  { %v427_v63 = vsub.f32 1.0, %v426_v50  ;;  %vm451_vm1 = vmor %vm449_vm15, %vm450_vm13  ;;  %v456_v50 = vor.u32 1.1754944e-38, %v455_v38  ;;  %v476_v38 = vor.u32 1.1754944e-38, %v475_v60 }
 0x174   :  { %v446_v57 = vsub.f32 1.0, %v445_v42 }
 0x175   :  { %v428_v59 = vmul.f32 %v2989_v56, %v427_v63 }
 0x176   :  { %v447_v58 = vmul.f32 %v2991_v45, %v446_v57 }
 0x177   :  { %v2993_v49 = vpop.eup %2992  ;;  %v429_v51 = vadd.f32 %v2989_v56, %v428_v59 }
 0x178   :  { %v448_v61 = vadd.f32 %v2991_v45, %v447_v58  ;;  %v465_v54 = vmul.f32 %v2993_v49, %v463_v46  ;;  %v2995_v52 = vpop.eup %2994  ;;  %vm470_vm4 = vweird.f32 %v2993_v49 }
 0x179   :  { %v433_v42 = vsel %vm432_vm0, %v2989_v56, %v429_v51  ;;  %v473_v51 = vand.u32 2147483647, %v463_v46  ;;  %vm471_vm6 = vmor %vm469_vm5, %vm470_vm4 }
 0x17a   :  { %v438_v40 = vsel %vm435_vm2, %v437_v48, %v433_v42  ;;  %v452_v63 = vsel %vm451_vm1, %v2991_v45, %v448_v61  ;;  %v466_v37 = vsub.f32 1.0, %v465_v54 }
 0x17b   :  { %v457_v57 = vsel %vm454_vm3, %v456_v50, %v452_v63  ;;  %v480_v36 = vmul.f32 %v2995_v52, %v438_v40  ;;  %vm474_vm7 = vcmp.eq.f32.partialorder %v473_v51, 8.507059e+37  ;;  %v102_v40 = vld [vmem:[#allocation4 + $0x50] sm:$0xff] }
 0x17c   :  { %v479_v34 = vmul.f32 %v457_v57, %v3883_v44  ;;  %v467_v59 = vmul.f32 %v2993_v49, %v466_v37 }
 0x17e   :  { %v3957_v62 = vadd.f32 %v480_v36, %v479_v34  ;;  %v468_v41 = vadd.f32 %v2993_v49, %v467_v59 }
 0x180   :  { %2996 = vtanh.f32 %v3957_v62  ;;  %v472_v56 = vsel %vm471_vm6, %v2993_v49, %v468_v41 }
 0x181   :  { %v477_v53 = vsel %vm474_vm7, %v476_v38, %v472_v56 }
 0x186   :  { %v2997_v45 = vpop.eup %2996 }
 0x187   :  { %v3960_v58 = vmul.f32 %v2997_v45, %v477_v53 }
 0x189   :  { %5701 = vst [vmem:[#allocation47_spill] sm:$0xff] %v3960_v58  ;;  %500 = vmatmul.f32.vlgmr.msra.gmra.mxu0 %v3960_v58  ;;  %520 = vmatmul.f32.vlgmr.msra.gmra.mxu1 %v3960_v58 }
 0x18a   :  { %540 = vmatmul.f32.vlgmr.msra.gmra.mxu2 %v3960_v58  ;;  %560 = vmatmul.f32.vlgmr.msra.gmra.mxu3 %v3960_v58  ;;  %v4226_v58 = vld [vmem:[#allocation7 + $0x10] sm:$0xff] }
 0x18b   :  { %778 = vmatpush.msra.mxu0 %v3559_v0  ;;  %798 = vmatpush.msra.mxu1 %v3561_v1  ;;  %v5702_v0 = vld [vmem:[#allocation34_spill] sm:$0xff]  ;;  %v5703_v1 = vld [vmem:[#allocation21_spill] sm:$0xff] }
 0x18c   :  { %818 = vmatpush.msra.mxu2 %v3605_v17  ;;  %838 = vmatpush.msra.mxu3 %v3563_v2  ;;  %v5704_v2 = vld [vmem:[#allocation22_spill] sm:$0xff]  ;;  %v5719_v17 = vld [vmem:[#allocation33_spill] sm:$0xff] }
 0x18d   :  { %779 = vmatpush.msra.mxu0 %v3567_v3  ;;  %799 = vmatpush.msra.mxu1 %v3569_v4  ;;  %v5705_v3 = vld [vmem:[#allocation23_spill] sm:$0xff]  ;;  %v5706_v4 = vld [vmem:[#allocation38_spill] sm:$0xff] }
 0x18e   :  { %819 = vmatpush.msra.mxu2 %v3611_v19  ;;  %839 = vmatpush.msra.mxu3 %v5673_v5  ;;  %v5707_v5 = vld [vmem:[#allocation24_spill] sm:$0xff] }
 0x18f   :  { %780 = vmatpush.msra.mxu0 %v3574_v6  ;;  %800 = vmatpush.msra.mxu1 %v3576_v7  ;;  %v5708_v6 = vld [vmem:[#allocation25_spill] sm:$0xff]  ;;  %v5709_v7 = vld [vmem:[#allocation26_spill] sm:$0xff]  ;;  %v5721_v19 = vld [vmem:[#allocation36_spill] sm:$0xff] }
 0x190   :  { %820 = vmatpush.msra.mxu2 %v3623_v23  ;;  %840 = vmatpush.msra.mxu3 %v3580_v8  ;;  %v5710_v8 = vld [vmem:[#allocation42_spill] sm:$0xff]  ;;  %v5725_v23 = vld [vmem:[#allocation40_spill] sm:$0xff] }
 0x191   :  { %781 = vmatpush.msra.mxu0 %v3583_v9  ;;  %801 = vmatpush.msra.mxu1 %v3585_v10  ;;  %v5711_v9 = vld [vmem:[#allocation27_spill] sm:$0xff]  ;;  %v5712_v10 = vld [vmem:[#allocation28_spill] sm:$0xff] }
 0x192   :  { %821 = vmatpush.msra.mxu2 %v3635_v27  ;;  %841 = vmatpush.msra.mxu3 %v3589_v11  ;;  %v5713_v11 = vld [vmem:[#allocation29_spill] sm:$0xff]  ;;  %v101_v27 = vld [vmem:[#allocation4 + $0x48] sm:$0xff] }
 0x193   :  { %782 = vmatpush.msra.mxu0 %v3592_v12  ;;  %802 = vmatpush.msra.mxu1 %v3594_v13  ;;  %v5714_v12 = vld [vmem:[#allocation43_spill] sm:$0xff]  ;;  %v5715_v13 = vld [vmem:[#allocation30_spill] sm:$0xff] }
 0x194   :  { %822 = vmatpush.msra.mxu2 %v3647_v31  ;;  %842 = vmatpush.msra.mxu3 %v3598_v14  ;;  %v5716_v14 = vld [vmem:[#allocation31_spill] sm:$0xff] }
 0x195   :  { %783 = vmatpush.msra.mxu0 %v3601_v15  ;;  %803 = vmatpush.msra.mxu1 %v3603_v16  ;;  %v5717_v15 = vld [vmem:[#allocation32_spill] sm:$0xff] }
 0x196   :  { %823 = vmatpush.msra.mxu2 %v3659_v35  ;;  %843 = vmatpush.msra.mxu3 %v3609_v18  ;;  %v5718_v16 = vld [vmem:[#allocation44_spill] sm:$0xff]  ;;  %v5720_v18 = vld [vmem:[#allocation35_spill] sm:$0xff]  ;;  %v103_v35 = vld [vmem:[#allocation4 + $0x58] sm:$0xff] }
 0x197   :  { %784 = vmatpush.msra.mxu0 %v3614_v20  ;;  %804 = vmatpush.msra.mxu1 %v3616_v21  ;;  %v5722_v20 = vld [vmem:[#allocation45_spill] sm:$0xff] }
 0x198   :  { %824 = vmatpush.msra.mxu2 %v3671_v39  ;;  %844 = vmatpush.msra.mxu3 %v3621_v22  ;;  %v5723_v21 = vld [vmem:[#allocation37_spill] sm:$0xff]  ;;  %v5724_v22 = vld [vmem:[#allocation39_spill] sm:$0xff] }
 0x199   :  { %785 = vmatpush.msra.mxu0 %v3626_v24  ;;  %805 = vmatpush.msra.mxu1 %v3628_v25  ;;  %v5726_v24 = vld [vmem:[#allocation46_spill] sm:$0xff]  ;;  %v5727_v25 = vld [vmem:[#allocation41_spill] sm:$0xff] }
 0x19a   :  { %825 = vmatpush.msra.mxu2 %v3683_v43  ;;  %845 = vmatpush.msra.mxu3 %v3633_v26  ;;  %v100_v26 = vld [vmem:[#allocation4 + $0x40] sm:$0xff]  ;;  %5753 = vst [vmem:[#allocation41_spill] sm:$0xff] %v4226_v58 }
 0x19b   :  { %786 = vmatpush.msra.mxu0 %v3638_v28  ;;  %806 = vmatpush.msra.mxu1 %v3640_v29 }
 0x19c   :  { %826 = vmatpush.msra.mxu2 %v3695_v47  ;;  %846 = vmatpush.msra.mxu3 %v3645_v30 }
 0x19d   :  { %787 = vmatpush.msra.mxu0 %v3650_v32  ;;  %807 = vmatpush.msra.mxu1 %v3652_v33 }
 0x19e   :  { %827 = vmatpush.msra.mxu2 %v5702_v0  ;;  %847 = vmatpush.msra.mxu3 %v5703_v1 }
 0x19f   :  { %788 = vmatpush.msra.mxu0 %v5704_v2  ;;  %808 = vmatpush.msra.mxu1 %v5705_v3 }
 0x1a0   :  { %828 = vmatpush.msra.mxu2 %v5706_v4  ;;  %848 = vmatpush.msra.mxu3 %v5707_v5 }
 0x1a1   :  { %789 = vmatpush.msra.mxu0 %v5708_v6  ;;  %809 = vmatpush.msra.mxu1 %v5709_v7 }
 0x1a2   :  { %829 = vmatpush.msra.mxu2 %v5710_v8  ;;  %849 = vmatpush.msra.mxu3 %v5711_v9 }
 0x1a3   :  { %790 = vmatpush.msra.mxu0 %v5712_v10  ;;  %810 = vmatpush.msra.mxu1 %v5713_v11 }
 0x1a4   :  { %830 = vmatpush.msra.mxu2 %v5714_v12  ;;  %850 = vmatpush.msra.mxu3 %v5715_v13 }
 0x1a5   :  { %791 = vmatpush.msra.mxu0 %v5716_v14  ;;  %811 = vmatpush.msra.mxu1 %v5717_v15 }
 0x1a6   :  { %831 = vmatpush.msra.mxu2 %v5718_v16  ;;  %851 = vmatpush.msra.mxu3 %v5719_v17 }
 0x1a7   :  { %792 = vmatpush.msra.mxu0 %v5720_v18  ;;  %812 = vmatpush.msra.mxu1 %v5721_v19 }
 0x1a8   :  { %832 = vmatpush.msra.mxu2 %v5722_v20  ;;  %852 = vmatpush.msra.mxu3 %v5723_v21  ;;  %v4043_v21 = vld [vmem:[#allocation7 + $0x1e8] sm:$0xff] }
 0x1a9   :  { %793 = vmatpush.msra.mxu0 %v5724_v22  ;;  %813 = vmatpush.msra.mxu1 %v5725_v23  ;;  %v4046_v22 = vld [vmem:[#allocation7 + $0x1f0] sm:$0xff]  ;;  %v4049_v23 = vld [vmem:[#allocation7 + $0x1f8] sm:$0xff] }
 0x1aa   :  { %833 = vmatpush.msra.mxu2 %v5726_v24  ;;  %853 = vmatpush.msra.mxu3 %v5727_v25  ;;  %v4052_v24 = vld [vmem:[#allocation7 + $0x1c0] sm:$0xff]  ;;  %v4055_v25 = vld [vmem:[#allocation7 + $0x1c8] sm:$0xff] }
 0x206   :  { %v501_v28 = vpop.f32.mrf.mxu0  ;;  %v521_v29 = vpop.f32.mrf.mxu1 }
 0x207   :  { %v564_v30 = vadd.f32 %v501_v28, %v100_v26  ;;  %v565_v31 = vadd.f32 %v521_v29, %v101_v27  ;;  %v4058_v26 = vld [vmem:[#allocation7 + $0x1d0] sm:$0xff]  ;;  %v4061_v27 = vld [vmem:[#allocation7 + $0x1d8] sm:$0xff]  ;;  %v4064_v28 = vld [vmem:[#allocation7 + $0x1a0] sm:$0xff] }
 0x208   :  { %v4067_v29 = vld [vmem:[#allocation7 + $0x1a8] sm:$0xff] }
 0x209   :  { %v2911_v32 = vmul.f32 -1.442695, %v564_v30  ;;  %v2912_v33 = vmul.f32 -1.442695, %v565_v31  ;;  %v4070_v30 = vld [vmem:[#allocation7 + $0x1b0] sm:$0xff]  ;;  %v4073_v31 = vld [vmem:[#allocation7 + $0x1b8] sm:$0xff] }
 0x20b   :  { %2998 = vpow2.f32 %v2911_v32  ;;  %v4076_v32 = vld [vmem:[#allocation7 + $0x180] sm:$0xff] }
 0x20c   :  { %3000 = vpow2.f32 %v2912_v33  ;;  %v4079_v33 = vld [vmem:[#allocation7 + $0x188] sm:$0xff] }
 0x20d   :  { %v561_v39 = vpop.f32.mrf.mxu3  ;;  %v541_v49 = vpop.f32.mrf.mxu2 }
 0x20e   :  { %v567_v43 = vadd.f32 %v561_v39, %v103_v35  ;;  %v566_v61 = vadd.f32 %v541_v49, %v102_v40  ;;  %v4082_v35 = vld [vmem:[#allocation7 + $0x190] sm:$0xff]  ;;  %v4085_v39 = vld [vmem:[#allocation7 + $0x198] sm:$0xff] }
 0x20f   :  { %v4106_v40 = vld [vmem:[#allocation7 + $0x150] sm:$0xff]  ;;  %v4109_v49 = vld [vmem:[#allocation7 + $0x158] sm:$0xff] }
 0x210   :  { %v2913_v47 = vmul.f32 -1.442695, %v567_v43  ;;  %v4088_v43 = vld [vmem:[#allocation7 + $0x160] sm:$0xff] }
 0x211   :  { %v2999_v44 = vpop.eup %2998 }
 0x212   :  { %v3001_v34 = vpop.eup %3000  ;;  %v571_v36 = vadd.f32 1.0, %v2999_v44  ;;  %3002 = vpow2.f32 %v2913_v47  ;;  %v4091_v47 = vld [vmem:[#allocation7 + $0x168] sm:$0xff]  ;;  %v4094_v44 = vld [vmem:[#allocation7 + $0x170] sm:$0xff] }
 0x213   :  { %v590_v37 = vadd.f32 1.0, %v3001_v34  ;;  %v4097_v34 = vld [vmem:[#allocation7 + $0x178] sm:$0xff] }
 0x214   :  { %3004 = vrcp.f32 %v571_v36  ;;  %v583_v57 = vand.u32 2147483648, %v571_v36  ;;  %v581_v60 = vand.u32 2147483647, %v571_v36  ;;  %vm577_vm10 = vweird.f32 %v571_v36 }
 0x215   :  { %3006 = vrcp.f32 %v590_v37  ;;  %v602_v59 = vand.u32 2147483648, %v590_v37  ;;  %v600_v56 = vand.u32 2147483647, %v590_v37  ;;  %vm596_vm11 = vweird.f32 %v590_v37 }
 0x216   :  { %v584_v53 = vor.u32 1.1754944e-38, %v583_v57  ;;  %vm582_vm14 = vcmp.eq.f32.partialorder %v581_v60, 8.507059e+37  ;;  %v4139_v57 = vld [vmem:[#allocation7 + $0xe8] sm:$0xff]  ;;  %v4148_v60 = vld [vmem:[#allocation7 + $0xc0] sm:$0xff] }
 0x217   :  { %v603_v2 = vor.u32 1.1754944e-38, %v602_v59  ;;  %vm601_vm15 = vcmp.eq.f32.partialorder %v600_v56, 8.507059e+37  ;;  %v4142_v59 = vld [vmem:[#allocation7 + $0xf0] sm:$0xff] }
 0x218   :  { %v3003_v46 = vpop.eup %3002  ;;  %v4154_v56 = vld [vmem:[#allocation7 + $0xd0] sm:$0xff] }
 0x219   :  { %v610_v55 = vadd.f32 1.0, %v3003_v46  ;;  %v4112_v46 = vld [vmem:[#allocation7 + $0x120] sm:$0xff]  ;;  %5729 = vst [vmem:[#allocation21_spill] sm:$0xff] %v4154_v56 }
 0x21a   :  { %v3005_v48 = vpop.eup %3004 }
 0x21b   :  { %v3007_v54 = vpop.eup %3006  ;;  %v573_v50 = vmul.f32 %v3005_v48, %v571_v36  ;;  %3008 = vrcp.f32 %v610_v55  ;;  %vm578_vm8 = vweird.f32 %v3005_v48  ;;  %v622_v14 = vand.u32 2147483648, %v610_v55  ;;  %v4100_v36 = vld [vmem:[#allocation7 + $0x140] sm:$0xff] }
 0x21c   :  { %v592_v42 = vmul.f32 %v3007_v54, %v590_v37  ;;  %3010 = vtanh.f32 %v566_v61  ;;  %vm597_vm9 = vweird.f32 %v3007_v54  ;;  %vm579_vm12 = vmor %vm577_vm10, %vm578_vm8  ;;  %vm616_vm1 = vweird.f32 %v610_v55  ;;  %v4103_v37 = vld [vmem:[#allocation7 + $0x148] sm:$0xff]  ;;  %v4121_v61 = vld [vmem:[#allocation7 + $0x138] sm:$0xff] }
 0x21d   :  { %v574_v52 = vsub.f32 1.0, %v573_v50  ;;  %vm598_vm13 = vmor %vm596_vm11, %vm597_vm9  ;;  %v620_v15 = vand.u32 2147483647, %v610_v55  ;;  %v623_v17 = vor.u32 1.1754944e-38, %v622_v14  ;;  %v4127_v50 = vld [vmem:[#allocation7 + $0x108] sm:$0xff]  ;;  %v4205_v14 = vld [vmem:[#allocation7 + $0x58] sm:$0xff] }
 0x21e   :  { %v593_v63 = vsub.f32 1.0, %v592_v42  ;;  %v4130_v42 = vld [vmem:[#allocation7 + $0x110] sm:$0xff]  ;;  %5746 = vst [vmem:[#allocation35_spill] sm:$0xff] %v4205_v14 }
 0x21f   :  { %v575_v41 = vmul.f32 %v3005_v48, %v574_v52  ;;  %vm621_vm3 = vcmp.eq.f32.partialorder %v620_v15, 8.507059e+37  ;;  %v4133_v52 = vld [vmem:[#allocation7 + $0x118] sm:$0xff]  ;;  %v4208_v15 = vld [vmem:[#allocation7 + $0x20] sm:$0xff] }
 0x220   :  { %v594_v51 = vmul.f32 %v3007_v54, %v593_v63  ;;  %v4136_v63 = vld [vmem:[#allocation7 + $0xe0] sm:$0xff]  ;;  %5747 = vst [vmem:[#allocation36_spill] sm:$0xff] %v4208_v15 }
 0x221   :  { %v3009_v38 = vpop.eup %3008  ;;  %v576_v45 = vadd.f32 %v3005_v48, %v575_v41  ;;  %v4145_v41 = vld [vmem:[#allocation7 + $0xf8] sm:$0xff] }
 0x222   :  { %v595_v0 = vadd.f32 %v3007_v54, %v594_v51  ;;  %v612_v1 = vmul.f32 %v3009_v38, %v610_v55  ;;  %v3011_v4 = vpop.eup %3010  ;;  %vm617_vm0 = vweird.f32 %v3009_v38  ;;  %v4115_v55 = vld [vmem:[#allocation7 + $0x128] sm:$0xff] }
 0x223   :  { %v580_v3 = vsel %vm579_vm12, %v3005_v48, %v576_v45  ;;  %vm618_vm2 = vmor %vm616_vm1, %vm617_vm0  ;;  %v4118_v48 = vld [vmem:[#allocation7 + $0x130] sm:$0xff]  ;;  %v4151_v51 = vld [vmem:[#allocation7 + $0xc8] sm:$0xff] }
 0x224   :  { %v585_v5 = vsel %vm582_vm14, %v584_v53, %v580_v3  ;;  %v599_v6 = vsel %vm598_vm13, %v3007_v54, %v595_v0  ;;  %v613_v7 = vsub.f32 1.0, %v612_v1  ;;  %v4124_v54 = vld [vmem:[#allocation7 + $0x100] sm:$0xff]  ;;  %v4163_v53 = vld [vmem:[#allocation7 + $0xa8] sm:$0xff]  ;;  %v4166_v0 = vld [vmem:[#allocation7 + $0xb0] sm:$0xff] }
 0x225   :  { %v604_v8 = vsel %vm601_vm15, %v603_v2, %v599_v6  ;;  %v627_v9 = vmul.f32 %v3011_v4, %v585_v5  ;;  %v4160_v45 = vld [vmem:[#allocation7 + $0xa0] sm:$0xff]  ;;  %5732 = vst [vmem:[#allocation38_spill] sm:$0xff] %v4163_v53  ;;  %v4169_v1 = vld [vmem:[#allocation7 + $0xb8] sm:$0xff]  ;;  %v4175_v3 = vld [vmem:[#allocation7 + $0x88] sm:$0xff] }
 0x226   :  { %v626_v10 = vmul.f32 %v604_v8, %v3957_v62  ;;  %v614_v11 = vmul.f32 %v3009_v38, %v613_v7  ;;  %v4040_v62 = vld [vmem:[#allocation7 + $0x1e0] sm:$0xff]  ;;  %5731 = vst [vmem:[#allocation23_spill] sm:$0xff] %v4160_v45  ;;  %v4178_v4 = vld [vmem:[#allocation7 + $0x90] sm:$0xff]  ;;  %v4181_v5 = vld [vmem:[#allocation7 + $0x98] sm:$0xff] }
 0x227   :  { %5733 = vst [vmem:[#allocation24_spill] sm:$0xff] %v4166_v0  ;;  %v4172_v2 = vld [vmem:[#allocation7 + $0x80] sm:$0xff]  ;;  %v4187_v7 = vld [vmem:[#allocation7 + $0x68] sm:$0xff]  ;;  %v4190_v8 = vld [vmem:[#allocation7 + $0x70] sm:$0xff] }
 0x228   :  { %v4031_v12 = vadd.f32 %v627_v9, %v626_v10  ;;  %v615_v13 = vadd.f32 %v3009_v38, %v614_v11  ;;  %5734 = vst [vmem:[#allocation25_spill] sm:$0xff] %v4169_v1  ;;  %v4184_v6 = vld [vmem:[#allocation7 + $0x60] sm:$0xff]  ;;  %v4193_v9 = vld [vmem:[#allocation7 + $0x78] sm:$0xff]  ;;  %v4199_v11 = vld [vmem:[#allocation7 + $0x48] sm:$0xff] }
 0x229   :  { %5735 = vst [vmem:[#allocation26_spill] sm:$0xff] %v4172_v2  ;;  %v4196_v10 = vld [vmem:[#allocation7 + $0x40] sm:$0xff] }
 0x22a   :  { %3012 = vtanh.f32 %v4031_v12  ;;  %v619_v16 = vsel %vm618_vm2, %v3009_v38, %v615_v13  ;;  %v4157_v38 = vld [vmem:[#allocation7 + $0xd8] sm:$0xff]  ;;  %5736 = vst [vmem:[#allocation42_spill] sm:$0xff] %v4175_v3  ;;  %v4202_v13 = vld [vmem:[#allocation7 + $0x50] sm:$0xff] }
 0x22b   :  { %v624_v19 = vsel %vm621_vm3, %v623_v17, %v619_v16  ;;  %5730 = vst [vmem:[#allocation22_spill] sm:$0xff] %v4157_v38  ;;  %v4211_v16 = vld [vmem:[#allocation7 + $0x28] sm:$0xff]  ;;  %v4214_v17 = vld [vmem:[#allocation7 + $0x30] sm:$0xff] }
 0x22c   :  { %5737 = vst [vmem:[#allocation27_spill] sm:$0xff] %v4178_v4 }
 0x22d   :  { %5738 = vst [vmem:[#allocation28_spill] sm:$0xff] %v4181_v5 }
 0x22e   :  { %5739 = vst [vmem:[#allocation29_spill] sm:$0xff] %v4184_v6 }
 0x22f   :  { %5740 = vst [vmem:[#allocation43_spill] sm:$0xff] %v4187_v7 }
 0x230   :  { %v3013_v18 = vpop.eup %3012  ;;  %5741 = vst [vmem:[#allocation30_spill] sm:$0xff] %v4190_v8 }
 0x231   :  { %v4034_v20 = vmul.f32 %v3013_v18, %v624_v19  ;;  %5742 = vst [vmem:[#allocation31_spill] sm:$0xff] %v4193_v9  ;;  %v4217_v18 = vld [vmem:[#allocation7 + $0x38] sm:$0xff]  ;;  %v4220_v19 = vld [vmem:[#allocation7] sm:$0xff] }
 0x232   :  { %5743 = vst [vmem:[#allocation32_spill] sm:$0xff] %v4196_v10 }
 0x233   :  { %5728 = vst [vmem:[#allocation34_spill] sm:$0xff] %v4034_v20  ;;  %647 = vmatmul.f32.vlgmr.msrb.gmra.mxu0 %v4034_v20  ;;  %667 = vmatmul.f32.vlgmr.msrb.gmra.mxu1 %v4034_v20 }
 0x234   :  { %687 = vmatmul.f32.vlgmr.msrb.gmra.mxu2 %v4034_v20  ;;  %707 = vmatmul.f32.vlgmr.msrb.gmra.mxu3 %v4034_v20  ;;  %5744 = vst [vmem:[#allocation44_spill] sm:$0xff] %v4199_v11  ;;  %v4223_v20 = vld [vmem:[#allocation7 + $0x8] sm:$0xff] }
 0x235   :  { %925 = vmatpush.msrb.mxu0 %v4040_v62  ;;  %945 = vmatpush.msrb.mxu1 %v4043_v21  ;;  %5745 = vst [vmem:[#allocation33_spill] sm:$0xff] %v4202_v13 }
 0x236   :  { %965 = vmatpush.msrb.mxu2 %v4046_v22  ;;  %985 = vmatpush.msrb.mxu3 %v4049_v23  ;;  %5748 = vst [vmem:[#allocation45_spill] sm:$0xff] %v4211_v16 }
 0x237   :  { %926 = vmatpush.msrb.mxu0 %v4052_v24  ;;  %946 = vmatpush.msrb.mxu1 %v4055_v25  ;;  %5749 = vst [vmem:[#allocation37_spill] sm:$0xff] %v4214_v17 }
 0x238   :  { %966 = vmatpush.msrb.mxu2 %v4058_v26  ;;  %986 = vmatpush.msrb.mxu3 %v4061_v27  ;;  %5750 = vst [vmem:[#allocation39_spill] sm:$0xff] %v4217_v18 }
 0x239   :  { %927 = vmatpush.msrb.mxu0 %v4064_v28  ;;  %947 = vmatpush.msrb.mxu1 %v4067_v29  ;;  %5751 = vst [vmem:[#allocation40_spill] sm:$0xff] %v4220_v19 }
 0x23a   :  { %967 = vmatpush.msrb.mxu2 %v4070_v30  ;;  %987 = vmatpush.msrb.mxu3 %v4073_v31  ;;  %5752 = vst [vmem:[#allocation46_spill] sm:$0xff] %v4223_v20 }
 0x23b   :  { %928 = vmatpush.msrb.mxu0 %v4076_v32  ;;  %948 = vmatpush.msrb.mxu1 %v4079_v33 }
 0x23c   :  { %968 = vmatpush.msrb.mxu2 %v4082_v35  ;;  %988 = vmatpush.msrb.mxu3 %v4085_v39 }
 0x23d   :  { %929 = vmatpush.msrb.mxu0 %v4088_v43  ;;  %949 = vmatpush.msrb.mxu1 %v4091_v47 }
 0x23e   :  { %969 = vmatpush.msrb.mxu2 %v4094_v44  ;;  %989 = vmatpush.msrb.mxu3 %v4097_v34 }
 0x23f   :  { %930 = vmatpush.msrb.mxu0 %v4100_v36  ;;  %950 = vmatpush.msrb.mxu1 %v4103_v37 }
 0x240   :  { %970 = vmatpush.msrb.mxu2 %v4106_v40  ;;  %990 = vmatpush.msrb.mxu3 %v4109_v49 }
 0x241   :  { %931 = vmatpush.msrb.mxu0 %v4112_v46  ;;  %951 = vmatpush.msrb.mxu1 %v4115_v55 }
 0x242   :  { %971 = vmatpush.msrb.mxu2 %v4118_v48  ;;  %991 = vmatpush.msrb.mxu3 %v4121_v61 }
 0x243   :  { %932 = vmatpush.msrb.mxu0 %v4124_v54  ;;  %952 = vmatpush.msrb.mxu1 %v4127_v50 }
 0x244   :  { %972 = vmatpush.msrb.mxu2 %v4130_v42  ;;  %992 = vmatpush.msrb.mxu3 %v4133_v52 }
 0x245   :  { %933 = vmatpush.msrb.mxu0 %v4136_v63  ;;  %953 = vmatpush.msrb.mxu1 %v4139_v57 }
 0x246   :  { %973 = vmatpush.msrb.mxu2 %v4142_v59  ;;  %993 = vmatpush.msrb.mxu3 %v4145_v41 }
 0x247   :  { %934 = vmatpush.msrb.mxu0 %v4148_v60  ;;  %954 = vmatpush.msrb.mxu1 %v4151_v51 }
 0x248   :  { %974 = vmatpush.msrb.mxu2 %v4154_v56  ;;  %994 = vmatpush.msrb.mxu3 %v4157_v38 }
 0x249   :  { %935 = vmatpush.msrb.mxu0 %v4160_v45  ;;  %955 = vmatpush.msrb.mxu1 %v4163_v53 }
 0x24a   :  { %975 = vmatpush.msrb.mxu2 %v4166_v0  ;;  %995 = vmatpush.msrb.mxu3 %v4169_v1 }
 0x24b   :  { %936 = vmatpush.msrb.mxu0 %v4172_v2  ;;  %956 = vmatpush.msrb.mxu1 %v4175_v3 }
 0x24c   :  { %976 = vmatpush.msrb.mxu2 %v4178_v4  ;;  %996 = vmatpush.msrb.mxu3 %v4181_v5 }
 0x24d   :  { %937 = vmatpush.msrb.mxu0 %v4184_v6  ;;  %957 = vmatpush.msrb.mxu1 %v4187_v7 }
 0x24e   :  { %977 = vmatpush.msrb.mxu2 %v4190_v8  ;;  %997 = vmatpush.msrb.mxu3 %v4193_v9  ;;  %v107_v9 = vld [vmem:[#allocation4 + $0x78] sm:$0xff] }
 0x24f   :  { %938 = vmatpush.msrb.mxu0 %v4196_v10  ;;  %958 = vmatpush.msrb.mxu1 %v4199_v11 }
 0x250   :  { %978 = vmatpush.msrb.mxu2 %v4202_v13  ;;  %998 = vmatpush.msrb.mxu3 %v4205_v14 }
 0x251   :  { %939 = vmatpush.msrb.mxu0 %v4208_v15  ;;  %959 = vmatpush.msrb.mxu1 %v4211_v16  ;;  %v4229_v16 = vld [vmem:[#allocation7 + $0x18] sm:$0xff]  ;;  %v105_v15 = vld [vmem:[#allocation4 + $0x68] sm:$0xff] }
 0x252   :  { %979 = vmatpush.msrb.mxu2 %v4214_v17  ;;  %999 = vmatpush.msrb.mxu3 %v4217_v18  ;;  %5754 = vst [vmem:[#allocation48_spill] sm:$0xff] %v4229_v16  ;;  %v104_v17 = vld [vmem:[#allocation4 + $0x60] sm:$0xff] }
 0x253   :  { %940 = vmatpush.msrb.mxu0 %v4220_v19  ;;  %960 = vmatpush.msrb.mxu1 %v4223_v20 }
 0x254   :  { %980 = vmatpush.msrb.mxu2 %v4226_v58  ;;  %1000 = vmatpush.msrb.mxu3 %v4229_v16  ;;  %v106_v16 = vld [vmem:[#allocation4 + $0x70] sm:$0xff] }
 0x2b0   :  { %v648_v14 = vpop.f32.mrf.mxu0  ;;  %v668_v18 = vpop.f32.mrf.mxu1 }
 0x2b1   :  { %v711_v13 = vadd.f32 %v648_v14, %v104_v17  ;;  %v712_v11 = vadd.f32 %v668_v18, %v105_v15 }
 0x2b3   :  { %v2914_v10 = vmul.f32 -1.442695, %v711_v13  ;;  %v2915_v19 = vmul.f32 -1.442695, %v712_v11 }
 0x2b5   :  { %3014 = vpow2.f32 %v2914_v10 }
 0x2b6   :  { %3016 = vpow2.f32 %v2915_v19 }
 0x2b7   :  { %v708_v20 = vpop.f32.mrf.mxu3  ;;  %v688_v3 = vpop.f32.mrf.mxu2 }
 0x2b8   :  { %v714_v8 = vadd.f32 %v708_v20, %v107_v9  ;;  %v713_v13 = vadd.f32 %v688_v3, %v106_v16 }
 0x2ba   :  { %v2916_v7 = vmul.f32 -1.442695, %v714_v8 }
 0x2bb   :  { %v3015_v6 = vpop.eup %3014 }
 0x2bc   :  { %v3017_v58 = vpop.eup %3016  ;;  %v718_v5 = vadd.f32 1.0, %v3015_v6  ;;  %3018 = vpow2.f32 %v2916_v7 }
 0x2bd   :  { %v737_v4 = vadd.f32 1.0, %v3017_v58 }
 0x2be   :  { %3020 = vrcp.f32 %v718_v5  ;;  %v730_v8 = vand.u32 2147483648, %v718_v5  ;;  %v728_v58 = vand.u32 2147483647, %v718_v5  ;;  %vm724_vm6 = vweird.f32 %v718_v5 }
 0x2bf   :  { %3022 = vrcp.f32 %v737_v4  ;;  %v749_v9 = vand.u32 2147483648, %v737_v4  ;;  %v747_v19 = vand.u32 2147483647, %v737_v4  ;;  %vm743_vm7 = vweird.f32 %v737_v4 }
 0x2c0   :  { %vm729_vm10 = vcmp.eq.f32.partialorder %v728_v58, 8.507059e+37 }
 0x2c1   :  { %vm748_vm11 = vcmp.eq.f32.partialorder %v747_v19, 8.507059e+37  ;;  %v5763_v19 = vld [vmem:[#allocation42_spill] sm:$0xff] }
 0x2c2   :  { %v3019_v2 = vpop.eup %3018 }
 0x2c3   :  { %v757_v14 = vadd.f32 1.0, %v3019_v2  ;;  %v731_v2 = vor.u32 1.1754944e-38, %v730_v8 }
 0x2c4   :  { %v3021_v15 = vpop.eup %3020 }
 0x2c5   :  { %v3023_v11 = vpop.eup %3022  ;;  %v720_v10 = vmul.f32 %v3021_v15, %v718_v5  ;;  %3024 = vrcp.f32 %v757_v14  ;;  %vm725_vm4 = vweird.f32 %v3021_v15  ;;  %v769_v8 = vand.u32 2147483648, %v757_v14 }
 0x2c6   :  { %v739_v17 = vmul.f32 %v3023_v11, %v737_v4  ;;  %3026 = vtanh.f32 %v713_v13  ;;  %vm744_vm5 = vweird.f32 %v3023_v11  ;;  %vm726_vm8 = vmor %vm724_vm6, %vm725_vm4  ;;  %vm763_vm13 = vweird.f32 %v757_v14 }
 0x2c7   :  { %v721_v18 = vsub.f32 1.0, %v720_v10  ;;  %vm745_vm9 = vmor %vm743_vm7, %vm744_vm5  ;;  %v750_v10 = vor.u32 1.1754944e-38, %v749_v9  ;;  %v770_v9 = vor.u32 1.1754944e-38, %v769_v8  ;;  %v5774_v8 = vld [vmem:[#allocation36_spill] sm:$0xff] }
 0x2c8   :  { %v740_v20 = vsub.f32 1.0, %v739_v17 }
 0x2c9   :  { %v722_v6 = vmul.f32 %v3021_v15, %v721_v18 }
 0x2ca   :  { %v741_v7 = vmul.f32 %v3023_v11, %v740_v20 }
 0x2cb   :  { %v3025_v1 = vpop.eup %3024  ;;  %v723_v0 = vadd.f32 %v3021_v15, %v722_v6 }
 0x2cc   :  { %v742_v3 = vadd.f32 %v3023_v11, %v741_v7  ;;  %v759_v16 = vmul.f32 %v3025_v1, %v757_v14  ;;  %v3027_v13 = vpop.eup %3026  ;;  %vm764_vm12 = vweird.f32 %v3025_v1 }
 0x2cd   :  { %v727_v17 = vsel %vm726_vm8, %v3021_v15, %v723_v0  ;;  %v767_v0 = vand.u32 2147483647, %v757_v14  ;;  %vm765_vm14 = vmor %vm763_vm13, %vm764_vm12  ;;  %v5762_v14 = vld [vmem:[#allocation26_spill] sm:$0xff] }
 0x2ce   :  { %v732_v53 = vsel %vm729_vm10, %v731_v2, %v727_v17  ;;  %v746_v18 = vsel %vm745_vm9, %v3023_v11, %v742_v3  ;;  %v760_v45 = vsub.f32 1.0, %v759_v16  ;;  %v5764_v2 = vld [vmem:[#allocation27_spill] sm:$0xff]  ;;  %v5765_v3 = vld [vmem:[#allocation28_spill] sm:$0xff]  ;;  %v5766_v16 = vld [vmem:[#allocation29_spill] sm:$0xff] }
 0x2cf   :  { %v751_v20 = vsel %vm748_vm11, %v750_v10, %v746_v18  ;;  %v774_v38 = vmul.f32 %v3027_v13, %v732_v53  ;;  %vm768_vm15 = vcmp.eq.f32.partialorder %v767_v0, 8.507059e+37  ;;  %v5760_v53 = vld [vmem:[#allocation24_spill] sm:$0xff]  ;;  %v5767_v10 = vld [vmem:[#allocation43_spill] sm:$0xff]  ;;  %v5768_v17 = vld [vmem:[#allocation30_spill] sm:$0xff] }
 0x2d0   :  { %v773_v56 = vmul.f32 %v751_v20, %v4031_v12  ;;  %v761_v6 = vmul.f32 %v3025_v1, %v760_v45  ;;  %v5756_v12 = vld [vmem:[#allocation21_spill] sm:$0xff]  ;;  %v5759_v45 = vld [vmem:[#allocation38_spill] sm:$0xff]  ;;  %v5769_v13 = vld [vmem:[#allocation31_spill] sm:$0xff] }
 0x2d1   :  { %v5770_v18 = vld [vmem:[#allocation32_spill] sm:$0xff]  ;;  %v5775_v0 = vld [vmem:[#allocation45_spill] sm:$0xff] }
 0x2d2   :  { %v4233_v5 = vadd.f32 %v774_v38, %v773_v56  ;;  %v762_v4 = vadd.f32 %v3025_v1, %v761_v6  ;;  %v5757_v56 = vld [vmem:[#allocation22_spill] sm:$0xff]  ;;  %v5758_v38 = vld [vmem:[#allocation23_spill] sm:$0xff]  ;;  %v5771_v20 = vld [vmem:[#allocation44_spill] sm:$0xff] }
 0x2d3   :  { %v5772_v6 = vld [vmem:[#allocation33_spill] sm:$0xff] }
 0x2d4   :  { %3028 = vtanh.f32 %v4233_v5  ;;  %v766_v15 = vsel %vm765_vm14, %v3025_v1, %v762_v4  ;;  %v5761_v1 = vld [vmem:[#allocation25_spill] sm:$0xff]  ;;  %v5773_v4 = vld [vmem:[#allocation35_spill] sm:$0xff] }
 0x2d5   :  { %v771_v58 = vsel %vm768_vm15, %v770_v9, %v766_v15  ;;  %v5776_v15 = vld [vmem:[#allocation37_spill] sm:$0xff]  ;;  %v5777_v9 = vld [vmem:[#allocation39_spill] sm:$0xff] }
 0x2da   :  { %v3029_v11 = vpop.eup %3028 }
 0x2db   :  { %v4236_v7 = vmul.f32 %v3029_v11, %v771_v58  ;;  %v5778_v11 = vld [vmem:[#allocation40_spill] sm:$0xff]  ;;  %v5779_v58 = vld [vmem:[#allocation46_spill] sm:$0xff] }
 0x2dd   :  { %5755 = vst [vmem:[#allocation49_spill] sm:$0xff] %v4236_v7  ;;  %794 = vmatmul.f32.vlgmr.msra.gmra.mxu0 %v4236_v7  ;;  %814 = vmatmul.f32.vlgmr.msra.gmra.mxu1 %v4236_v7 }
 0x2de   :  { %834 = vmatmul.f32.vlgmr.msra.gmra.mxu2 %v4236_v7  ;;  %854 = vmatmul.f32.vlgmr.msra.gmra.mxu3 %v4236_v7  ;;  %v5780_v7 = vld [vmem:[#allocation41_spill] sm:$0xff] }
 0x2df   :  { %1072 = vmatpush.msra.mxu0 %v4040_v62  ;;  %1092 = vmatpush.msra.mxu1 %v4043_v21 }
 0x2e0   :  { %1112 = vmatpush.msra.mxu2 %v4046_v22  ;;  %1132 = vmatpush.msra.mxu3 %v4049_v23 }
 0x2e1   :  { %1073 = vmatpush.msra.mxu0 %v4052_v24  ;;  %1093 = vmatpush.msra.mxu1 %v4055_v25 }
 0x2e2   :  { %1113 = vmatpush.msra.mxu2 %v4058_v26  ;;  %1133 = vmatpush.msra.mxu3 %v4061_v27 }
 0x2e3   :  { %1074 = vmatpush.msra.mxu0 %v4064_v28  ;;  %1094 = vmatpush.msra.mxu1 %v4067_v29 }
 0x2e4   :  { %1114 = vmatpush.msra.mxu2 %v4070_v30  ;;  %1134 = vmatpush.msra.mxu3 %v4073_v31 }
 0x2e5   :  { %1075 = vmatpush.msra.mxu0 %v4076_v32  ;;  %1095 = vmatpush.msra.mxu1 %v4079_v33 }
 0x2e6   :  { %1115 = vmatpush.msra.mxu2 %v4082_v35  ;;  %1135 = vmatpush.msra.mxu3 %v4085_v39 }
 0x2e7   :  { %1076 = vmatpush.msra.mxu0 %v4088_v43  ;;  %1096 = vmatpush.msra.mxu1 %v4091_v47 }
 0x2e8   :  { %1116 = vmatpush.msra.mxu2 %v4094_v44  ;;  %1136 = vmatpush.msra.mxu3 %v4097_v34 }
 0x2e9   :  { %1077 = vmatpush.msra.mxu0 %v4100_v36  ;;  %1097 = vmatpush.msra.mxu1 %v4103_v37 }
 0x2ea   :  { %1117 = vmatpush.msra.mxu2 %v4106_v40  ;;  %1137 = vmatpush.msra.mxu3 %v4109_v49 }
 0x2eb   :  { %1078 = vmatpush.msra.mxu0 %v4112_v46  ;;  %1098 = vmatpush.msra.mxu1 %v4115_v55 }
 0x2ec   :  { %1118 = vmatpush.msra.mxu2 %v4118_v48  ;;  %1138 = vmatpush.msra.mxu3 %v4121_v61 }
 0x2ed   :  { %1079 = vmatpush.msra.mxu0 %v4124_v54  ;;  %1099 = vmatpush.msra.mxu1 %v4127_v50 }
 0x2ee   :  { %1119 = vmatpush.msra.mxu2 %v4130_v42  ;;  %1139 = vmatpush.msra.mxu3 %v4133_v52 }
 0x2ef   :  { %1080 = vmatpush.msra.mxu0 %v4136_v63  ;;  %1100 = vmatpush.msra.mxu1 %v4139_v57 }
 0x2f0   :  { %1120 = vmatpush.msra.mxu2 %v4142_v59  ;;  %1140 = vmatpush.msra.mxu3 %v4145_v41 }
 0x2f1   :  { %1081 = vmatpush.msra.mxu0 %v4148_v60  ;;  %1101 = vmatpush.msra.mxu1 %v4151_v51 }
 0x2f2   :  { %1121 = vmatpush.msra.mxu2 %v5756_v12  ;;  %1141 = vmatpush.msra.mxu3 %v5757_v56 }
 0x2f3   :  { %1082 = vmatpush.msra.mxu0 %v5758_v38  ;;  %1102 = vmatpush.msra.mxu1 %v5759_v45 }
 0x2f4   :  { %1122 = vmatpush.msra.mxu2 %v5760_v53  ;;  %1142 = vmatpush.msra.mxu3 %v5761_v1 }
 0x2f5   :  { %1083 = vmatpush.msra.mxu0 %v5762_v14  ;;  %1103 = vmatpush.msra.mxu1 %v5763_v19 }
 0x2f6   :  { %1123 = vmatpush.msra.mxu2 %v5764_v2  ;;  %1143 = vmatpush.msra.mxu3 %v5765_v3 }
 0x2f7   :  { %1084 = vmatpush.msra.mxu0 %v5766_v16  ;;  %1104 = vmatpush.msra.mxu1 %v5767_v10 }
 0x2f8   :  { %1124 = vmatpush.msra.mxu2 %v5768_v17  ;;  %1144 = vmatpush.msra.mxu3 %v5769_v13 }
 0x2f9   :  { %1085 = vmatpush.msra.mxu0 %v5770_v18  ;;  %1105 = vmatpush.msra.mxu1 %v5771_v20  ;;  %v5781_v18 = vld [vmem:[#allocation48_spill] sm:$0xff]  ;;  %v108_v20 = vld [vmem:[#allocation4 + $0x80] sm:$0xff] }
 0x2fa   :  { %1125 = vmatpush.msra.mxu2 %v5772_v6  ;;  %1145 = vmatpush.msra.mxu3 %v5773_v4  ;;  %v109_v6 = vld [vmem:[#allocation4 + $0x88] sm:$0xff] }
 0x2fb   :  { %1086 = vmatpush.msra.mxu0 %v5774_v8  ;;  %1106 = vmatpush.msra.mxu1 %v5775_v0 }
 0x2fc   :  { %1126 = vmatpush.msra.mxu2 %v5776_v15  ;;  %1146 = vmatpush.msra.mxu3 %v5777_v9  ;;  %v111_v15 = vld [vmem:[#allocation4 + $0x98] sm:$0xff] }
 0x2fd   :  { %1087 = vmatpush.msra.mxu0 %v5778_v11  ;;  %1107 = vmatpush.msra.mxu1 %v5779_v58 }
 0x2fe   :  { %1127 = vmatpush.msra.mxu2 %v5780_v7  ;;  %1147 = vmatpush.msra.mxu3 %v5781_v18  ;;  %v110_v18 = vld [vmem:[#allocation4 + $0x90] sm:$0xff] }
 0x35a   :  { %v795_v13 = vpop.f32.mrf.mxu0  ;;  %v815_v4 = vpop.f32.mrf.mxu1 }
 0x35b   :  { %v858_v17 = vadd.f32 %v795_v13, %v108_v20  ;;  %v859_v8 = vadd.f32 %v815_v4, %v109_v6 }
 0x35d   :  { %v2917_v10 = vmul.f32 -1.442695, %v858_v17  ;;  %v2918_v0 = vmul.f32 -1.442695, %v859_v8 }
 0x35f   :  { %3030 = vpow2.f32 %v2917_v10 }
 0x360   :  { %3032 = vpow2.f32 %v2918_v0 }
 0x361   :  { %v855_v9 = vpop.f32.mrf.mxu3  ;;  %v835_v19 = vpop.f32.mrf.mxu2 }
 0x362   :  { %v861_v16 = vadd.f32 %v855_v9, %v111_v15  ;;  %v860_v17 = vadd.f32 %v835_v19, %v110_v18 }
 0x364   :  { %v2919_v11 = vmul.f32 -1.442695, %v861_v16 }
 0x365   :  { %v3031_v3 = vpop.eup %3030 }
 0x366   :  { %v3033_v58 = vpop.eup %3032  ;;  %v865_v2 = vadd.f32 1.0, %v3031_v3  ;;  %3034 = vpow2.f32 %v2919_v11 }
 0x367   :  { %v884_v7 = vadd.f32 1.0, %v3033_v58 }
 0x368   :  { %3036 = vrcp.f32 %v865_v2  ;;  %v877_v16 = vand.u32 2147483648, %v865_v2  ;;  %v875_v9 = vand.u32 2147483647, %v865_v2  ;;  %vm871_vm2 = vweird.f32 %v865_v2 }
 0x369   :  { %3038 = vrcp.f32 %v884_v7  ;;  %v896_v15 = vand.u32 2147483648, %v884_v7  ;;  %v894_v58 = vand.u32 2147483647, %v884_v7  ;;  %vm890_vm3 = vweird.f32 %v884_v7 }
 0x36a   :  { %vm876_vm6 = vcmp.eq.f32.partialorder %v875_v9, 8.507059e+37 }
 0x36b   :  { %vm895_vm7 = vcmp.eq.f32.partialorder %v894_v58, 8.507059e+37 }
 0x36c   :  { %v3035_v14 = vpop.eup %3034 }
 0x36d   :  { %v904_v13 = vadd.f32 1.0, %v3035_v14  ;;  %v878_v14 = vor.u32 1.1754944e-38, %v877_v16 }
 0x36e   :  { %v3037_v20 = vpop.eup %3036 }
 0x36f   :  { %v3039_v6 = vpop.eup %3038  ;;  %v867_v10 = vmul.f32 %v3037_v20, %v865_v2  ;;  %3040 = vrcp.f32 %v904_v13  ;;  %vm872_vm0 = vweird.f32 %v3037_v20  ;;  %v916_v16 = vand.u32 2147483648, %v904_v13 }
 0x370   :  { %v886_v4 = vmul.f32 %v3039_v6, %v884_v7  ;;  %3042 = vtanh.f32 %v860_v17  ;;  %vm891_vm1 = vweird.f32 %v3039_v6  ;;  %vm873_vm4 = vmor %vm871_vm2, %vm872_vm0  ;;  %vm910_vm9 = vweird.f32 %v904_v13 }
 0x371   :  { %v868_v8 = vsub.f32 1.0, %v867_v10  ;;  %vm892_vm5 = vmor %vm890_vm3, %vm891_vm1  ;;  %v897_v10 = vor.u32 1.1754944e-38, %v896_v15  ;;  %v917_v15 = vor.u32 1.1754944e-38, %v916_v16 }
 0x372   :  { %v887_v0 = vsub.f32 1.0, %v886_v4 }
 0x373   :  { %v869_v3 = vmul.f32 %v3037_v20, %v868_v8 }
 0x374   :  { %v888_v11 = vmul.f32 %v3039_v6, %v887_v0 }
 0x375   :  { %v3041_v1 = vpop.eup %3040  ;;  %v870_v53 = vadd.f32 %v3037_v20, %v869_v3 }
 0x376   :  { %v889_v19 = vadd.f32 %v3039_v6, %v888_v11  ;;  %v906_v18 = vmul.f32 %v3041_v1, %v904_v13  ;;  %v3043_v17 = vpop.eup %3042  ;;  %vm911_vm8 = vweird.f32 %v3041_v1 }
 0x377   :  { %v874_v4 = vsel %vm873_vm4, %v3037_v20, %v870_v53  ;;  %v914_v53 = vand.u32 2147483647, %v904_v13  ;;  %vm912_vm10 = vmor %vm910_vm9, %vm911_vm8 }
 0x378   :  { %v879_v45 = vsel %vm876_vm6, %v878_v14, %v874_v4  ;;  %v893_v8 = vsel %vm892_vm5, %v3039_v6, %v889_v19  ;;  %v907_v38 = vsub.f32 1.0, %v906_v18 }
 0x379   :  { %v898_v0 = vsel %vm895_vm7, %v897_v10, %v893_v8  ;;  %v921_v56 = vmul.f32 %v3043_v17, %v879_v45  ;;  %vm915_vm11 = vcmp.eq.f32.partialorder %v914_v53, 8.507059e+37  ;;  %v114_v45 = vld [vmem:[#allocation4 + $0xb0] sm:$0xff] }
 0x37a   :  { %v920_v12 = vmul.f32 %v898_v0, %v4233_v5  ;;  %v908_v3 = vmul.f32 %v3041_v1, %v907_v38 }
 0x37c   :  { %v4307_v2 = vadd.f32 %v921_v56, %v920_v12  ;;  %v909_v7 = vadd.f32 %v3041_v1, %v908_v3 }
 0x37e   :  { %3044 = vtanh.f32 %v4307_v2  ;;  %v913_v20 = vsel %vm912_vm10, %v3041_v1, %v909_v7 }
 0x37f   :  { %v918_v9 = vsel %vm915_vm11, %v917_v15, %v913_v20 }
 0x384   :  { %v3045_v6 = vpop.eup %3044 }
 0x385   :  { %v4310_v11 = vmul.f32 %v3045_v6, %v918_v9 }
 0x387   :  { %941 = vmatmul.f32.vlgmr.msrb.gmra.mxu0 %v4310_v11  ;;  %961 = vmatmul.f32.vlgmr.msrb.gmra.mxu1 %v4310_v11 }
 0x388   :  { %981 = vmatmul.f32.vlgmr.msrb.gmra.mxu2 %v4310_v11  ;;  %1001 = vmatmul.f32.vlgmr.msrb.gmra.mxu3 %v4310_v11 }
 0x389   :  { %1219 = vmatpush.msrb.mxu0 %v4040_v62  ;;  %1239 = vmatpush.msrb.mxu1 %v4043_v21  ;;  %v5782_v62 = vld [vmem:[#allocation21_spill] sm:$0xff]  ;;  %v5783_v21 = vld [vmem:[#allocation22_spill] sm:$0xff] }
 0x38a   :  { %1259 = vmatpush.msrb.mxu2 %v4046_v22  ;;  %1279 = vmatpush.msrb.mxu3 %v4049_v23  ;;  %v5784_v22 = vld [vmem:[#allocation23_spill] sm:$0xff]  ;;  %v5785_v23 = vld [vmem:[#allocation38_spill] sm:$0xff] }
 0x38b   :  { %1220 = vmatpush.msrb.mxu0 %v4052_v24  ;;  %1240 = vmatpush.msrb.mxu1 %v4055_v25  ;;  %v5786_v24 = vld [vmem:[#allocation24_spill] sm:$0xff]  ;;  %v5787_v25 = vld [vmem:[#allocation25_spill] sm:$0xff] }
 0x38c   :  { %1260 = vmatpush.msrb.mxu2 %v4058_v26  ;;  %1280 = vmatpush.msrb.mxu3 %v4061_v27  ;;  %v5788_v26 = vld [vmem:[#allocation26_spill] sm:$0xff] }
 0x38d   :  { %1221 = vmatpush.msrb.mxu0 %v4064_v28  ;;  %1241 = vmatpush.msrb.mxu1 %v4067_v29  ;;  %v5789_v27 = vld [vmem:[#allocation42_spill] sm:$0xff]  ;;  %v5790_v28 = vld [vmem:[#allocation27_spill] sm:$0xff]  ;;  %v5791_v29 = vld [vmem:[#allocation28_spill] sm:$0xff] }
 0x38e   :  { %1261 = vmatpush.msrb.mxu2 %v4070_v30  ;;  %1281 = vmatpush.msrb.mxu3 %v4073_v31  ;;  %v5792_v30 = vld [vmem:[#allocation29_spill] sm:$0xff]  ;;  %v5793_v31 = vld [vmem:[#allocation43_spill] sm:$0xff] }
 0x38f   :  { %1222 = vmatpush.msrb.mxu0 %v4076_v32  ;;  %1242 = vmatpush.msrb.mxu1 %v4079_v33  ;;  %v5794_v32 = vld [vmem:[#allocation30_spill] sm:$0xff]  ;;  %v5795_v33 = vld [vmem:[#allocation31_spill] sm:$0xff] }
 0x390   :  { %1262 = vmatpush.msrb.mxu2 %v4082_v35  ;;  %1282 = vmatpush.msrb.mxu3 %v4085_v39  ;;  %v5796_v35 = vld [vmem:[#allocation32_spill] sm:$0xff] }
 0x391   :  { %1223 = vmatpush.msrb.mxu0 %v4088_v43  ;;  %1243 = vmatpush.msrb.mxu1 %v4091_v47  ;;  %v5797_v39 = vld [vmem:[#allocation44_spill] sm:$0xff]  ;;  %v5798_v43 = vld [vmem:[#allocation33_spill] sm:$0xff]  ;;  %v5799_v47 = vld [vmem:[#allocation35_spill] sm:$0xff] }
 0x392   :  { %1263 = vmatpush.msrb.mxu2 %v4094_v44  ;;  %1283 = vmatpush.msrb.mxu3 %v4097_v34  ;;  %v5800_v44 = vld [vmem:[#allocation36_spill] sm:$0xff]  ;;  %v5801_v34 = vld [vmem:[#allocation45_spill] sm:$0xff] }
 0x393   :  { %1224 = vmatpush.msrb.mxu0 %v4100_v36  ;;  %1244 = vmatpush.msrb.mxu1 %v4103_v37  ;;  %v5802_v36 = vld [vmem:[#allocation37_spill] sm:$0xff]  ;;  %v5803_v37 = vld [vmem:[#allocation39_spill] sm:$0xff] }
 0x394   :  { %1264 = vmatpush.msrb.mxu2 %v4106_v40  ;;  %1284 = vmatpush.msrb.mxu3 %v4109_v49  ;;  %v5804_v40 = vld [vmem:[#allocation40_spill] sm:$0xff]  ;;  %v5805_v49 = vld [vmem:[#allocation46_spill] sm:$0xff] }
 0x395   :  { %1225 = vmatpush.msrb.mxu0 %v4112_v46  ;;  %1245 = vmatpush.msrb.mxu1 %v4115_v55  ;;  %v5806_v46 = vld [vmem:[#allocation41_spill] sm:$0xff]  ;;  %v5807_v55 = vld [vmem:[#allocation48_spill] sm:$0xff] }
 0x396   :  { %1265 = vmatpush.msrb.mxu2 %v4118_v48  ;;  %1285 = vmatpush.msrb.mxu3 %v4121_v61  ;;  %v112_v48 = vld [vmem:[#allocation4 + $0xa0] sm:$0xff]  ;;  %v113_v61 = vld [vmem:[#allocation4 + $0xa8] sm:$0xff] }
 0x397   :  { %1226 = vmatpush.msrb.mxu0 %v4124_v54  ;;  %1246 = vmatpush.msrb.mxu1 %v4127_v50 }
 0x398   :  { %1266 = vmatpush.msrb.mxu2 %v4130_v42  ;;  %1286 = vmatpush.msrb.mxu3 %v4133_v52 }
 0x399   :  { %1227 = vmatpush.msrb.mxu0 %v4136_v63  ;;  %1247 = vmatpush.msrb.mxu1 %v4139_v57 }
 0x39a   :  { %1267 = vmatpush.msrb.mxu2 %v4142_v59  ;;  %1287 = vmatpush.msrb.mxu3 %v4145_v41  ;;  %v115_v59 = vld [vmem:[#allocation4 + $0xb8] sm:$0xff] }
 0x39b   :  { %1228 = vmatpush.msrb.mxu0 %v4148_v60  ;;  %1248 = vmatpush.msrb.mxu1 %v4151_v51 }
 0x39c   :  { %1268 = vmatpush.msrb.mxu2 %v5782_v62  ;;  %1288 = vmatpush.msrb.mxu3 %v5783_v21 }
 0x39d   :  { %1229 = vmatpush.msrb.mxu0 %v5784_v22  ;;  %1249 = vmatpush.msrb.mxu1 %v5785_v23 }
 0x39e   :  { %1269 = vmatpush.msrb.mxu2 %v5786_v24  ;;  %1289 = vmatpush.msrb.mxu3 %v5787_v25 }
 0x39f   :  { %1230 = vmatpush.msrb.mxu0 %v5788_v26  ;;  %1250 = vmatpush.msrb.mxu1 %v5789_v27 }
 0x3a0   :  { %1270 = vmatpush.msrb.mxu2 %v5790_v28  ;;  %1290 = vmatpush.msrb.mxu3 %v5791_v29 }
 0x3a1   :  { %1231 = vmatpush.msrb.mxu0 %v5792_v30  ;;  %1251 = vmatpush.msrb.mxu1 %v5793_v31 }
 0x3a2   :  { %1271 = vmatpush.msrb.mxu2 %v5794_v32  ;;  %1291 = vmatpush.msrb.mxu3 %v5795_v33 }
 0x3a3   :  { %1232 = vmatpush.msrb.mxu0 %v5796_v35  ;;  %1252 = vmatpush.msrb.mxu1 %v5797_v39 }
 0x3a4   :  { %1272 = vmatpush.msrb.mxu2 %v5798_v43  ;;  %1292 = vmatpush.msrb.mxu3 %v5799_v47 }
 0x3a5   :  { %1233 = vmatpush.msrb.mxu0 %v5800_v44  ;;  %1253 = vmatpush.msrb.mxu1 %v5801_v34 }
 0x3a6   :  { %1273 = vmatpush.msrb.mxu2 %v5802_v36  ;;  %1293 = vmatpush.msrb.mxu3 %v5803_v37  ;;  %v1430_v37 = vld [vmem:[#allocation9 + $0x3e8] sm:$0xff] }
 0x3a7   :  { %1234 = vmatpush.msrb.mxu0 %v5804_v40  ;;  %1254 = vmatpush.msrb.mxu1 %v5805_v49  ;;  %v1431_v40 = vld [vmem:[#allocation9 + $0x3f0] sm:$0xff]  ;;  %v1432_v49 = vld [vmem:[#allocation9 + $0x3f8] sm:$0xff] }
 0x3a8   :  { %1274 = vmatpush.msrb.mxu2 %v5806_v46  ;;  %1294 = vmatpush.msrb.mxu3 %v5807_v55  ;;  %v1425_v46 = vld [vmem:[#allocation9 + $0x3c0] sm:$0xff]  ;;  %v1426_v55 = vld [vmem:[#allocation9 + $0x3c8] sm:$0xff] }
 0x404   :  { %v942_v54 = vpop.f32.mrf.mxu0  ;;  %v962_v50 = vpop.f32.mrf.mxu1 }
 0x405   :  { %v1005_v42 = vadd.f32 %v942_v54, %v112_v48  ;;  %v1006_v52 = vadd.f32 %v962_v50, %v113_v61  ;;  %v1427_v48 = vld [vmem:[#allocation9 + $0x3d0] sm:$0xff]  ;;  %v1428_v61 = vld [vmem:[#allocation9 + $0x3d8] sm:$0xff]  ;;  %v1421_v54 = vld [vmem:[#allocation9 + $0x3a0] sm:$0xff] }
 0x406   :  { %v1422_v50 = vld [vmem:[#allocation9 + $0x3a8] sm:$0xff] }
 0x407   :  { %v2920_v63 = vmul.f32 -1.442695, %v1005_v42  ;;  %v2921_v57 = vmul.f32 -1.442695, %v1006_v52  ;;  %v1423_v42 = vld [vmem:[#allocation9 + $0x3b0] sm:$0xff]  ;;  %v1424_v52 = vld [vmem:[#allocation9 + $0x3b8] sm:$0xff] }
 0x409   :  { %3046 = vpow2.f32 %v2920_v63  ;;  %v1417_v63 = vld [vmem:[#allocation9 + $0x380] sm:$0xff] }
 0x40a   :  { %3048 = vpow2.f32 %v2921_v57  ;;  %v1418_v57 = vld [vmem:[#allocation9 + $0x388] sm:$0xff] }
 0x40b   :  { %v1002_v41 = vpop.f32.mrf.mxu3  ;;  %v982_v1 = vpop.f32.mrf.mxu2 }
 0x40c   :  { %v1008_v60 = vadd.f32 %v1002_v41, %v115_v59  ;;  %v1007_v19 = vadd.f32 %v982_v1, %v114_v45  ;;  %v1419_v59 = vld [vmem:[#allocation9 + $0x390] sm:$0xff]  ;;  %v116_v41 = vld [vmem:[#allocation4 + $0xc0] sm:$0xff] }
 0x40e   :  { %v2922_v51 = vmul.f32 -1.442695, %v1008_v60  ;;  %v117_v60 = vld [vmem:[#allocation4 + $0xc8] sm:$0xff] }
 0x40f   :  { %v3047_v5 = vpop.eup %3046 }
 0x410   :  { %v3049_v12 = vpop.eup %3048  ;;  %v1012_v56 = vadd.f32 1.0, %v3047_v5  ;;  %3050 = vpow2.f32 %v2922_v51  ;;  %v1420_v51 = vld [vmem:[#allocation9 + $0x398] sm:$0xff]  ;;  %v1413_v5 = vld [vmem:[#allocation9 + $0x360] sm:$0xff] }
 0x411   :  { %v1031_v38 = vadd.f32 1.0, %v3049_v12  ;;  %v1414_v12 = vld [vmem:[#allocation9 + $0x368] sm:$0xff] }
 0x412   :  { %3052 = vrcp.f32 %v1012_v56  ;;  %v1024_v0 = vand.u32 2147483648, %v1012_v56  ;;  %v1022_v16 = vand.u32 2147483647, %v1012_v56  ;;  %vm1018_vm14 = vweird.f32 %v1012_v56 }
 0x413   :  { %3054 = vrcp.f32 %v1031_v38  ;;  %v1043_v3 = vand.u32 2147483648, %v1031_v38  ;;  %v1041_v20 = vand.u32 2147483647, %v1031_v38  ;;  %vm1037_vm15 = vweird.f32 %v1031_v38 }
 0x414   :  { %v1025_v9 = vor.u32 1.1754944e-38, %v1024_v0  ;;  %vm1023_vm2 = vcmp.eq.f32.partialorder %v1022_v16, 8.507059e+37  ;;  %v1401_v16 = vld [vmem:[#allocation9 + $0x300] sm:$0xff] }
 0x415   :  { %v1044_v22 = vor.u32 1.1754944e-38, %v1043_v3  ;;  %vm1042_vm3 = vcmp.eq.f32.partialorder %v1041_v20, 8.507059e+37  ;;  %v1403_v20 = vld [vmem:[#allocation9 + $0x310] sm:$0xff] }
 0x416   :  { %v3051_v13 = vpop.eup %3050 }
 0x417   :  { %v1051_v58 = vadd.f32 1.0, %v3051_v13  ;;  %v1409_v13 = vld [vmem:[#allocation9 + $0x340] sm:$0xff] }
 0x418   :  { %v3053_v14 = vpop.eup %3052 }
 0x419   :  { %v3055_v18 = vpop.eup %3054  ;;  %v1014_v10 = vmul.f32 %v3053_v14, %v1012_v56  ;;  %3056 = vrcp.f32 %v1051_v58  ;;  %vm1019_vm12 = vweird.f32 %v3053_v14  ;;  %v1063_v35 = vand.u32 2147483648, %v1051_v58  ;;  %v1415_v56 = vld [vmem:[#allocation9 + $0x370] sm:$0xff] }
 0x41a   :  { %v1033_v4 = vmul.f32 %v3055_v18, %v1031_v38  ;;  %3058 = vtanh.f32 %v1007_v19  ;;  %vm1038_vm13 = vweird.f32 %v3055_v18  ;;  %vm1020_vm0 = vmor %vm1018_vm14, %vm1019_vm12  ;;  %vm1057_vm5 = vweird.f32 %v1051_v58  ;;  %v1416_v38 = vld [vmem:[#allocation9 + $0x378] sm:$0xff] }
 0x41b   :  { %v1015_v17 = vsub.f32 1.0, %v1014_v10  ;;  %vm1039_vm1 = vmor %vm1037_vm15, %vm1038_vm13  ;;  %v1061_v39 = vand.u32 2147483647, %v1051_v58  ;;  %v1064_v47 = vor.u32 1.1754944e-38, %v1063_v35  ;;  %v1412_v10 = vld [vmem:[#allocation9 + $0x358] sm:$0xff] }
 0x41c   :  { %v1034_v8 = vsub.f32 1.0, %v1033_v4  ;;  %v1405_v4 = vld [vmem:[#allocation9 + $0x320] sm:$0xff] }
 0x41d   :  { %v1016_v7 = vmul.f32 %v3053_v14, %v1015_v17  ;;  %vm1062_vm7 = vcmp.eq.f32.partialorder %v1061_v39, 8.507059e+37  ;;  %v1406_v17 = vld [vmem:[#allocation9 + $0x328] sm:$0xff]  ;;  %v1392_v39 = vld [vmem:[#allocation9 + $0x2b8] sm:$0xff] }
 0x41e   :  { %v1035_v53 = vmul.f32 %v3055_v18, %v1034_v8  ;;  %v1407_v8 = vld [vmem:[#allocation9 + $0x330] sm:$0xff] }
 0x41f   :  { %v3057_v15 = vpop.eup %3056  ;;  %v1017_v6 = vadd.f32 %v3053_v14, %v1016_v7  ;;  %v1408_v7 = vld [vmem:[#allocation9 + $0x338] sm:$0xff] }
 0x420   :  { %v1036_v62 = vadd.f32 %v3055_v18, %v1035_v53  ;;  %v1053_v21 = vmul.f32 %v3057_v15, %v1051_v58  ;;  %v3059_v24 = vpop.eup %3058  ;;  %vm1058_vm4 = vweird.f32 %v3057_v15  ;;  %v1410_v58 = vld [vmem:[#allocation9 + $0x348] sm:$0xff] }
 0x421   :  { %v1021_v23 = vsel %vm1020_vm0, %v3053_v14, %v1017_v6  ;;  %vm1059_vm6 = vmor %vm1057_vm5, %vm1058_vm4  ;;  %v1411_v14 = vld [vmem:[#allocation9 + $0x350] sm:$0xff]  ;;  %v1402_v53 = vld [vmem:[#allocation9 + $0x308] sm:$0xff] }
 0x422   :  { %v1026_v25 = vsel %vm1023_vm2, %v1025_v9, %v1021_v23  ;;  %v1040_v26 = vsel %vm1039_vm1, %v3055_v18, %v1036_v62  ;;  %v1054_v27 = vsub.f32 1.0, %v1053_v21  ;;  %v1404_v6 = vld [vmem:[#allocation9 + $0x318] sm:$0xff]  ;;  %v1397_v9 = vld [vmem:[#allocation9 + $0x2e0] sm:$0xff]  ;;  %v1398_v62 = vld [vmem:[#allocation9 + $0x2e8] sm:$0xff] }
 0x423   :  { %v1045_v28 = vsel %vm1042_vm3, %v1044_v22, %v1040_v26  ;;  %v1068_v29 = vmul.f32 %v3059_v24, %v1026_v25  ;;  %v1399_v21 = vld [vmem:[#allocation9 + $0x2f0] sm:$0xff]  ;;  %v1400_v23 = vld [vmem:[#allocation9 + $0x2f8] sm:$0xff]  ;;  %v1393_v25 = vld [vmem:[#allocation9 + $0x2c0] sm:$0xff] }
 0x424   :  { %v1067_v30 = vmul.f32 %v1045_v28, %v4307_v2  ;;  %v1055_v31 = vmul.f32 %v3057_v15, %v1054_v27  ;;  %v1429_v2 = vld [vmem:[#allocation9 + $0x3e0] sm:$0xff]  ;;  %v1394_v26 = vld [vmem:[#allocation9 + $0x2c8] sm:$0xff]  ;;  %v1395_v27 = vld [vmem:[#allocation9 + $0x2d0] sm:$0xff] }
 0x425   :  { %v1396_v28 = vld [vmem:[#allocation9 + $0x2d8] sm:$0xff] }
 0x426   :  { %v4381_v32 = vadd.f32 %v1068_v29, %v1067_v30  ;;  %v1056_v33 = vadd.f32 %v3057_v15, %v1055_v31  ;;  %v1389_v30 = vld [vmem:[#allocation9 + $0x2a0] sm:$0xff]  ;;  %v1390_v31 = vld [vmem:[#allocation9 + $0x2a8] sm:$0xff] }
 0x428   :  { %3060 = vtanh.f32 %v4381_v32  ;;  %v1060_v43 = vsel %vm1059_vm6, %v3057_v15, %v1056_v33  ;;  %v119_v15 = vld [vmem:[#allocation4 + $0xd8] sm:$0xff]  ;;  %v1391_v33 = vld [vmem:[#allocation9 + $0x2b0] sm:$0xff] }
 0x429   :  { %v1065_v34 = vsel %vm1062_vm7, %v1064_v47, %v1060_v43  ;;  %v1385_v43 = vld [vmem:[#allocation9 + $0x280] sm:$0xff]  ;;  %v1386_v47 = vld [vmem:[#allocation9 + $0x288] sm:$0xff] }
 0x42e   :  { %v3061_v44 = vpop.eup %3060 }
 0x42f   :  { %v4384_v36 = vmul.f32 %v3061_v44, %v1065_v34 }
 0x431   :  { %1088 = vmatmul.f32.vlgmr.msra.gmra.mxu0 %v4384_v36  ;;  %1108 = vmatmul.f32.vlgmr.msra.gmra.mxu1 %v4384_v36 }
 0x432   :  { %1128 = vmatmul.f32.vlgmr.msra.gmra.mxu2 %v4384_v36  ;;  %1148 = vmatmul.f32.vlgmr.msra.gmra.mxu3 %v4384_v36 }
 0x433   :  { %1444 = vmatpush.msra.mxu0 %v1429_v2  ;;  %1485 = vmatpush.msra.mxu1 %v1430_v37  ;;  %v1387_v2 = vld [vmem:[#allocation9 + $0x290] sm:$0xff]  ;;  %v1388_v37 = vld [vmem:[#allocation9 + $0x298] sm:$0xff] }
 0x434   :  { %1526 = vmatpush.msra.mxu2 %v1431_v40  ;;  %1567 = vmatpush.msra.mxu3 %v1432_v49  ;;  %v1381_v49 = vld [vmem:[#allocation9 + $0x260] sm:$0xff] }
 0x435   :  { %1445 = vmatpush.msra.mxu0 %v1425_v46  ;;  %1486 = vmatpush.msra.mxu1 %v1426_v55  ;;  %v1382_v46 = vld [vmem:[#allocation9 + $0x268] sm:$0xff]  ;;  %v1383_v55 = vld [vmem:[#allocation9 + $0x270] sm:$0xff] }
 0x436   :  { %1527 = vmatpush.msra.mxu2 %v1427_v48  ;;  %1568 = vmatpush.msra.mxu3 %v1428_v61  ;;  %v118_v48 = vld [vmem:[#allocation4 + $0xd0] sm:$0xff]  ;;  %v1384_v61 = vld [vmem:[#allocation9 + $0x278] sm:$0xff] }
 0x437   :  { %1446 = vmatpush.msra.mxu0 %v1421_v54  ;;  %1487 = vmatpush.msra.mxu1 %v1422_v50  ;;  %v1377_v54 = vld [vmem:[#allocation9 + $0x240] sm:$0xff]  ;;  %v1378_v50 = vld [vmem:[#allocation9 + $0x248] sm:$0xff] }
 0x438   :  { %1528 = vmatpush.msra.mxu2 %v1423_v42  ;;  %1569 = vmatpush.msra.mxu3 %v1424_v52  ;;  %v1379_v42 = vld [vmem:[#allocation9 + $0x250] sm:$0xff]  ;;  %v1380_v52 = vld [vmem:[#allocation9 + $0x258] sm:$0xff] }
 0x439   :  { %1447 = vmatpush.msra.mxu0 %v1417_v63  ;;  %1488 = vmatpush.msra.mxu1 %v1418_v57  ;;  %v1373_v63 = vld [vmem:[#allocation9 + $0x220] sm:$0xff] }
 0x43a   :  { %1529 = vmatpush.msra.mxu2 %v1419_v59  ;;  %1570 = vmatpush.msra.mxu3 %v1420_v51  ;;  %v1374_v59 = vld [vmem:[#allocation9 + $0x228] sm:$0xff] }
 0x43b   :  { %1448 = vmatpush.msra.mxu0 %v1413_v5  ;;  %1489 = vmatpush.msra.mxu1 %v1414_v12  ;;  %v1369_v5 = vld [vmem:[#allocation9 + $0x200] sm:$0xff]  ;;  %v1370_v12 = vld [vmem:[#allocation9 + $0x208] sm:$0xff] }
 0x43c   :  { %1530 = vmatpush.msra.mxu2 %v1415_v56  ;;  %1571 = vmatpush.msra.mxu3 %v1416_v38  ;;  %v1371_v38 = vld [vmem:[#allocation9 + $0x210] sm:$0xff] }
 0x43d   :  { %1449 = vmatpush.msra.mxu0 %v1409_v13  ;;  %1490 = vmatpush.msra.mxu1 %v1410_v58 }
 0x43e   :  { %1531 = vmatpush.msra.mxu2 %v1411_v14  ;;  %1572 = vmatpush.msra.mxu3 %v1412_v10 }
 0x43f   :  { %1450 = vmatpush.msra.mxu0 %v1405_v4  ;;  %1491 = vmatpush.msra.mxu1 %v1406_v17 }
 0x440   :  { %1532 = vmatpush.msra.mxu2 %v1407_v8  ;;  %1573 = vmatpush.msra.mxu3 %v1408_v7 }
 0x441   :  { %1451 = vmatpush.msra.mxu0 %v1401_v16  ;;  %1492 = vmatpush.msra.mxu1 %v1402_v53 }
 0x442   :  { %1533 = vmatpush.msra.mxu2 %v1403_v20  ;;  %1574 = vmatpush.msra.mxu3 %v1404_v6 }
 0x443   :  { %1452 = vmatpush.msra.mxu0 %v1397_v9  ;;  %1493 = vmatpush.msra.mxu1 %v1398_v62 }
 0x444   :  { %1534 = vmatpush.msra.mxu2 %v1399_v21  ;;  %1575 = vmatpush.msra.mxu3 %v1400_v23 }
 0x445   :  { %1453 = vmatpush.msra.mxu0 %v1393_v25  ;;  %1494 = vmatpush.msra.mxu1 %v1394_v26 }
 0x446   :  { %1535 = vmatpush.msra.mxu2 %v1395_v27  ;;  %1576 = vmatpush.msra.mxu3 %v1396_v28 }
 0x447   :  { %1454 = vmatpush.msra.mxu0 %v1389_v30  ;;  %1495 = vmatpush.msra.mxu1 %v1390_v31 }
 0x448   :  { %1536 = vmatpush.msra.mxu2 %v1391_v33  ;;  %1577 = vmatpush.msra.mxu3 %v1392_v39 }
 0x449   :  { %1455 = vmatpush.msra.mxu0 %v1385_v43  ;;  %1496 = vmatpush.msra.mxu1 %v1386_v47 }
 0x44a   :  { %1537 = vmatpush.msra.mxu2 %v1387_v2  ;;  %1578 = vmatpush.msra.mxu3 %v1388_v37  ;;  %v5810_v2 = vld [vmem:[#allocation34_spill] sm:$0xff]  ;;  %v4420_v37 = vld [vmem:[#allocation7 + $0x3e0] sm:$0xff] }
 0x44b   :  { %1456 = vmatpush.msra.mxu0 %v1381_v49  ;;  %1497 = vmatpush.msra.mxu1 %v1382_v46  ;;  %v4424_v49 = vld [vmem:[#allocation7 + $0x3c0] sm:$0xff]  ;;  %v4428_v46 = vld [vmem:[#allocation7 + $0x3c8] sm:$0xff] }
 0x44c   :  { %1538 = vmatpush.msra.mxu2 %v1383_v55  ;;  %1579 = vmatpush.msra.mxu3 %v1384_v61  ;;  %5811 = vst [vmem:[#allocation21_spill] sm:$0xff] %v4428_v46  ;;  %v4430_v55 = vld [vmem:[#allocation7 + $0x3f8] sm:$0xff]  ;;  %v4435_v61 = vld [vmem:[#allocation7 + $0x3a8] sm:$0xff] }
 0x44d   :  { %1457 = vmatpush.msra.mxu0 %v1377_v54  ;;  %1498 = vmatpush.msra.mxu1 %v1378_v50  ;;  %5812 = vst [vmem:[#allocation22_spill] sm:$0xff] %v4430_v55  ;;  %v4437_v54 = vld [vmem:[#allocation7 + $0x3d8] sm:$0xff]  ;;  %v5815_v50 = vld [vmem:[#allocation49_spill] sm:$0xff] }
 0x44e   :  { %1539 = vmatpush.msra.mxu2 %v1379_v42  ;;  %1580 = vmatpush.msra.mxu3 %v1380_v52  ;;  %5814 = vst [vmem:[#allocation38_spill] sm:$0xff] %v4435_v61  ;;  %v4456_v42 = vld [vmem:[#allocation7 + $0x3f0] sm:$0xff] }
 0x44f   :  { %1458 = vmatpush.msra.mxu0 %v1373_v63  ;;  %1499 = vmatpush.msra.mxu1 %v1374_v59  ;;  %v4459_v52 = vld [vmem:[#allocation7 + $0x3d0] sm:$0xff]  ;;  %v4461_v63 = vld [vmem:[#allocation7 + $0x3b8] sm:$0xff]  ;;  %v4473_v59 = vld [vmem:[#allocation7 + $0x368] sm:$0xff] }
 0x450   :  { %5816 = vst [vmem:[#allocation24_spill] sm:$0xff] %v4461_v63 }
 0x451   :  { %1459 = vmatpush.msra.mxu0 %v1369_v5  ;;  %1500 = vmatpush.msra.mxu1 %v1370_v12  ;;  %v120_v5 = vld [vmem:[#allocation4 + $0xe0] sm:$0xff]  ;;  %v121_v12 = vld [vmem:[#allocation4 + $0xe8] sm:$0xff] }
 0x4ae   :  { %v1089_v45 = vpop.f32.mrf.mxu0  ;;  %v1109_v1 = vpop.f32.mrf.mxu1 }
 0x4af   :  { %v1152_v19 = vadd.f32 %v1089_v45, %v116_v41  ;;  %v1153_v18 = vadd.f32 %v1109_v1, %v117_v60  ;;  %v1375_v41 = vld [vmem:[#allocation9 + $0x230] sm:$0xff]  ;;  %v1376_v60 = vld [vmem:[#allocation9 + $0x238] sm:$0xff] }
 0x4b0   :  { %v1372_v45 = vld [vmem:[#allocation9 + $0x218] sm:$0xff]  ;;  %1540 = vmatpush.msra.mxu2 %v1375_v41  ;;  %1581 = vmatpush.msra.mxu3 %v1376_v60  ;;  %v4477_v60 = vld [vmem:[#allocation7 + $0x3b0] sm:$0xff] }
 0x4b1   :  { %v2923_v0 = vmul.f32 -1.442695, %v1152_v19  ;;  %v2924_v3 = vmul.f32 -1.442695, %v1153_v18  ;;  %v4475_v41 = vld [vmem:[#allocation7 + $0x398] sm:$0xff] }
 0x4b2   :  { %1541 = vmatpush.msra.mxu2 %v1371_v38  ;;  %1582 = vmatpush.msra.mxu3 %v1372_v45  ;;  %v4488_v38 = vld [vmem:[#allocation7 + $0x370] sm:$0xff] }
 0x4b3   :  { %3062 = vpow2.f32 %v2923_v0 }
 0x4b4   :  { %3064 = vpow2.f32 %v2924_v3 }
 0x4b5   :  { %v1149_v22 = vpop.f32.mrf.mxu3  ;;  %v1129_v57 = vpop.f32.mrf.mxu2 }
 0x4b6   :  { %v1155_v24 = vadd.f32 %v1149_v22, %v119_v15  ;;  %v1154_v13 = vadd.f32 %v1129_v57, %v118_v48  ;;  %v4433_v48 = vld [vmem:[#allocation7 + $0x3a0] sm:$0xff]  ;;  %v4466_v57 = vld [vmem:[#allocation7 + $0x388] sm:$0xff] }
 0x4b7   :  { %5813 = vst [vmem:[#allocation23_spill] sm:$0xff] %v4433_v48 }
 0x4b8   :  { %v2925_v29 = vmul.f32 -1.442695, %v1155_v24 }
 0x4b9   :  { %v3063_v35 = vpop.eup %3062 }
 0x4ba   :  { %v3065_v44 = vpop.eup %3064  ;;  %v4390_v34 = vadd.f32 1.0, %v3063_v35  ;;  %3066 = vpow2.f32 %v2925_v29 }
 0x4bb   :  { %v4392_v40 = vadd.f32 1.0, %v3065_v44 }
 0x4bc   :  { %3068 = vrcp.f32 %v4390_v34  ;;  %v1171_v4 = vand.u32 2147483648, %v4390_v34  ;;  %v1169_v0 = vand.u32 2147483647, %v4390_v34  ;;  %vm1165_vm10 = vweird.f32 %v4390_v34 }
 0x4bd   :  { %3070 = vrcp.f32 %v4392_v40  ;;  %v1190_v17 = vand.u32 2147483648, %v4392_v40  ;;  %v1188_v7 = vand.u32 2147483647, %v4392_v40  ;;  %vm1184_vm11 = vweird.f32 %v4392_v40 }
 0x4be   :  { %v1172_v20 = vor.u32 1.1754944e-38, %v1171_v4  ;;  %vm1170_vm14 = vcmp.eq.f32.partialorder %v1169_v0, 8.507059e+37  ;;  %v4502_v4 = vld [vmem:[#allocation7 + $0x320] sm:$0xff] }
 0x4bf   :  { %v1191_v9 = vor.u32 1.1754944e-38, %v1190_v17  ;;  %vm1189_vm15 = vcmp.eq.f32.partialorder %v1188_v7, 8.507059e+37  ;;  %v4504_v17 = vld [vmem:[#allocation7 + $0x328] sm:$0xff]  ;;  %v4512_v7 = vld [vmem:[#allocation7 + $0x330] sm:$0xff] }
 0x4c0   :  { %v3067_v51 = vpop.eup %3066 }
 0x4c1   :  { %v1198_v56 = vadd.f32 1.0, %v3067_v51  ;;  %v4481_v51 = vld [vmem:[#allocation7 + $0x390] sm:$0xff] }
 0x4c2   :  { %v3069_v1 = vpop.eup %3068 }
 0x4c3   :  { %v3071_v58 = vpop.eup %3070  ;;  %v1161_v14 = vmul.f32 %v3069_v1, %v4390_v34  ;;  %3072 = vrcp.f32 %v1198_v56  ;;  %vm1166_vm8 = vweird.f32 %v3069_v1  ;;  %v1210_v31 = vand.u32 2147483648, %v1198_v56  ;;  %v5809_v34 = vld [vmem:[#allocation47_spill] sm:$0xff] }
 0x4c4   :  { %v1180_v19 = vmul.f32 %v3071_v58, %v4392_v40  ;;  %3074 = vtanh.f32 %v1154_v13  ;;  %vm1185_vm9 = vweird.f32 %v3071_v58  ;;  %vm1167_vm12 = vmor %vm1165_vm10, %vm1166_vm8  ;;  %vm1204_vm1 = vweird.f32 %v1198_v56  ;;  %v4422_v40 = vld [vmem:[#allocation7 + $0x3e8] sm:$0xff]  ;;  %v4491_v13 = vld [vmem:[#allocation7 + $0x340] sm:$0xff] }
 0x4c5   :  { %v1162_v18 = vsub.f32 1.0, %v1161_v14  ;;  %vm1186_vm13 = vmor %vm1184_vm11, %vm1185_vm9  ;;  %v1208_v33 = vand.u32 2147483647, %v1198_v56  ;;  %v1211_v39 = vor.u32 1.1754944e-38, %v1210_v31  ;;  %v4495_v14 = vld [vmem:[#allocation7 + $0x358] sm:$0xff]  ;;  %v4551_v31 = vld [vmem:[#allocation7 + $0x2f0] sm:$0xff] }
 0x4c6   :  { %v1181_v10 = vsub.f32 1.0, %v1180_v19 }
 0x4c7   :  { %v1163_v8 = vmul.f32 %v3069_v1, %v1162_v18  ;;  %vm1209_vm3 = vcmp.eq.f32.partialorder %v1208_v33, 8.507059e+37 }
 0x4c8   :  { %v1182_v3 = vmul.f32 %v3071_v58, %v1181_v10  ;;  %v4500_v10 = vld [vmem:[#allocation7 + $0x350] sm:$0xff] }
 0x4c9   :  { %v3073_v16 = vpop.eup %3072  ;;  %v1164_v53 = vadd.f32 %v3069_v1, %v1163_v8  ;;  %v4507_v8 = vld [vmem:[#allocation7 + $0x338] sm:$0xff] }
 0x4ca   :  { %v1183_v15 = vadd.f32 %v3071_v58, %v1182_v3  ;;  %v1200_v6 = vmul.f32 %v3073_v16, %v1198_v56  ;;  %v3075_v21 = vpop.eup %3074  ;;  %vm1205_vm0 = vweird.f32 %v3073_v16  ;;  %v4485_v56 = vld [vmem:[#allocation7 + $0x378] sm:$0xff] }
 0x4cb   :  { %v1168_v62 = vsel %vm1167_vm12, %v3069_v1, %v1164_v53  ;;  %vm1206_vm2 = vmor %vm1204_vm1, %vm1205_vm0  ;;  %v4516_v53 = vld [vmem:[#allocation7 + $0x308] sm:$0xff] }
 0x4cc   :  { %v1173_v22 = vsel %vm1170_vm14, %v1172_v20, %v1168_v62  ;;  %v1187_v23 = vsel %vm1186_vm13, %v3071_v58, %v1183_v15  ;;  %v1201_v24 = vsub.f32 1.0, %v1200_v6  ;;  %v4493_v58 = vld [vmem:[#allocation7 + $0x348] sm:$0xff]  ;;  %v4519_v20 = vld [vmem:[#allocation7 + $0x2e0] sm:$0xff]  ;;  %v123_v15 = vld [vmem:[#allocation4 + $0xf8] sm:$0xff] }
 0x4cd   :  { %v1192_v25 = vsel %vm1189_vm15, %v1191_v9, %v1187_v23  ;;  %v1215_v26 = vmul.f32 %v3075_v21, %v1173_v22  ;;  %v4524_v6 = vld [vmem:[#allocation7 + $0x2e8] sm:$0xff]  ;;  %v4526_v9 = vld [vmem:[#allocation7 + $0x318] sm:$0xff]  ;;  %v4529_v62 = vld [vmem:[#allocation7 + $0x2c0] sm:$0xff] }
 0x4ce   :  { %v1214_v27 = vmul.f32 %v1192_v25, %v4381_v32  ;;  %v1202_v28 = vmul.f32 %v3073_v16, %v1201_v24  ;;  %v5808_v32 = vld [vmem:[#allocation20_spill] sm:$0xff]  ;;  %v4533_v22 = vld [vmem:[#allocation7 + $0x2f8] sm:$0xff]  ;;  %v4539_v25 = vld [vmem:[#allocation7 + $0x310] sm:$0xff] }
 0x4cf   :  { %v4531_v21 = vld [vmem:[#allocation7 + $0x2c8] sm:$0xff]  ;;  %v4537_v24 = vld [vmem:[#allocation7 + $0x2d8] sm:$0xff] }
 0x4d0   :  { %v4405_v29 = vadd.f32 %v1215_v26, %v1214_v27  ;;  %v1203_v30 = vadd.f32 %v3073_v16, %v1202_v28  ;;  %5817 = vst [vmem:[#allocation25_spill] sm:$0xff] %v4537_v24  ;;  %v4542_v27 = vld [vmem:[#allocation7 + $0x2a0] sm:$0xff]  ;;  %v4544_v28 = vld [vmem:[#allocation7 + $0x2a8] sm:$0xff] }
 0x4d1   :  { %5818 = vst [vmem:[#allocation26_spill] sm:$0xff] %v4542_v27 }
 0x4d2   :  { %3076 = vtanh.f32 %v4405_v29  ;;  %v1207_v35 = vsel %vm1206_vm2, %v3073_v16, %v1203_v30  ;;  %v4514_v16 = vld [vmem:[#allocation7 + $0x300] sm:$0xff]  ;;  %5819 = vst [vmem:[#allocation42_spill] sm:$0xff] %v4544_v28  ;;  %v4549_v30 = vld [vmem:[#allocation7 + $0x2b8] sm:$0xff] }
 0x4d3   :  { %v1212_v47 = vsel %vm1209_vm3, %v1211_v39, %v1207_v35  ;;  %5820 = vst [vmem:[#allocation27_spill] sm:$0xff] %v4549_v30  ;;  %v4554_v35 = vld [vmem:[#allocation7 + $0x280] sm:$0xff]  ;;  %v4556_v39 = vld [vmem:[#allocation7 + $0x288] sm:$0xff] }
 0x4d4   :  { %5821 = vst [vmem:[#allocation28_spill] sm:$0xff] %v4554_v35 }
 0x4d5   :  { %5822 = vst [vmem:[#allocation29_spill] sm:$0xff] %v4556_v39 }
 0x4d8   :  { %v3077_v43 = vpop.eup %3076 }
 0x4d9   :  { %v1218_v44 = vmul.f32 %v3077_v43, %v1212_v47  ;;  %v4559_v43 = vld [vmem:[#allocation7 + $0x2d0] sm:$0xff] }
 0x4da   :  { %5823 = vst [vmem:[#allocation43_spill] sm:$0xff] %v4559_v43 }
 0x4db   :  { %1235 = vmatmul.f32.vlgmr.msrb.gmra.mxu0 %v1218_v44  ;;  %1255 = vmatmul.f32.vlgmr.msrb.gmra.mxu1 %v1218_v44 }
 0x4dc   :  { %1275 = vmatmul.f32.vlgmr.msrb.gmra.mxu2 %v1218_v44  ;;  %1295 = vmatmul.f32.vlgmr.msrb.gmra.mxu3 %v1218_v44 }
 0x4dd   :  { %1677 = vmatpush.msrb.mxu0 %v4420_v37  ;;  %1697 = vmatpush.msrb.mxu1 %v4422_v40 }
 0x4de   :  { %1737 = vmatpush.msrb.mxu3 %v4430_v55  ;;  %1717 = vmatpush.msrb.mxu2 %v4456_v42 }
 0x4df   :  { %1678 = vmatpush.msrb.mxu0 %v4424_v49  ;;  %1698 = vmatpush.msrb.mxu1 %v4428_v46 }
 0x4e0   :  { %1738 = vmatpush.msrb.mxu3 %v4437_v54  ;;  %1718 = vmatpush.msrb.mxu2 %v4459_v52 }
 0x4e1   :  { %1679 = vmatpush.msrb.mxu0 %v4433_v48  ;;  %1699 = vmatpush.msrb.mxu1 %v4435_v61 }
 0x4e2   :  { %1739 = vmatpush.msrb.mxu3 %v4461_v63  ;;  %1719 = vmatpush.msrb.mxu2 %v4477_v60 }
 0x4e3   :  { %1460 = vmatmul.f32.vlgmr.msra.gmra.mxu0 %v5808_v32  ;;  %1501 = vmatmul.f32.vlgmr.msra.gmra.mxu1 %v5808_v32 }
 0x4e4   :  { %1542 = vmatmul.f32.vlgmr.msra.gmra.mxu2 %v5808_v32  ;;  %1583 = vmatmul.f32.vlgmr.msra.gmra.mxu3 %v5808_v32  ;;  %v4565_v32 = vld [vmem:[#allocation7 + $0x2b0] sm:$0xff] }
 0x4e5   :  { %1700 = vmatpush.msrb.mxu1 %v4466_v57  ;;  %1740 = vmatpush.msrb.mxu3 %v4475_v41  ;;  %5825 = vst [vmem:[#allocation31_spill] sm:$0xff] %v4565_v32 }
 0x4e6   :  { %1720 = vmatpush.msrb.mxu2 %v4481_v51 }
 0x4e7   :  { %1701 = vmatpush.msrb.mxu1 %v4473_v59  ;;  %1741 = vmatpush.msrb.mxu3 %v4485_v56 }
 0x4e8   :  { %1721 = vmatpush.msrb.mxu2 %v4488_v38 }
 0x4e9   :  { %1702 = vmatpush.msrb.mxu1 %v4493_v58  ;;  %1742 = vmatpush.msrb.mxu3 %v4495_v14 }
 0x4ea   :  { %1722 = vmatpush.msrb.mxu2 %v4500_v10 }
 0x4eb   :  { %1463 = vmatmul.f32.gmra.mxu0 %v5809_v34  ;;  %1504 = vmatmul.f32.gmra.mxu1 %v5809_v34 }
 0x4ec   :  { %1545 = vmatmul.f32.gmra.mxu2 %v5809_v34  ;;  %1586 = vmatmul.f32.gmra.mxu3 %v5809_v34 }
 0x4ed   :  { %1703 = vmatpush.msrb.mxu1 %v4504_v17  ;;  %1743 = vmatpush.msrb.mxu3 %v4507_v8 }
 0x4ee   :  { %1723 = vmatpush.msrb.mxu2 %v4512_v7 }
 0x4ef   :  { %1704 = vmatpush.msrb.mxu1 %v4516_v53  ;;  %1744 = vmatpush.msrb.mxu3 %v4526_v9 }
 0x4f0   :  { %1724 = vmatpush.msrb.mxu2 %v4539_v25 }
 0x4f1   :  { %1705 = vmatpush.msrb.mxu1 %v4524_v6  ;;  %1745 = vmatpush.msrb.mxu3 %v4533_v22 }
 0x4f2   :  { %1725 = vmatpush.msrb.mxu2 %v4551_v31 }
 0x4f3   :  { %1466 = vmatmul.f32.gmra.mxu0 %v5810_v2  ;;  %1507 = vmatmul.f32.gmra.mxu1 %v5810_v2 }
 0x4f4   :  { %1548 = vmatmul.f32.gmra.mxu2 %v5810_v2  ;;  %1589 = vmatmul.f32.gmra.mxu3 %v5810_v2 }
 0x4f5   :  { %1706 = vmatpush.msrb.mxu1 %v4531_v21  ;;  %1746 = vmatpush.msrb.mxu3 %v4537_v24 }
 0x4f6   :  { %1726 = vmatpush.msrb.mxu2 %v4559_v43 }
 0x4f7   :  { %1707 = vmatpush.msrb.mxu1 %v4544_v28  ;;  %1747 = vmatpush.msrb.mxu3 %v4549_v30 }
 0x4f8   :  { %1727 = vmatpush.msrb.mxu2 %v4565_v32 }
 0x4f9   :  { %1708 = vmatpush.msrb.mxu1 %v4556_v39 }
 0x4fb   :  { %1469 = vmatmul.f32.gmra.mxu0 %v5815_v50  ;;  %1510 = vmatmul.f32.gmra.mxu1 %v5815_v50 }
 0x4fc   :  { %1551 = vmatmul.f32.gmra.mxu2 %v5815_v50  ;;  %1592 = vmatmul.f32.gmra.mxu3 %v5815_v50  ;;  %v4570_v50 = vld [vmem:[#allocation7 + $0x260] sm:$0xff] }
 0x4fd   :  { %5826 = vst [vmem:[#allocation32_spill] sm:$0xff] %v4570_v50 }
 0x503   :  { %1472 = vmatmul.f32.gmra.mxu0 %v4310_v11  ;;  %1513 = vmatmul.f32.gmra.mxu1 %v4310_v11 }
 0x504   :  { %1554 = vmatmul.f32.gmra.mxu2 %v4310_v11  ;;  %1595 = vmatmul.f32.gmra.mxu3 %v4310_v11  ;;  %v4464_v11 = vld [vmem:[#allocation7 + $0x380] sm:$0xff] }
 0x505   :  { %1680 = vmatpush.msrb.mxu0 %v4464_v11 }
 0x50b   :  { %1475 = vmatmul.f32.gmra.mxu0 %v4384_v36  ;;  %1516 = vmatmul.f32.gmra.mxu1 %v4384_v36 }
 0x50c   :  { %1557 = vmatmul.f32.gmra.mxu2 %v4384_v36  ;;  %1598 = vmatmul.f32.gmra.mxu3 %v4384_v36  ;;  %v4469_v36 = vld [vmem:[#allocation7 + $0x360] sm:$0xff] }
 0x50d   :  { %1681 = vmatpush.msrb.mxu0 %v4469_v36 }
 0x50f   :  { %1682 = vmatpush.msrb.mxu0 %v4491_v13 }
 0x511   :  { %1683 = vmatpush.msrb.mxu0 %v4502_v4 }
 0x513   :  { %1478 = vmatmul.f32.gmra.mxu0 %v1218_v44  ;;  %1519 = vmatmul.f32.gmra.mxu1 %v1218_v44 }
 0x514   :  { %1560 = vmatmul.f32.gmra.mxu2 %v1218_v44  ;;  %1601 = vmatmul.f32.gmra.mxu3 %v1218_v44  ;;  %v4563_v44 = vld [vmem:[#allocation7 + $0x298] sm:$0xff] }
 0x515   :  { %1684 = vmatpush.msrb.mxu0 %v4514_v16  ;;  %5824 = vst [vmem:[#allocation30_spill] sm:$0xff] %v4563_v44  ;;  %1748 = vmatpush.msrb.mxu3 %v4563_v44 }
 0x517   :  { %1685 = vmatpush.msrb.mxu0 %v4519_v20 }
 0x519   :  { %1686 = vmatpush.msrb.mxu0 %v4529_v62 }
 0x51b   :  { %1687 = vmatpush.msrb.mxu0 %v4542_v27 }
 0x51d   :  { %1688 = vmatpush.msrb.mxu0 %v4554_v35 }
 0x51f   :  { %1689 = vmatpush.msrb.mxu0 %v4570_v50  ;;  %v4613_v50 = vld [vmem:[#allocation7 + $0x238] sm:$0xff] }
 0x520   :  { %5839 = vst [vmem:[#allocation47_spill] sm:$0xff] %v4613_v50 }
 0x558   :  { %v1236_v45 = vpop.f32.mrf.mxu0  ;;  %v1256_v1 = vpop.f32.mrf.mxu1 }
 0x559   :  { %v1299_v19 = vadd.f32 %v1236_v45, %v120_v5  ;;  %v1300_v18 = vadd.f32 %v1256_v1, %v121_v12  ;;  %v4572_v5 = vld [vmem:[#allocation7 + $0x268] sm:$0xff]  ;;  %v4579_v45 = vld [vmem:[#allocation7 + $0x278] sm:$0xff]  ;;  %v4581_v1 = vld [vmem:[#allocation7 + $0x290] sm:$0xff] }
 0x55a   :  { %5827 = vst [vmem:[#allocation44_spill] sm:$0xff] %v4572_v5  ;;  %1709 = vmatpush.msrb.mxu1 %v4572_v5  ;;  %1749 = vmatpush.msrb.mxu3 %v4579_v45  ;;  %v4611_v5 = vld [vmem:[#allocation7 + $0x208] sm:$0xff] }
 0x55b   :  { %v2926_v0 = vmul.f32 -1.442695, %v1299_v19  ;;  %v2927_v3 = vmul.f32 -1.442695, %v1300_v18  ;;  %5828 = vst [vmem:[#allocation33_spill] sm:$0xff] %v4579_v45  ;;  %v4585_v19 = vld [vmem:[#allocation7 + $0x240] sm:$0xff]  ;;  %1728 = vmatpush.msrb.mxu2 %v4581_v1 }
 0x55c   :  { %5829 = vst [vmem:[#allocation35_spill] sm:$0xff] %v4581_v1  ;;  %v4587_v18 = vld [vmem:[#allocation7 + $0x248] sm:$0xff]  ;;  %1690 = vmatpush.msrb.mxu0 %v4585_v19  ;;  %v4609_v45 = vld [vmem:[#allocation7 + $0x200] sm:$0xff] }
 0x55d   :  { %3078 = vpow2.f32 %v2926_v0  ;;  %5830 = vst [vmem:[#allocation36_spill] sm:$0xff] %v4585_v19  ;;  %v4593_v0 = vld [vmem:[#allocation7 + $0x270] sm:$0xff]  ;;  %1710 = vmatpush.msrb.mxu1 %v4587_v18  ;;  %v4621_v19 = vld [vmem:[#allocation7 + $0x218] sm:$0xff] }
 0x55e   :  { %3080 = vpow2.f32 %v2927_v3  ;;  %5831 = vst [vmem:[#allocation45_spill] sm:$0xff] %v4587_v18  ;;  %v4595_v3 = vld [vmem:[#allocation7 + $0x258] sm:$0xff]  ;;  %1729 = vmatpush.msrb.mxu2 %v4593_v0  ;;  %v4619_v18 = vld [vmem:[#allocation7 + $0x230] sm:$0xff] }
 0x55f   :  { %v1296_v23 = vpop.f32.mrf.mxu3  ;;  %5832 = vst [vmem:[#allocation37_spill] sm:$0xff] %v4593_v0  ;;  %1750 = vmatpush.msrb.mxu3 %v4595_v3 }
 0x560   :  { %v1302_v26 = vadd.f32 %v1296_v23, %v123_v15  ;;  %5833 = vst [vmem:[#allocation39_spill] sm:$0xff] %v4595_v3  ;;  %v4599_v15 = vld [vmem:[#allocation7 + $0x220] sm:$0xff]  ;;  %v4601_v23 = vld [vmem:[#allocation7 + $0x228] sm:$0xff] }
 0x561   :  { %5834 = vst [vmem:[#allocation40_spill] sm:$0xff] %v4599_v15  ;;  %1691 = vmatpush.msrb.mxu0 %v4599_v15  ;;  %1711 = vmatpush.msrb.mxu1 %v4601_v23 }
 0x562   :  { %v2928_v33 = vmul.f32 -1.442695, %v1302_v26  ;;  %5835 = vst [vmem:[#allocation46_spill] sm:$0xff] %v4601_v23  ;;  %v122_v26 = vld [vmem:[#allocation4 + $0xf0] sm:$0xff]  ;;  %1751 = vmatpush.msrb.mxu3 %v4613_v50 }
 0x563   :  { %v3079_v47 = vpop.eup %3078  ;;  %5837 = vst [vmem:[#allocation48_spill] sm:$0xff] %v4609_v45  ;;  %1692 = vmatpush.msrb.mxu0 %v4609_v45  ;;  %1712 = vmatpush.msrb.mxu1 %v4611_v5 }
 0x564   :  { %v3081_v34 = vpop.eup %3080  ;;  %v4567_v2 = vadd.f32 1.0, %v3079_v47  ;;  %3082 = vpow2.f32 %v2928_v33  ;;  %v1276_v33 = vpop.f32.mrf.mxu2  ;;  %v4605_v47 = vld [vmem:[#allocation7 + $0x250] sm:$0xff]  ;;  %5838 = vst [vmem:[#allocation20_spill] sm:$0xff] %v4611_v5  ;;  %1752 = vmatpush.msrb.mxu3 %v4621_v19 }
 0x565   :  { %v4575_v12 = vadd.f32 1.0, %v3081_v34  ;;  %5836 = vst [vmem:[#allocation41_spill] sm:$0xff] %v4605_v47  ;;  %v1301_v0 = vadd.f32 %v1276_v33, %v122_v26  ;;  %1730 = vmatpush.msrb.mxu2 %v4605_v47  ;;  %1824 = vmatpush.msra.mxu0 %v4420_v37 }
 0x566   :  { %3084 = vrcp.f32 %v4567_v2  ;;  %5840 = vst [vmem:[#allocation34_spill] sm:$0xff] %v4619_v18  ;;  %1844 = vmatpush.msra.mxu1 %v4422_v40  ;;  %v1318_v50 = vand.u32 2147483648, %v4567_v2  ;;  %1884 = vmatpush.msra.mxu3 %v4430_v55  ;;  %vm1312_vm6 = vweird.f32 %v4567_v2 }
 0x567   :  { %3086 = vrcp.f32 %v4575_v12  ;;  %5841 = vst [vmem:[#allocation49_spill] sm:$0xff] %v4621_v19  ;;  %1731 = vmatpush.msrb.mxu2 %v4619_v18  ;;  %v1337_v5 = vand.u32 2147483648, %v4575_v12  ;;  %v1316_v18 = vand.u32 2147483647, %v4567_v2  ;;  %1825 = vmatpush.msra.mxu0 %v4424_v49  ;;  %vm1331_vm7 = vweird.f32 %v4575_v12 }
 0x568   :  { %1845 = vmatpush.msra.mxu1 %v4428_v46  ;;  %1885 = vmatpush.msra.mxu3 %v4437_v54 }
 0x569   :  { %1826 = vmatpush.msra.mxu0 %v4433_v48  ;;  %vm1317_vm10 = vcmp.eq.f32.partialorder %v1316_v18, 8.507059e+37 }
 0x56a   :  { %v3083_v34 = vpop.eup %3082  ;;  %1846 = vmatpush.msra.mxu1 %v4435_v61  ;;  %1886 = vmatpush.msra.mxu3 %v4461_v63 }
 0x56b   :  { %v4615_v44 = vadd.f32 1.0, %v3083_v34  ;;  %v4629_v34 = vld [vmem:[#allocation7 + $0x210] sm:$0xff]  ;;  %1827 = vmatpush.msra.mxu0 %v4464_v11 }
 0x56c   :  { %v3085_v1 = vpop.eup %3084  ;;  %5842 = vst [vmem:[#allocation50_spill] sm:$0xff] %v4629_v34  ;;  %1732 = vmatpush.msrb.mxu2 %v4629_v34  ;;  %1847 = vmatpush.msra.mxu1 %v4466_v57 }
 0x56d   :  { %v3087_v3 = vpop.eup %3086  ;;  %v1308_v39 = vmul.f32 %v3085_v1, %v4567_v2  ;;  %3088 = vrcp.f32 %v4615_v44  ;;  %vm1313_vm4 = vweird.f32 %v3085_v1  ;;  %v1338_v2 = vor.u32 1.1754944e-38, %v1337_v5  ;;  %1887 = vmatpush.msra.mxu3 %v4475_v41  ;;  %1828 = vmatpush.msra.mxu0 %v4469_v36 }
 0x56e   :  { %v1327_v23 = vmul.f32 %v3087_v3, %v4575_v12  ;;  %3090 = vtanh.f32 %v1301_v0  ;;  %1864 = vmatpush.msra.mxu2 %v4456_v42  ;;  %vm1332_vm5 = vweird.f32 %v3087_v3  ;;  %vm1314_vm8 = vmor %vm1312_vm6, %vm1313_vm4  ;;  %1848 = vmatpush.msra.mxu1 %v4473_v59  ;;  %vm1351_vm13 = vweird.f32 %v4615_v44 }
 0x56f   :  { %v1309_v26 = vsub.f32 1.0, %v1308_v39  ;;  %vm1333_vm9 = vmor %vm1331_vm7, %vm1332_vm5  ;;  %1888 = vmatpush.msra.mxu3 %v4485_v56  ;;  %1829 = vmatpush.msra.mxu0 %v4491_v13 }
 0x570   :  { %v1328_v33 = vsub.f32 1.0, %v1327_v23  ;;  %v1335_v23 = vand.u32 2147483647, %v4575_v12  ;;  %1865 = vmatpush.msra.mxu2 %v4459_v52  ;;  %1849 = vmatpush.msra.mxu1 %v4493_v58 }
 0x571   :  { %v1310_v45 = vmul.f32 %v3085_v1, %v1309_v26  ;;  %v1319_v26 = vor.u32 1.1754944e-38, %v1318_v50  ;;  %1889 = vmatpush.msra.mxu3 %v4495_v14  ;;  %1830 = vmatpush.msra.mxu0 %v4502_v4 }
 0x572   :  { %v1329_v39 = vmul.f32 %v3087_v3, %v1328_v33  ;;  %1866 = vmatpush.msra.mxu2 %v4477_v60  ;;  %vm1336_vm11 = vcmp.eq.f32.partialorder %v1335_v23, 8.507059e+37  ;;  %1850 = vmatpush.msra.mxu1 %v4504_v17  ;;  %v5843_v23 = vld [vmem:[#allocation29_spill] sm:$0xff] }
 0x573   :  { %v4646_v0 = vpop.eup %3088  ;;  %v1311_v55 = vadd.f32 %v3085_v1, %v1310_v45  ;;  %1890 = vmatpush.msra.mxu3 %v4507_v8  ;;  %1831 = vmatpush.msra.mxu0 %v4514_v16 }
 0x574   :  { %v1330_v33 = vadd.f32 %v3087_v3, %v1329_v39  ;;  %v1347_v46 = vmul.f32 %v4646_v0, %v4615_v44  ;;  %v3091_v12 = vpop.eup %3090  ;;  %1867 = vmatpush.msra.mxu2 %v4481_v51  ;;  %vm1352_vm12 = vweird.f32 %v4646_v0  ;;  %1851 = vmatpush.msra.mxu1 %v4516_v53 }
 0x575   :  { %v1315_v45 = vsel %vm1314_vm8, %v3085_v1, %v1311_v55  ;;  %vm1353_vm14 = vmor %vm1351_vm13, %vm1352_vm12  ;;  %1891 = vmatpush.msra.mxu3 %v4526_v9  ;;  %1832 = vmatpush.msra.mxu0 %v4519_v20 }
 0x576   :  { %v1320_v48 = vsel %vm1317_vm10, %v1319_v26, %v1315_v45  ;;  %v1334_v50 = vsel %vm1333_vm9, %v3087_v3, %v1330_v33  ;;  %v1348_v39 = vsub.f32 1.0, %v1347_v46  ;;  %1868 = vmatpush.msra.mxu2 %v4488_v38  ;;  %1852 = vmatpush.msra.mxu1 %v4524_v6  ;;  %v5845_v26 = vld [vmem:[#allocation30_spill] sm:$0xff]  ;;  %v5846_v33 = vld [vmem:[#allocation32_spill] sm:$0xff]  ;;  %v5848_v45 = vld [vmem:[#allocation37_spill] sm:$0xff] }
 0x577   :  { %v1339_v61 = vsel %vm1336_vm11, %v1338_v2, %v1334_v50  ;;  %v1362_v63 = vmul.f32 %v3091_v12, %v1320_v48  ;;  %1892 = vmatpush.msra.mxu3 %v4533_v22  ;;  %1833 = vmatpush.msra.mxu0 %v4529_v62  ;;  %v5847_v2 = vld [vmem:[#allocation44_spill] sm:$0xff]  ;;  %v5849_v12 = vld [vmem:[#allocation33_spill] sm:$0xff] }
 0x578   :  { %v1361_v55 = vmul.f32 %v1339_v61, %v4405_v29  ;;  %v1349_v5 = vmul.f32 %v4646_v0, %v1348_v39  ;;  %1869 = vmatpush.msra.mxu2 %v4500_v10  ;;  %v1357_v29 = vand.u32 2147483648, %v4615_v44  ;;  %v1355_v61 = vand.u32 2147483647, %v4615_v44  ;;  %1853 = vmatpush.msra.mxu1 %v4531_v21  ;;  %v5850_v50 = vld [vmem:[#allocation36_spill] sm:$0xff]  ;;  %v5851_v39 = vld [vmem:[#allocation45_spill] sm:$0xff] }
 0x579   :  { %1893 = vmatpush.msra.mxu3 %v4537_v24  ;;  %1834 = vmatpush.msra.mxu0 %v4542_v27 }
 0x57a   :  { %v1363_v46 = vadd.f32 %v1362_v63, %v1361_v55  ;;  %v1350_v48 = vadd.f32 %v4646_v0, %v1349_v5  ;;  %1870 = vmatpush.msra.mxu2 %v4512_v7  ;;  %v1358_v1 = vor.u32 1.1754944e-38, %v1357_v29  ;;  %vm1356_vm15 = vcmp.eq.f32.partialorder %v1355_v61, 8.507059e+37  ;;  %1854 = vmatpush.msra.mxu1 %v4544_v28  ;;  %v5853_v5 = vld [vmem:[#allocation39_spill] sm:$0xff]  ;;  %v5857_v61 = vld [vmem:[#allocation48_spill] sm:$0xff] }
 0x57b   :  { %1894 = vmatpush.msra.mxu3 %v4549_v30  ;;  %1835 = vmatpush.msra.mxu0 %v4554_v35  ;;  %v5852_v55 = vmov 0.0   ;;  %v5856_v29 = vld [vmem:[#allocation47_spill] sm:$0xff] }
 0x57c   :  { %3092 = vtanh.f32 %v1363_v46  ;;  %2864 = vst [vmem:[#allocation13] sm:$0xff] %v1363_v46  ;;  %v1354_v63 = vsel %vm1353_vm14, %v4646_v0, %v1350_v48  ;;  %1871 = vmatpush.msra.mxu2 %v4539_v25  ;;  %1855 = vmatpush.msra.mxu1 %v5843_v23  ;;  %v5844_v0 = vld [vmem:[#allocation35_spill] sm:$0xff]  ;;  %v5854_v46 = vld [vmem:[#allocation46_spill] sm:$0xff] }
 0x57d   :  { %v1359_v18 = vsel %vm1356_vm15, %v1358_v1, %v1354_v63  ;;  %1895 = vmatpush.msra.mxu3 %v5845_v26  ;;  %1836 = vmatpush.msra.mxu0 %v5846_v33  ;;  %v5855_v48 = vld [vmem:[#allocation34_spill] sm:$0xff]  ;;  %v5858_v63 = vld [vmem:[#allocation20_spill] sm:$0xff] }
 0x57e   :  { %1872 = vmatpush.msra.mxu2 %v4551_v31  ;;  %1856 = vmatpush.msra.mxu1 %v5847_v2  ;;  %v5859_v1 = vld [vmem:[#allocation22_spill] sm:$0xff] }
 0x57f   :  { %1896 = vmatpush.msra.mxu3 %v5849_v12  ;;  %1837 = vmatpush.msra.mxu0 %v5850_v50 }
 0x580   :  { %1873 = vmatpush.msra.mxu2 %v4559_v43  ;;  %1857 = vmatpush.msra.mxu1 %v5851_v39 }
 0x581   :  { %1897 = vmatpush.msra.mxu3 %v5853_v5  ;;  %1838 = vmatpush.msra.mxu0 %v4599_v15 }
 0x582   :  { %v3093_v44 = vpop.eup %3092  ;;  %1874 = vmatpush.msra.mxu2 %v4565_v32  ;;  %1858 = vmatpush.msra.mxu1 %v5854_v46 }
 0x583   :  { %v1365_v3 = vmul.f32 %v3093_v44, %v1359_v18  ;;  %1898 = vmatpush.msra.mxu3 %v5856_v29  ;;  %1839 = vmatpush.msra.mxu0 %v5857_v61  ;;  %v5860_v44 = vld [vmem:[#allocation21_spill] sm:$0xff]  ;;  %v5861_v18 = vld [vmem:[#allocation23_spill] sm:$0xff] }
 0x584   :  { %1875 = vmatpush.msra.mxu2 %v5844_v0  ;;  %1859 = vmatpush.msra.mxu1 %v5858_v63 }
 0x585   :  { %1481 = vmatmul.f32.gmra.mxu0 %v1365_v3  ;;  %2860 = vst [vmem:[#allocation12] sm:$0xff] %v1365_v3  ;;  %1522 = vmatmul.f32.gmra.mxu1 %v1365_v3 }
 0x586   :  { %1563 = vmatmul.f32.gmra.mxu2 %v1365_v3  ;;  %1604 = vmatmul.f32.gmra.mxu3 %v1365_v3  ;;  %v5862_v3 = vld [vmem:[#allocation38_spill] sm:$0xff] }
 0x587   :  { %1876 = vmatpush.msra.mxu2 %v5848_v45  ;;  %1899 = vmatpush.msra.mxu3 %v4621_v19 }
 0x589   :  { %1877 = vmatpush.msra.mxu2 %v4605_v47 }
 0x58b   :  { %1878 = vmatpush.msra.mxu2 %v5855_v48 }
 0x58d   :  { %1693 = vmatmul.f32.vlgmr.msrb.gmra.mxu0 %v5852_v55  ;;  %1713 = vmatmul.f32.vlgmr.msrb.gmra.mxu1 %v5852_v55 }
 0x58e   :  { %1733 = vmatmul.f32.vlgmr.msrb.gmra.mxu2 %v5852_v55  ;;  %1753 = vmatmul.f32.vlgmr.msrb.gmra.mxu3 %v5852_v55  ;;  %v5863_v55 = vld [vmem:[#allocation24_spill] sm:$0xff] }
 0x58f   :  { %1879 = vmatpush.msra.mxu2 %v4629_v34  ;;  %1971 = vmatpush.msrb.mxu0 %v4420_v37 }
 0x590   :  { %1991 = vmatpush.msrb.mxu1 %v4422_v40  ;;  %2031 = vmatpush.msrb.mxu3 %v5859_v1 }
 0x591   :  { %2011 = vmatpush.msrb.mxu2 %v4456_v42  ;;  %1972 = vmatpush.msrb.mxu0 %v4424_v49 }
 0x592   :  { %1992 = vmatpush.msrb.mxu1 %v5860_v44  ;;  %2032 = vmatpush.msrb.mxu3 %v4437_v54 }
 0x593   :  { %2012 = vmatpush.msrb.mxu2 %v4459_v52  ;;  %1973 = vmatpush.msrb.mxu0 %v5861_v18 }
 0x594   :  { %1993 = vmatpush.msrb.mxu1 %v5862_v3  ;;  %2033 = vmatpush.msrb.mxu3 %v5863_v55 }
 0x595   :  { %2013 = vmatpush.msrb.mxu2 %v4477_v60  ;;  %1974 = vmatpush.msrb.mxu0 %v4464_v11 }
 0x596   :  { %1994 = vmatpush.msrb.mxu1 %v4466_v57  ;;  %2034 = vmatpush.msrb.mxu3 %v4475_v41 }
 0x597   :  { %2014 = vmatpush.msrb.mxu2 %v4481_v51  ;;  %1975 = vmatpush.msrb.mxu0 %v4469_v36 }
 0x598   :  { %1995 = vmatpush.msrb.mxu1 %v4473_v59  ;;  %2035 = vmatpush.msrb.mxu3 %v4485_v56 }
 0x599   :  { %2015 = vmatpush.msrb.mxu2 %v4488_v38  ;;  %1976 = vmatpush.msrb.mxu0 %v4491_v13 }
 0x59a   :  { %1996 = vmatpush.msrb.mxu1 %v4493_v58  ;;  %2036 = vmatpush.msrb.mxu3 %v4495_v14 }
 0x59b   :  { %2016 = vmatpush.msrb.mxu2 %v4500_v10  ;;  %1977 = vmatpush.msrb.mxu0 %v4502_v4 }
 0x59c   :  { %1997 = vmatpush.msrb.mxu1 %v4504_v17  ;;  %2037 = vmatpush.msrb.mxu3 %v4507_v8 }
 0x59d   :  { %2017 = vmatpush.msrb.mxu2 %v4512_v7  ;;  %1978 = vmatpush.msrb.mxu0 %v4514_v16 }
 0x59e   :  { %1998 = vmatpush.msrb.mxu1 %v4516_v53  ;;  %2038 = vmatpush.msrb.mxu3 %v4526_v9 }
 0x59f   :  { %2018 = vmatpush.msrb.mxu2 %v4539_v25  ;;  %1979 = vmatpush.msrb.mxu0 %v4519_v20 }
 0x5a0   :  { %1999 = vmatpush.msrb.mxu1 %v4524_v6  ;;  %2039 = vmatpush.msrb.mxu3 %v4533_v22 }
 0x5a1   :  { %2019 = vmatpush.msrb.mxu2 %v4551_v31  ;;  %1980 = vmatpush.msrb.mxu0 %v4529_v62 }
 0x5a2   :  { %2000 = vmatpush.msrb.mxu1 %v4531_v21  ;;  %2040 = vmatpush.msrb.mxu3 %v4537_v24 }
 0x5a3   :  { %2020 = vmatpush.msrb.mxu2 %v4559_v43  ;;  %1981 = vmatpush.msrb.mxu0 %v4542_v27 }
 0x5a4   :  { %2001 = vmatpush.msrb.mxu1 %v4544_v28  ;;  %2041 = vmatpush.msrb.mxu3 %v4549_v30 }
 0x5a5   :  { %2021 = vmatpush.msrb.mxu2 %v4565_v32  ;;  %1982 = vmatpush.msrb.mxu0 %v4554_v35 }
 0x5a6   :  { %2002 = vmatpush.msrb.mxu1 %v5843_v23  ;;  %2042 = vmatpush.msrb.mxu3 %v5845_v26 }
 0x5a7   :  { %2022 = vmatpush.msrb.mxu2 %v5844_v0  ;;  %1983 = vmatpush.msrb.mxu0 %v5846_v33 }
 0x5a8   :  { %2003 = vmatpush.msrb.mxu1 %v5847_v2  ;;  %2043 = vmatpush.msrb.mxu3 %v5849_v12 }
 0x5a9   :  { %2023 = vmatpush.msrb.mxu2 %v5848_v45  ;;  %1984 = vmatpush.msrb.mxu0 %v5850_v50  ;;  %v1584_v50 = vpop.f32.mrf.mxu3 }
 0x5aa   :  { %2004 = vmatpush.msrb.mxu1 %v5851_v39  ;;  %2044 = vmatpush.msrb.mxu3 %v5853_v5  ;;  %v1461_v39 = vpop.f32.mrf.mxu0 }
 0x5ab   :  { %2024 = vmatpush.msrb.mxu2 %v4605_v47  ;;  %1985 = vmatpush.msrb.mxu0 %v4599_v15  ;;  %v1502_v47 = vpop.f32.mrf.mxu1 }
 0x5ac   :  { %2005 = vmatpush.msrb.mxu1 %v5854_v46  ;;  %2045 = vmatpush.msrb.mxu3 %v5856_v29  ;;  %v1543_v46 = vpop.f32.mrf.mxu2 }
 0x5ad   :  { %2025 = vmatpush.msrb.mxu2 %v5855_v48  ;;  %1986 = vmatpush.msrb.mxu0 %v5857_v61 }
 0x5ae   :  { %2006 = vmatpush.msrb.mxu1 %v5858_v63  ;;  %2046 = vmatpush.msrb.mxu3 %v4621_v19 }
 0x5af   :  { %2026 = vmatpush.msrb.mxu2 %v4629_v34 }
 0x5b1   :  { %v4791_v12 = vpop.f32.mrf.mxu3 }
 0x5b2   :  { %v4787_v5 = vpop.f32.mrf.mxu0  ;;  %5866 = vst [vmem:[#allocation23_spill] sm:$0xff] %v4791_v12 }
 0x5b3   :  { %5864 = vst [vmem:[#allocation22_spill] sm:$0xff] %v4787_v5  ;;  %v4789_v15 = vpop.f32.mrf.mxu1 }
 0x5b4   :  { %5865 = vst [vmem:[#allocation21_spill] sm:$0xff] %v4789_v15  ;;  %v4797_v61 = vpop.f32.mrf.mxu2 }
 0x5b5   :  { %5869 = vst [vmem:[#allocation51_spill] sm:$0xff] %v4797_v61 }
 0x5b9   :  { %v4799_v63 = vpop.f32.mrf.mxu3 }
 0x5ba   :  { %v4793_v48 = vpop.f32.mrf.mxu0  ;;  %5870 = vst [vmem:[#allocation52_spill] sm:$0xff] %v4799_v63 }
 0x5bb   :  { %5867 = vst [vmem:[#allocation38_spill] sm:$0xff] %v4793_v48  ;;  %v4795_v29 = vpop.f32.mrf.mxu1 }
 0x5bc   :  { %5868 = vst [vmem:[#allocation24_spill] sm:$0xff] %v4795_v29  ;;  %v4805_v45 = vpop.f32.mrf.mxu2 }
 0x5bd   :  { %5873 = vst [vmem:[#allocation55_spill] sm:$0xff] %v4805_v45 }
 0x5c1   :  { %v4807_v5 = vpop.f32.mrf.mxu3 }
 0x5c2   :  { %v4801_v34 = vpop.f32.mrf.mxu0  ;;  %5874 = vst [vmem:[#allocation56_spill] sm:$0xff] %v4807_v5 }
 0x5c3   :  { %5871 = vst [vmem:[#allocation53_spill] sm:$0xff] %v4801_v34  ;;  %v4803_v19 = vpop.f32.mrf.mxu1 }
 0x5c4   :  { %5872 = vst [vmem:[#allocation54_spill] sm:$0xff] %v4803_v19  ;;  %v4813_v12 = vpop.f32.mrf.mxu2 }
 0x5c5   :  { %5877 = vst [vmem:[#allocation59_spill] sm:$0xff] %v4813_v12 }
 0x5c9   :  { %v4815_v48 = vpop.f32.mrf.mxu3 }
 0x5ca   :  { %v4809_v15 = vpop.f32.mrf.mxu0  ;;  %5878 = vst [vmem:[#allocation60_spill] sm:$0xff] %v4815_v48 }
 0x5cb   :  { %5875 = vst [vmem:[#allocation57_spill] sm:$0xff] %v4809_v15  ;;  %v4811_v2 = vpop.f32.mrf.mxu1 }
 0x5cc   :  { %5876 = vst [vmem:[#allocation58_spill] sm:$0xff] %v4811_v2  ;;  %v4821_v63 = vpop.f32.mrf.mxu2  ;;  %v1434_v2 = vld [vmem:[#allocation10 + $0x4] sm:$0xf] }
 0x5cd   :  { %5881 = vst [vmem:[#allocation63_spill] sm:$0xff] %v4821_v63  ;;  %v4847_v0 = vperm.slane %v1434_v2, 3 }
 0x5cf   :  { %5893 = vst [vmem:[#allocation75_spill] sm:$0xff] %v4847_v0  ;;  %v1585_v23 = vadd.f32 %v1584_v50, %v4847_v0 }
 0x5d1   :  { %v4823_v34 = vpop.f32.mrf.mxu3 }
 0x5d2   :  { %v4817_v29 = vpop.f32.mrf.mxu0  ;;  %5882 = vst [vmem:[#allocation64_spill] sm:$0xff] %v4823_v34 }
 0x5d3   :  { %5879 = vst [vmem:[#allocation61_spill] sm:$0xff] %v4817_v29  ;;  %v4819_v61 = vpop.f32.mrf.mxu1  ;;  %v4837_v29 = vperm.slane %v1434_v2, 0 }
 0x5d4   :  { %5880 = vst [vmem:[#allocation62_spill] sm:$0xff] %v4819_v61  ;;  %v4829_v5 = vpop.f32.mrf.mxu2  ;;  %v4839_v61 = vperm.slane %v1434_v2, 1 }
 0x5d5   :  { %5885 = vst [vmem:[#allocation67_spill] sm:$0xff] %v4829_v5  ;;  %v1462_v63 = vadd.f32 %v1461_v39, %v4837_v29 }
 0x5d6   :  { %5889 = vst [vmem:[#allocation71_spill] sm:$0xff] %v4837_v29  ;;  %v1503_v34 = vadd.f32 %v1502_v47, %v4839_v61 }
 0x5d7   :  { %5890 = vst [vmem:[#allocation72_spill] sm:$0xff] %v4839_v61 }
 0x5d9   :  { %v4831_v15 = vpop.f32.mrf.mxu3 }
 0x5da   :  { %v4825_v19 = vpop.f32.mrf.mxu0  ;;  %5886 = vst [vmem:[#allocation68_spill] sm:$0xff] %v4831_v15 }
 0x5db   :  { %5883 = vst [vmem:[#allocation65_spill] sm:$0xff] %v4825_v19  ;;  %v4827_v45 = vpop.f32.mrf.mxu1 }
 0x5dc   :  { %5884 = vst [vmem:[#allocation66_spill] sm:$0xff] %v4827_v45  ;;  %v4843_v19 = vpop.f32.mrf.mxu2 }
 0x5dd   :  { %5891 = vst [vmem:[#allocation73_spill] sm:$0xff] %v4843_v19 }
 0x602   :  { %v4833_v12 = vpop.f32.mrf.mxu0  ;;  %v4835_v48 = vpop.f32.mrf.mxu1 }
 0x603   :  { %5887 = vst [vmem:[#allocation69_spill] sm:$0xff] %v4833_v12 }
 0x604   :  { %5888 = vst [vmem:[#allocation70_spill] sm:$0xff] %v4835_v48 }
 0x609   :  { %v4845_v45 = vpop.f32.mrf.mxu3  ;;  %v4850_v35 = vpop.f32.mrf.mxu2 }
 0x60a   :  { %5892 = vst [vmem:[#allocation74_spill] sm:$0xff] %v4845_v45  ;;  %v1694_v5 = vpop.f32.mrf.mxu0  ;;  %v1714_v33 = vpop.f32.mrf.mxu1 }
 0x60b   :  { %v1757_v15 = vadd.f32 %v1694_v5, %v1462_v63  ;;  %v1758_v26 = vadd.f32 %v1714_v33, %v1503_v34  ;;  %5894 = vst [vmem:[#allocation76_spill] sm:$0xff] %v4850_v35  ;;  %v4852_v5 = vperm.slane %v1434_v2, 2 }
 0x60d   :  { %v2929_v12 = vmul.f32 -1.442695, %v1757_v15  ;;  %v2930_v48 = vmul.f32 -1.442695, %v1758_v26  ;;  %5895 = vst [vmem:[#allocation77_spill] sm:$0xff] %v4852_v5  ;;  %v1544_v26 = vadd.f32 %v1543_v46, %v4852_v5 }
 0x60f   :  { %3094 = vpow2.f32 %v2929_v12 }
 0x610   :  { %3096 = vpow2.f32 %v2930_v48 }
 0x611   :  { %v1754_v39 = vpop.f32.mrf.mxu3  ;;  %v1734_v15 = vpop.f32.mrf.mxu2 }
 0x612   :  { %v1760_v47 = vadd.f32 %v1754_v39, %v1585_v23  ;;  %v1759_v50 = vadd.f32 %v1734_v15, %v1544_v26 }
 0x614   :  { %v2931_v61 = vmul.f32 -1.442695, %v1760_v47 }
 0x615   :  { %v3095_v19 = vpop.eup %3094 }
 0x616   :  { %v3097_v29 = vpop.eup %3096  ;;  %v1764_v45 = vadd.f32 1.0, %v3095_v19  ;;  %3098 = vpow2.f32 %v2931_v61 }
 0x617   :  { %v1783_v30 = vadd.f32 1.0, %v3097_v29 }
 0x618   :  { %3100 = vrcp.f32 %v1764_v45  ;;  %v1776_v19 = vand.u32 2147483648, %v1764_v45  ;;  %v1774_v61 = vand.u32 2147483647, %v1764_v45  ;;  %vm1770_vm2 = vweird.f32 %v1764_v45 }
 0x619   :  { %3102 = vrcp.f32 %v1783_v30  ;;  %v1795_v29 = vand.u32 2147483648, %v1783_v30  ;;  %v1793_v0 = vand.u32 2147483647, %v1783_v30  ;;  %vm1789_vm3 = vweird.f32 %v1783_v30 }
 0x61a   :  { %v1777_v15 = vor.u32 1.1754944e-38, %v1776_v19  ;;  %vm1775_vm5 = vcmp.eq.f32.partialorder %v1774_v61, 8.507059e+37 }
 0x61b   :  { %v1796_v5 = vor.u32 1.1754944e-38, %v1795_v29  ;;  %vm1794_vm7 = vcmp.eq.f32.partialorder %v1793_v0, 8.507059e+37 }
 0x61c   :  { %v3099_v34 = vpop.eup %3098 }
 0x61d   :  { %v1803_v33 = vadd.f32 1.0, %v3099_v34 }
 0x61e   :  { %v3101_v12 = vpop.eup %3100 }
 0x61f   :  { %v3103_v48 = vpop.eup %3102  ;;  %v1766_v63 = vmul.f32 %v3101_v12, %v1764_v45  ;;  %3104 = vrcp.f32 %v1803_v33  ;;  %vm1771_vm0 = vweird.f32 %v3101_v12  ;;  %vm1809_vm9 = vweird.f32 %v1803_v33 }
 0x620   :  { %v1785_v23 = vmul.f32 %v3103_v48, %v1783_v30  ;;  %3106 = vtanh.f32 %v1759_v50  ;;  %vm1790_vm1 = vweird.f32 %v3103_v48  ;;  %vm1772_vm4 = vmor %vm1770_vm2, %vm1771_vm0  ;;  %v1813_v45 = vand.u32 2147483647, %v1803_v33 }
 0x621   :  { %v1767_v39 = vsub.f32 1.0, %v1766_v63  ;;  %vm1791_vm6 = vmor %vm1789_vm3, %vm1790_vm1 }
 0x622   :  { %v1786_v47 = vsub.f32 1.0, %v1785_v23  ;;  %vm1814_vm11 = vcmp.eq.f32.partialorder %v1813_v45, 8.507059e+37 }
 0x623   :  { %v1768_v2 = vmul.f32 %v3101_v12, %v1767_v39 }
 0x624   :  { %v1787_v35 = vmul.f32 %v3103_v48, %v1786_v47 }
 0x625   :  { %v3105_v32 = vpop.eup %3104  ;;  %v1769_v46 = vadd.f32 %v3101_v12, %v1768_v2 }
 0x626   :  { %v1788_v34 = vadd.f32 %v3103_v48, %v1787_v35  ;;  %v1805_v26 = vmul.f32 %v3105_v32, %v1803_v33  ;;  %v3107_v50 = vpop.eup %3106  ;;  %vm1810_vm8 = vweird.f32 %v3105_v32  ;;  %v1815_v35 = vand.u32 2147483648, %v1803_v33 }
 0x627   :  { %v1773_v63 = vsel %vm1772_vm4, %v3101_v12, %v1769_v46  ;;  %vm1811_vm10 = vmor %vm1809_vm9, %vm1810_vm8 }
 0x628   :  { %v1778_v23 = vsel %vm1775_vm5, %v1777_v15, %v1773_v63  ;;  %v1792_v39 = vsel %vm1791_vm6, %v3103_v48, %v1788_v34  ;;  %v1806_v28 = vsub.f32 1.0, %v1805_v26  ;;  %v1816_v19 = vor.u32 1.1754944e-38, %v1815_v35  ;;  %v5928_v63 = vld [vmem:[#allocation77_spill] sm:$0xff] }
 0x629   :  { %v1797_v47 = vsel %vm1794_vm7, %v1796_v5, %v1792_v39  ;;  %v1820_v27 = vmul.f32 %v3107_v50, %v1778_v23  ;;  %v5929_v50 = vld [vmem:[#allocation51_spill] sm:$0xff] }
 0x62a   :  { %v1819_v24 = vmul.f32 0.0, %v1797_v47  ;;  %v1807_v43 = vmul.f32 %v3105_v32, %v1806_v28  ;;  %v1547_v23 = vadd.f32 %v5929_v50, %v5928_v63  ;;  %v4994_v50 = vld [vmem:[#allocation7 + $0x340] sm:$0xff] }
 0x62c   :  { %v4855_v2 = vadd.f32 %v1820_v27, %v1819_v24  ;;  %v1808_v30 = vadd.f32 %v3105_v32, %v1807_v43 }
 0x62e   :  { %3108 = vtanh.f32 %v4855_v2  ;;  %v1812_v12 = vsel %vm1811_vm10, %v3105_v32, %v1808_v30 }
 0x62f   :  { %v1817_v0 = vsel %vm1814_vm11, %v1816_v19, %v1812_v12 }
 0x634   :  { %v3109_v48 = vpop.eup %3108 }
 0x635   :  { %v1823_v29 = vmul.f32 %v3109_v48, %v1817_v0 }
 0x637   :  { %1840 = vmatmul.f32.vlgmr.msra.gmra.mxu0 %v1823_v29  ;;  %1860 = vmatmul.f32.vlgmr.msra.gmra.mxu1 %v1823_v29 }
 0x638   :  { %1880 = vmatmul.f32.vlgmr.msra.gmra.mxu2 %v1823_v29  ;;  %1900 = vmatmul.f32.vlgmr.msra.gmra.mxu3 %v1823_v29 }
 0x639   :  { %2118 = vmatpush.msra.mxu0 %v4420_v37  ;;  %2138 = vmatpush.msra.mxu1 %v4422_v40  ;;  %v5896_v37 = vld [vmem:[#allocation43_spill] sm:$0xff]  ;;  %v5897_v40 = vld [vmem:[#allocation25_spill] sm:$0xff] }
 0x63a   :  { %2158 = vmatpush.msra.mxu2 %v4456_v42  ;;  %2178 = vmatpush.msra.mxu3 %v5859_v1  ;;  %v5900_v42 = vld [vmem:[#allocation31_spill] sm:$0xff] }
 0x63b   :  { %2119 = vmatpush.msra.mxu0 %v4424_v49  ;;  %2139 = vmatpush.msra.mxu1 %v5860_v44  ;;  %v5898_v49 = vld [vmem:[#allocation26_spill] sm:$0xff]  ;;  %v5926_v1 = vld [vmem:[#allocation75_spill] sm:$0xff] }
 0x63c   :  { %2159 = vmatpush.msra.mxu2 %v4459_v52  ;;  %2179 = vmatpush.msra.mxu3 %v4437_v54  ;;  %v5899_v54 = vld [vmem:[#allocation42_spill] sm:$0xff]  ;;  %v5901_v52 = vld [vmem:[#allocation27_spill] sm:$0xff] }
 0x63d   :  { %2120 = vmatpush.msra.mxu0 %v5861_v18  ;;  %2140 = vmatpush.msra.mxu1 %v5862_v3  ;;  %v5927_v44 = vld [vmem:[#allocation23_spill] sm:$0xff] }
 0x63e   :  { %2160 = vmatpush.msra.mxu2 %v4477_v60  ;;  %2180 = vmatpush.msra.mxu3 %v5863_v55  ;;  %v5907_v60 = vld [vmem:[#allocation44_spill] sm:$0xff]  ;;  %v1588_v18 = vadd.f32 %v5927_v44, %v5926_v1 }
 0x63f   :  { %2121 = vmatpush.msra.mxu0 %v4464_v11  ;;  %2141 = vmatpush.msra.mxu1 %v4466_v57  ;;  %v5902_v11 = vld [vmem:[#allocation28_spill] sm:$0xff]  ;;  %v5903_v57 = vld [vmem:[#allocation29_spill] sm:$0xff] }
 0x640   :  { %2161 = vmatpush.msra.mxu2 %v4481_v51  ;;  %2181 = vmatpush.msra.mxu3 %v4475_v41  ;;  %v5906_v41 = vld [vmem:[#allocation32_spill] sm:$0xff]  ;;  %v5908_v51 = vld [vmem:[#allocation37_spill] sm:$0xff] }
 0x641   :  { %2122 = vmatpush.msra.mxu0 %v4469_v36  ;;  %2142 = vmatpush.msra.mxu1 %v4473_v59  ;;  %v5904_v36 = vld [vmem:[#allocation35_spill] sm:$0xff]  ;;  %v5905_v59 = vld [vmem:[#allocation30_spill] sm:$0xff]  ;;  %v4961_v44 = vld [vmem:[#allocation7 + $0x3a8] sm:$0xff] }
 0x642   :  { %2162 = vmatpush.msra.mxu2 %v4488_v38  ;;  %2182 = vmatpush.msra.mxu3 %v4485_v56  ;;  %v5909_v56 = vld [vmem:[#allocation33_spill] sm:$0xff]  ;;  %v5910_v38 = vld [vmem:[#allocation36_spill] sm:$0xff] }
 0x643   :  { %2123 = vmatpush.msra.mxu0 %v4491_v13  ;;  %2143 = vmatpush.msra.mxu1 %v4493_v58  ;;  %v5911_v13 = vld [vmem:[#allocation45_spill] sm:$0xff] }
 0x644   :  { %2163 = vmatpush.msra.mxu2 %v4500_v10  ;;  %2183 = vmatpush.msra.mxu3 %v4495_v14  ;;  %v5912_v58 = vld [vmem:[#allocation41_spill] sm:$0xff]  ;;  %v5913_v14 = vld [vmem:[#allocation39_spill] sm:$0xff]  ;;  %v5914_v10 = vld [vmem:[#allocation40_spill] sm:$0xff] }
 0x645   :  { %2124 = vmatpush.msra.mxu0 %v4502_v4  ;;  %2144 = vmatpush.msra.mxu1 %v4504_v17  ;;  %v5915_v4 = vld [vmem:[#allocation46_spill] sm:$0xff] }
 0x646   :  { %2164 = vmatpush.msra.mxu2 %v4512_v7  ;;  %2184 = vmatpush.msra.mxu3 %v4507_v8  ;;  %v5916_v17 = vld [vmem:[#allocation34_spill] sm:$0xff]  ;;  %v5917_v8 = vld [vmem:[#allocation47_spill] sm:$0xff]  ;;  %v5918_v7 = vld [vmem:[#allocation48_spill] sm:$0xff] }
 0x647   :  { %2125 = vmatpush.msra.mxu0 %v4514_v16  ;;  %2145 = vmatpush.msra.mxu1 %v4516_v53  ;;  %v5919_v16 = vld [vmem:[#allocation20_spill] sm:$0xff]  ;;  %v5920_v53 = vld [vmem:[#allocation50_spill] sm:$0xff] }
 0x648   :  { %2165 = vmatpush.msra.mxu2 %v4539_v25  ;;  %2185 = vmatpush.msra.mxu3 %v4526_v9  ;;  %v5923_v9 = vld [vmem:[#allocation22_spill] sm:$0xff] }
 0x649   :  { %2126 = vmatpush.msra.mxu0 %v4519_v20  ;;  %2146 = vmatpush.msra.mxu1 %v4524_v6  ;;  %v5921_v20 = vld [vmem:[#allocation49_spill] sm:$0xff]  ;;  %v5922_v6 = vld [vmem:[#allocation71_spill] sm:$0xff] }
 0x64a   :  { %2166 = vmatpush.msra.mxu2 %v4551_v31  ;;  %2186 = vmatpush.msra.mxu3 %v4533_v22  ;;  %v5925_v22 = vld [vmem:[#allocation21_spill] sm:$0xff] }
 0x64b   :  { %2127 = vmatpush.msra.mxu0 %v4529_v62  ;;  %2147 = vmatpush.msra.mxu1 %v4531_v21  ;;  %v1465_v62 = vadd.f32 %v5923_v9, %v5922_v6  ;;  %v5924_v21 = vld [vmem:[#allocation72_spill] sm:$0xff] }
 0x64c   :  { %2167 = vmatpush.msra.mxu2 %v5896_v37  ;;  %2187 = vmatpush.msra.mxu3 %v5897_v40  ;;  %v1506_v24 = vadd.f32 %v5925_v22, %v5924_v21  ;;  %v4937_v22 = vld [vmem:[#allocation7 + $0x3e8] sm:$0xff] }
 0x64d   :  { %2128 = vmatpush.msra.mxu0 %v5898_v49  ;;  %2148 = vmatpush.msra.mxu1 %v5899_v54 }
 0x64e   :  { %2168 = vmatpush.msra.mxu2 %v5900_v42  ;;  %2188 = vmatpush.msra.mxu3 %v5901_v52 }
 0x64f   :  { %2129 = vmatpush.msra.mxu0 %v5902_v11  ;;  %2149 = vmatpush.msra.mxu1 %v5903_v57 }
 0x650   :  { %2169 = vmatpush.msra.mxu2 %v5904_v36  ;;  %2189 = vmatpush.msra.mxu3 %v5905_v59 }
 0x651   :  { %2130 = vmatpush.msra.mxu0 %v5906_v41  ;;  %2150 = vmatpush.msra.mxu1 %v5907_v60 }
 0x652   :  { %2170 = vmatpush.msra.mxu2 %v5908_v51  ;;  %2190 = vmatpush.msra.mxu3 %v5909_v56 }
 0x653   :  { %2131 = vmatpush.msra.mxu0 %v5910_v38  ;;  %2151 = vmatpush.msra.mxu1 %v5911_v13 }
 0x654   :  { %2171 = vmatpush.msra.mxu2 %v5912_v58  ;;  %2191 = vmatpush.msra.mxu3 %v5913_v14 }
 0x655   :  { %2132 = vmatpush.msra.mxu0 %v5914_v10  ;;  %2152 = vmatpush.msra.mxu1 %v5915_v4 }
 0x656   :  { %2172 = vmatpush.msra.mxu2 %v5916_v17  ;;  %2192 = vmatpush.msra.mxu3 %v5917_v8 }
 0x657   :  { %2133 = vmatpush.msra.mxu0 %v5918_v7  ;;  %2153 = vmatpush.msra.mxu1 %v5919_v16 }
 0x658   :  { %2173 = vmatpush.msra.mxu2 %v5920_v53  ;;  %2193 = vmatpush.msra.mxu3 %v5921_v20 }
 0x6b4   :  { %v1841_v25 = vpop.f32.mrf.mxu0  ;;  %v1861_v27 = vpop.f32.mrf.mxu1 }
 0x6b5   :  { %v1904_v28 = vadd.f32 %v1841_v25, %v1465_v62  ;;  %v1905_v31 = vadd.f32 %v1861_v27, %v1506_v24  ;;  %v4940_v24 = vld [vmem:[#allocation7 + $0x3f0] sm:$0xff]  ;;  %v4943_v25 = vld [vmem:[#allocation7 + $0x3f8] sm:$0xff]  ;;  %v4946_v27 = vld [vmem:[#allocation7 + $0x3c0] sm:$0xff] }
 0x6b7   :  { %v2932_v43 = vmul.f32 -1.442695, %v1904_v28  ;;  %v2933_v32 = vmul.f32 -1.442695, %v1905_v31  ;;  %v4949_v28 = vld [vmem:[#allocation7 + $0x3c8] sm:$0xff]  ;;  %v4952_v31 = vld [vmem:[#allocation7 + $0x3d0] sm:$0xff] }
 0x6b9   :  { %3110 = vpow2.f32 %v2932_v43  ;;  %v4955_v43 = vld [vmem:[#allocation7 + $0x3d8] sm:$0xff] }
 0x6ba   :  { %3112 = vpow2.f32 %v2933_v32  ;;  %v4958_v32 = vld [vmem:[#allocation7 + $0x3a0] sm:$0xff] }
 0x6bb   :  { %v1901_v3 = vpop.f32.mrf.mxu3  ;;  %v1881_v34 = vpop.f32.mrf.mxu2 }
 0x6bc   :  { %v1907_v55 = vadd.f32 %v1901_v3, %v1588_v18  ;;  %v1906_v30 = vadd.f32 %v1881_v34, %v1547_v23  ;;  %v4964_v18 = vld [vmem:[#allocation7 + $0x3b0] sm:$0xff]  ;;  %v4967_v3 = vld [vmem:[#allocation7 + $0x3b8] sm:$0xff]  ;;  %v4997_v23 = vld [vmem:[#allocation7 + $0x348] sm:$0xff] }
 0x6bd   :  { %v4988_v34 = vld [vmem:[#allocation7 + $0x370] sm:$0xff] }
 0x6be   :  { %v2934_v5 = vmul.f32 -1.442695, %v1907_v55  ;;  %v4970_v55 = vld [vmem:[#allocation7 + $0x380] sm:$0xff] }
 0x6bf   :  { %v3111_v33 = vpop.eup %3110 }
 0x6c0   :  { %v3113_v61 = vpop.eup %3112  ;;  %v1911_v46 = vadd.f32 1.0, %v3111_v33  ;;  %3114 = vpow2.f32 %v2934_v5  ;;  %v4973_v5 = vld [vmem:[#allocation7 + $0x388] sm:$0xff]  ;;  %v4976_v33 = vld [vmem:[#allocation7 + $0x390] sm:$0xff] }
 0x6c1   :  { %v1930_v15 = vadd.f32 1.0, %v3113_v61  ;;  %v4979_v61 = vld [vmem:[#allocation7 + $0x398] sm:$0xff] }
 0x6c2   :  { %3116 = vrcp.f32 %v1911_v46  ;;  %v1923_v0 = vand.u32 2147483648, %v1911_v46  ;;  %v1921_v40 = vand.u32 2147483647, %v1911_v46  ;;  %vm1917_vm14 = vweird.f32 %v1911_v46 }
 0x6c3   :  { %3118 = vrcp.f32 %v1930_v15  ;;  %v1942_v29 = vand.u32 2147483648, %v1930_v15  ;;  %v1940_v54 = vand.u32 2147483647, %v1930_v15  ;;  %vm1936_vm15 = vweird.f32 %v1930_v15 }
 0x6c4   :  { %v1924_v11 = vor.u32 1.1754944e-38, %v1923_v0  ;;  %vm1922_vm2 = vcmp.eq.f32.partialorder %v1921_v40, 8.507059e+37  ;;  %v5024_v0 = vld [vmem:[#allocation7 + $0x310] sm:$0xff]  ;;  %v5033_v40 = vld [vmem:[#allocation7 + $0x2e8] sm:$0xff] }
 0x6c5   :  { %v1943_v59 = vor.u32 1.1754944e-38, %v1942_v29  ;;  %vm1941_vm3 = vcmp.eq.f32.partialorder %v1940_v54, 8.507059e+37  ;;  %v5027_v29 = vld [vmem:[#allocation7 + $0x318] sm:$0xff] }
 0x6c6   :  { %v3115_v26 = vpop.eup %3114  ;;  %v5039_v54 = vld [vmem:[#allocation7 + $0x2f8] sm:$0xff] }
 0x6c7   :  { %v1950_v39 = vadd.f32 1.0, %v3115_v26  ;;  %v4991_v26 = vld [vmem:[#allocation7 + $0x378] sm:$0xff] }
 0x6c8   :  { %v3117_v47 = vpop.eup %3116 }
 0x6c9   :  { %v3119_v35 = vpop.eup %3118  ;;  %v1913_v45 = vmul.f32 %v3117_v47, %v1911_v46  ;;  %3120 = vrcp.f32 %v1950_v39  ;;  %vm1918_vm12 = vweird.f32 %v3117_v47  ;;  %v1962_v8 = vand.u32 2147483648, %v1950_v39  ;;  %v4982_v46 = vld [vmem:[#allocation7 + $0x360] sm:$0xff] }
 0x6ca   :  { %v1932_v12 = vmul.f32 %v3119_v35, %v1930_v15  ;;  %3122 = vtanh.f32 %v1906_v30  ;;  %vm1937_vm13 = vweird.f32 %v3119_v35  ;;  %vm1919_vm0 = vmor %vm1917_vm14, %vm1918_vm12  ;;  %vm1956_vm5 = vweird.f32 %v1950_v39  ;;  %v4985_v15 = vld [vmem:[#allocation7 + $0x368] sm:$0xff]  ;;  %v5006_v30 = vld [vmem:[#allocation7 + $0x320] sm:$0xff] }
 0x6cb   :  { %v1914_v19 = vsub.f32 1.0, %v1913_v45  ;;  %vm1938_vm1 = vmor %vm1936_vm15, %vm1937_vm13  ;;  %v1960_v7 = vand.u32 2147483647, %v1950_v39  ;;  %v1963_v53 = vor.u32 1.1754944e-38, %v1962_v8  ;;  %v5012_v45 = vld [vmem:[#allocation7 + $0x330] sm:$0xff]  ;;  %v5090_v8 = vld [vmem:[#allocation7 + $0x240] sm:$0xff] }
 0x6cc   :  { %v1933_v48 = vsub.f32 1.0, %v1932_v12  ;;  %v5015_v12 = vld [vmem:[#allocation7 + $0x338] sm:$0xff]  ;;  %5944 = vst [vmem:[#allocation36_spill] sm:$0xff] %v5090_v8 }
 0x6cd   :  { %v1915_v37 = vmul.f32 %v3117_v47, %v1914_v19  ;;  %vm1961_vm7 = vcmp.eq.f32.partialorder %v1960_v7, 8.507059e+37  ;;  %v5018_v19 = vld [vmem:[#allocation7 + $0x300] sm:$0xff]  ;;  %v5093_v7 = vld [vmem:[#allocation7 + $0x248] sm:$0xff] }
 0x6ce   :  { %v1934_v49 = vmul.f32 %v3119_v35, %v1933_v48  ;;  %v5021_v48 = vld [vmem:[#allocation7 + $0x308] sm:$0xff]  ;;  %5945 = vst [vmem:[#allocation45_spill] sm:$0xff] %v5093_v7 }
 0x6cf   :  { %v3121_v42 = vpop.eup %3120  ;;  %v1916_v52 = vadd.f32 %v3117_v47, %v1915_v37  ;;  %v5030_v37 = vld [vmem:[#allocation7 + $0x2e0] sm:$0xff] }
 0x6d0   :  { %v1935_v57 = vadd.f32 %v3119_v35, %v1934_v49  ;;  %v1952_v36 = vmul.f32 %v3121_v42, %v1950_v39  ;;  %v3123_v60 = vpop.eup %3122  ;;  %vm1957_vm4 = vweird.f32 %v3121_v42  ;;  %v5000_v39 = vld [vmem:[#allocation7 + $0x350] sm:$0xff] }
 0x6d1   :  { %v1920_v41 = vsel %vm1919_vm0, %v3117_v47, %v1916_v52  ;;  %vm1958_vm6 = vmor %vm1956_vm5, %vm1957_vm4  ;;  %v5003_v47 = vld [vmem:[#allocation7 + $0x358] sm:$0xff]  ;;  %v5036_v49 = vld [vmem:[#allocation7 + $0x2f0] sm:$0xff] }
 0x6d2   :  { %v1925_v51 = vsel %vm1922_vm2, %v1924_v11, %v1920_v41  ;;  %v1939_v56 = vsel %vm1938_vm1, %v3119_v35, %v1935_v57  ;;  %v1953_v38 = vsub.f32 1.0, %v1952_v36  ;;  %v5009_v35 = vld [vmem:[#allocation7 + $0x328] sm:$0xff]  ;;  %v5048_v11 = vld [vmem:[#allocation7 + $0x2d0] sm:$0xff]  ;;  %v5051_v57 = vld [vmem:[#allocation7 + $0x2d8] sm:$0xff] }
 0x6d3   :  { %v1944_v13 = vsel %vm1941_vm3, %v1943_v59, %v1939_v56  ;;  %v1967_v58 = vmul.f32 %v3123_v60, %v1925_v51  ;;  %v5045_v52 = vld [vmem:[#allocation7 + $0x2c8] sm:$0xff]  ;;  %5930 = vst [vmem:[#allocation43_spill] sm:$0xff] %v5048_v11  ;;  %v5054_v36 = vld [vmem:[#allocation7 + $0x2a0] sm:$0xff]  ;;  %v5060_v41 = vld [vmem:[#allocation7 + $0x2b0] sm:$0xff] }
 0x6d4   :  { %v1966_v14 = vmul.f32 %v1944_v13, %v4855_v2  ;;  %v1954_v10 = vmul.f32 %v3121_v42, %v1953_v38  ;;  %v4934_v2 = vld [vmem:[#allocation7 + $0x3e0] sm:$0xff]  ;;  %5931 = vst [vmem:[#allocation25_spill] sm:$0xff] %v5051_v57  ;;  %v5057_v59 = vld [vmem:[#allocation7 + $0x2a8] sm:$0xff]  ;;  %v5063_v60 = vld [vmem:[#allocation7 + $0x2b8] sm:$0xff] }
 0x6d5   :  { %5932 = vst [vmem:[#allocation26_spill] sm:$0xff] %v5054_v36  ;;  %v5066_v51 = vld [vmem:[#allocation7 + $0x280] sm:$0xff]  ;;  %v5069_v56 = vld [vmem:[#allocation7 + $0x288] sm:$0xff]  ;;  %v5072_v38 = vld [vmem:[#allocation7 + $0x290] sm:$0xff] }
 0x6d6   :  { %v4931_v4 = vadd.f32 %v1967_v58, %v1966_v14  ;;  %v1955_v17 = vadd.f32 %v3121_v42, %v1954_v10  ;;  %5933 = vst [vmem:[#allocation42_spill] sm:$0xff] %v5057_v59  ;;  %v5075_v13 = vld [vmem:[#allocation7 + $0x298] sm:$0xff]  ;;  %v5078_v58 = vld [vmem:[#allocation7 + $0x260] sm:$0xff]  ;;  %v5081_v14 = vld [vmem:[#allocation7 + $0x268] sm:$0xff] }
 0x6d7   :  { %5934 = vst [vmem:[#allocation31_spill] sm:$0xff] %v5060_v41  ;;  %v5084_v10 = vld [vmem:[#allocation7 + $0x270] sm:$0xff] }
 0x6d8   :  { %3124 = vtanh.f32 %v4931_v4  ;;  %v1959_v16 = vsel %vm1958_vm6, %v3121_v42, %v1955_v17  ;;  %v5042_v42 = vld [vmem:[#allocation7 + $0x2c0] sm:$0xff]  ;;  %5935 = vst [vmem:[#allocation27_spill] sm:$0xff] %v5063_v60  ;;  %v5087_v17 = vld [vmem:[#allocation7 + $0x278] sm:$0xff] }
 0x6d9   :  { %v1964_v9 = vsel %vm1961_vm7, %v1963_v53, %v1959_v16  ;;  %5936 = vst [vmem:[#allocation28_spill] sm:$0xff] %v5066_v51  ;;  %v5096_v16 = vld [vmem:[#allocation7 + $0x250] sm:$0xff]  ;;  %v5099_v53 = vld [vmem:[#allocation7 + $0x258] sm:$0xff] }
 0x6da   :  { %5937 = vst [vmem:[#allocation29_spill] sm:$0xff] %v5069_v56 }
 0x6db   :  { %5938 = vst [vmem:[#allocation35_spill] sm:$0xff] %v5072_v38 }
 0x6dc   :  { %5939 = vst [vmem:[#allocation30_spill] sm:$0xff] %v5075_v13 }
 0x6dd   :  { %5940 = vst [vmem:[#allocation32_spill] sm:$0xff] %v5078_v58 }
 0x6de   :  { %v3125_v20 = vpop.eup %3124  ;;  %5941 = vst [vmem:[#allocation44_spill] sm:$0xff] %v5081_v14 }
 0x6df   :  { %v1970_v62 = vmul.f32 %v3125_v20, %v1964_v9  ;;  %5942 = vst [vmem:[#allocation37_spill] sm:$0xff] %v5084_v10  ;;  %v5102_v20 = vld [vmem:[#allocation7 + $0x220] sm:$0xff]  ;;  %v5105_v9 = vld [vmem:[#allocation7 + $0x228] sm:$0xff] }
 0x6e0   :  { %5943 = vst [vmem:[#allocation33_spill] sm:$0xff] %v5087_v17 }
 0x6e1   :  { %1987 = vmatmul.f32.vlgmr.msrb.gmra.mxu0 %v1970_v62  ;;  %2007 = vmatmul.f32.vlgmr.msrb.gmra.mxu1 %v1970_v62  ;;  %5946 = vst [vmem:[#allocation41_spill] sm:$0xff] %v5096_v16 }
 0x6e2   :  { %2027 = vmatmul.f32.vlgmr.msrb.gmra.mxu2 %v1970_v62  ;;  %2047 = vmatmul.f32.vlgmr.msrb.gmra.mxu3 %v1970_v62  ;;  %5947 = vst [vmem:[#allocation39_spill] sm:$0xff] %v5099_v53  ;;  %v5108_v62 = vld [vmem:[#allocation7 + $0x230] sm:$0xff] }
 0x6e3   :  { %2265 = vmatpush.msrb.mxu0 %v4934_v2  ;;  %2285 = vmatpush.msrb.mxu1 %v4937_v22  ;;  %5948 = vst [vmem:[#allocation40_spill] sm:$0xff] %v5102_v20 }
 0x6e4   :  { %2305 = vmatpush.msrb.mxu2 %v4940_v24  ;;  %2325 = vmatpush.msrb.mxu3 %v4943_v25  ;;  %5949 = vst [vmem:[#allocation46_spill] sm:$0xff] %v5105_v9 }
 0x6e5   :  { %2266 = vmatpush.msrb.mxu0 %v4946_v27  ;;  %2286 = vmatpush.msrb.mxu1 %v4949_v28  ;;  %5950 = vst [vmem:[#allocation34_spill] sm:$0xff] %v5108_v62 }
 0x6e6   :  { %2306 = vmatpush.msrb.mxu2 %v4952_v31  ;;  %2326 = vmatpush.msrb.mxu3 %v4955_v43 }
 0x6e7   :  { %2267 = vmatpush.msrb.mxu0 %v4958_v32  ;;  %2287 = vmatpush.msrb.mxu1 %v4961_v44 }
 0x6e8   :  { %2307 = vmatpush.msrb.mxu2 %v4964_v18  ;;  %2327 = vmatpush.msrb.mxu3 %v4967_v3 }
 0x6e9   :  { %2268 = vmatpush.msrb.mxu0 %v4970_v55  ;;  %2288 = vmatpush.msrb.mxu1 %v4973_v5 }
 0x6ea   :  { %2308 = vmatpush.msrb.mxu2 %v4976_v33  ;;  %2328 = vmatpush.msrb.mxu3 %v4979_v61 }
 0x6eb   :  { %2269 = vmatpush.msrb.mxu0 %v4982_v46  ;;  %2289 = vmatpush.msrb.mxu1 %v4985_v15 }
 0x6ec   :  { %2309 = vmatpush.msrb.mxu2 %v4988_v34  ;;  %2329 = vmatpush.msrb.mxu3 %v4991_v26 }
 0x6ed   :  { %2270 = vmatpush.msrb.mxu0 %v4994_v50  ;;  %2290 = vmatpush.msrb.mxu1 %v4997_v23 }
 0x6ee   :  { %2310 = vmatpush.msrb.mxu2 %v5000_v39  ;;  %2330 = vmatpush.msrb.mxu3 %v5003_v47 }
 0x6ef   :  { %2271 = vmatpush.msrb.mxu0 %v5006_v30  ;;  %2291 = vmatpush.msrb.mxu1 %v5009_v35 }
 0x6f0   :  { %2311 = vmatpush.msrb.mxu2 %v5012_v45  ;;  %2331 = vmatpush.msrb.mxu3 %v5015_v12 }
 0x6f1   :  { %2272 = vmatpush.msrb.mxu0 %v5018_v19  ;;  %2292 = vmatpush.msrb.mxu1 %v5021_v48 }
 0x6f2   :  { %2312 = vmatpush.msrb.mxu2 %v5024_v0  ;;  %2332 = vmatpush.msrb.mxu3 %v5027_v29 }
 0x6f3   :  { %2273 = vmatpush.msrb.mxu0 %v5030_v37  ;;  %2293 = vmatpush.msrb.mxu1 %v5033_v40 }
 0x6f4   :  { %2313 = vmatpush.msrb.mxu2 %v5036_v49  ;;  %2333 = vmatpush.msrb.mxu3 %v5039_v54 }
 0x6f5   :  { %2274 = vmatpush.msrb.mxu0 %v5042_v42  ;;  %2294 = vmatpush.msrb.mxu1 %v5045_v52 }
 0x6f6   :  { %2314 = vmatpush.msrb.mxu2 %v5048_v11  ;;  %2334 = vmatpush.msrb.mxu3 %v5051_v57 }
 0x6f7   :  { %2275 = vmatpush.msrb.mxu0 %v5054_v36  ;;  %2295 = vmatpush.msrb.mxu1 %v5057_v59 }
 0x6f8   :  { %2315 = vmatpush.msrb.mxu2 %v5060_v41  ;;  %2335 = vmatpush.msrb.mxu3 %v5063_v60 }
 0x6f9   :  { %2276 = vmatpush.msrb.mxu0 %v5066_v51  ;;  %2296 = vmatpush.msrb.mxu1 %v5069_v56 }
 0x6fa   :  { %2316 = vmatpush.msrb.mxu2 %v5072_v38  ;;  %2336 = vmatpush.msrb.mxu3 %v5075_v13  ;;  %v5958_v38 = vld [vmem:[#allocation52_spill] sm:$0xff] }
 0x6fb   :  { %2277 = vmatpush.msrb.mxu0 %v5078_v58  ;;  %2297 = vmatpush.msrb.mxu1 %v5081_v14 }
 0x6fc   :  { %2317 = vmatpush.msrb.mxu2 %v5084_v10  ;;  %2337 = vmatpush.msrb.mxu3 %v5087_v17 }
 0x6fd   :  { %2278 = vmatpush.msrb.mxu0 %v5090_v8  ;;  %2298 = vmatpush.msrb.mxu1 %v5093_v7  ;;  %v5111_v7 = vld [vmem:[#allocation7 + $0x238] sm:$0xff] }
 0x6fe   :  { %2318 = vmatpush.msrb.mxu2 %v5096_v16  ;;  %2338 = vmatpush.msrb.mxu3 %v5099_v53  ;;  %5951 = vst [vmem:[#allocation47_spill] sm:$0xff] %v5111_v7  ;;  %v5114_v16 = vld [vmem:[#allocation7 + $0x200] sm:$0xff]  ;;  %v5117_v53 = vld [vmem:[#allocation7 + $0x208] sm:$0xff] }
 0x6ff   :  { %2279 = vmatpush.msrb.mxu0 %v5102_v20  ;;  %2299 = vmatpush.msrb.mxu1 %v5105_v9  ;;  %5952 = vst [vmem:[#allocation48_spill] sm:$0xff] %v5114_v16  ;;  %v5120_v20 = vld [vmem:[#allocation7 + $0x210] sm:$0xff]  ;;  %v5123_v9 = vld [vmem:[#allocation7 + $0x218] sm:$0xff] }
 0x700   :  { %2319 = vmatpush.msrb.mxu2 %v5108_v62  ;;  %2339 = vmatpush.msrb.mxu3 %v5111_v7  ;;  %5953 = vst [vmem:[#allocation20_spill] sm:$0xff] %v5117_v53  ;;  %v5956_v62 = vld [vmem:[#allocation38_spill] sm:$0xff]  ;;  %v5957_v7 = vld [vmem:[#allocation24_spill] sm:$0xff] }
 0x701   :  { %2280 = vmatpush.msrb.mxu0 %v5114_v16  ;;  %2300 = vmatpush.msrb.mxu1 %v5117_v53  ;;  %5954 = vst [vmem:[#allocation50_spill] sm:$0xff] %v5120_v20  ;;  %v1468_v8 = vadd.f32 %v5956_v62, %v5922_v6  ;;  %v1509_v17 = vadd.f32 %v5957_v7, %v5924_v21 }
 0x702   :  { %2320 = vmatpush.msrb.mxu2 %v5120_v20  ;;  %5955 = vst [vmem:[#allocation49_spill] sm:$0xff] %v5123_v9  ;;  %2340 = vmatpush.msrb.mxu3 %v5123_v9  ;;  %v1591_v20 = vadd.f32 %v5958_v38, %v5926_v1 }
 0x75e   :  { %v1988_v10 = vpop.f32.mrf.mxu0  ;;  %v2008_v16 = vpop.f32.mrf.mxu1 }
 0x75f   :  { %v2051_v14 = vadd.f32 %v1988_v10, %v1468_v8  ;;  %v2052_v58 = vadd.f32 %v2008_v16, %v1509_v17 }
 0x761   :  { %v2935_v13 = vmul.f32 -1.442695, %v2051_v14  ;;  %v2936_v53 = vmul.f32 -1.442695, %v2052_v58  ;;  %v5959_v14 = vld [vmem:[#allocation55_spill] sm:$0xff] }
 0x762   :  { %v1550_v58 = vadd.f32 %v5959_v14, %v5928_v63 }
 0x763   :  { %3126 = vpow2.f32 %v2935_v13 }
 0x764   :  { %3128 = vpow2.f32 %v2936_v53 }
 0x765   :  { %v2048_v56 = vpop.f32.mrf.mxu3  ;;  %v2028_v7 = vpop.f32.mrf.mxu2 }
 0x766   :  { %v2054_v51 = vadd.f32 %v2048_v56, %v1591_v20  ;;  %v2053_v8 = vadd.f32 %v2028_v7, %v1550_v58 }
 0x768   :  { %v2937_v9 = vmul.f32 -1.442695, %v2054_v51 }
 0x769   :  { %v3127_v60 = vpop.eup %3126 }
 0x76a   :  { %v3129_v41 = vpop.eup %3128  ;;  %v2058_v62 = vadd.f32 1.0, %v3127_v60  ;;  %3130 = vpow2.f32 %v2937_v9 }
 0x76b   :  { %v2077_v6 = vadd.f32 1.0, %v3129_v41 }
 0x76c   :  { %3132 = vrcp.f32 %v2058_v62  ;;  %v2070_v20 = vand.u32 2147483648, %v2058_v62  ;;  %v2068_v9 = vand.u32 2147483647, %v2058_v62  ;;  %vm2064_vm10 = vweird.f32 %v2058_v62 }
 0x76d   :  { %3134 = vrcp.f32 %v2077_v6  ;;  %v2089_v60 = vand.u32 2147483648, %v2077_v6  ;;  %v2087_v21 = vand.u32 2147483647, %v2077_v6  ;;  %vm2083_vm11 = vweird.f32 %v2077_v6 }
 0x76e   :  { %v2071_v7 = vor.u32 1.1754944e-38, %v2070_v20  ;;  %vm2069_vm14 = vcmp.eq.f32.partialorder %v2068_v9, 8.507059e+37 }
 0x76f   :  { %vm2088_vm15 = vcmp.eq.f32.partialorder %v2087_v21, 8.507059e+37 }
 0x770   :  { %v3131_v10 = vpop.eup %3130 }
 0x771   :  { %v2097_v13 = vadd.f32 1.0, %v3131_v10 }
 0x772   :  { %v3133_v17 = vpop.eup %3132 }
 0x773   :  { %v3135_v38 = vpop.eup %3134  ;;  %v2060_v16 = vmul.f32 %v3133_v17, %v2058_v62  ;;  %3136 = vrcp.f32 %v2097_v13  ;;  %vm2065_vm8 = vweird.f32 %v3133_v17  ;;  %vm2103_vm1 = vweird.f32 %v2097_v13 }
 0x774   :  { %v2079_v56 = vmul.f32 %v3135_v38, %v2077_v6  ;;  %3138 = vtanh.f32 %v2053_v8  ;;  %vm2084_vm9 = vweird.f32 %v3135_v38  ;;  %vm2066_vm12 = vmor %vm2064_vm10, %vm2065_vm8 }
 0x775   :  { %v2061_v51 = vsub.f32 1.0, %v2060_v16  ;;  %vm2085_vm13 = vmor %vm2083_vm11, %vm2084_vm9  ;;  %v2090_v16 = vor.u32 1.1754944e-38, %v2089_v60 }
 0x776   :  { %v2080_v53 = vsub.f32 1.0, %v2079_v56 }
 0x777   :  { %v2062_v41 = vmul.f32 %v3133_v17, %v2061_v51 }
 0x778   :  { %v2081_v1 = vmul.f32 %v3135_v38, %v2080_v53 }
 0x779   :  { %v3137_v59 = vpop.eup %3136  ;;  %v2063_v14 = vadd.f32 %v3133_v17, %v2062_v41 }
 0x77a   :  { %v2082_v10 = vadd.f32 %v3135_v38, %v2081_v1  ;;  %v2099_v58 = vmul.f32 %v3137_v59, %v2097_v13  ;;  %v3139_v8 = vpop.eup %3138  ;;  %vm2104_vm0 = vweird.f32 %v3137_v59  ;;  %v2109_v1 = vand.u32 2147483648, %v2097_v13 }
 0x77b   :  { %v2067_v56 = vsel %vm2066_vm12, %v3133_v17, %v2063_v14  ;;  %v2107_v17 = vand.u32 2147483647, %v2097_v13  ;;  %vm2105_vm2 = vmor %vm2103_vm1, %vm2104_vm0  ;;  %v5966_v13 = vld [vmem:[#allocation28_spill] sm:$0xff]  ;;  %v5967_v14 = vld [vmem:[#allocation29_spill] sm:$0xff] }
 0x77c   :  { %v2072_v63 = vsel %vm2069_vm14, %v2071_v7, %v2067_v56  ;;  %v2086_v51 = vsel %vm2085_vm13, %v3135_v38, %v2082_v10  ;;  %v2100_v36 = vsub.f32 1.0, %v2099_v58  ;;  %v2110_v60 = vor.u32 1.1754944e-38, %v2109_v1  ;;  %v5968_v7 = vld [vmem:[#allocation35_spill] sm:$0xff]  ;;  %v5969_v10 = vld [vmem:[#allocation30_spill] sm:$0xff]  ;;  %v5970_v58 = vld [vmem:[#allocation32_spill] sm:$0xff] }
 0x77d   :  { %v2091_v53 = vsel %vm2088_vm15, %v2090_v16, %v2086_v51  ;;  %v2114_v57 = vmul.f32 %v3139_v8, %v2072_v63  ;;  %vm2108_vm3 = vcmp.eq.f32.partialorder %v2107_v17, 8.507059e+37  ;;  %v5960_v63 = vld [vmem:[#allocation43_spill] sm:$0xff]  ;;  %v5971_v16 = vld [vmem:[#allocation44_spill] sm:$0xff]  ;;  %v5972_v56 = vld [vmem:[#allocation37_spill] sm:$0xff] }
 0x77e   :  { %v2113_v11 = vmul.f32 %v2091_v53, %v4931_v4  ;;  %v2101_v41 = vmul.f32 %v3137_v59, %v2100_v36  ;;  %v5961_v4 = vld [vmem:[#allocation25_spill] sm:$0xff]  ;;  %v5964_v36 = vld [vmem:[#allocation31_spill] sm:$0xff]  ;;  %v5974_v51 = vld [vmem:[#allocation36_spill] sm:$0xff] }
 0x77f   :  { %v5973_v8 = vld [vmem:[#allocation33_spill] sm:$0xff]  ;;  %v5978_v1 = vld [vmem:[#allocation40_spill] sm:$0xff]  ;;  %v5979_v17 = vld [vmem:[#allocation46_spill] sm:$0xff] }
 0x780   :  { %v5135_v62 = vadd.f32 %v2114_v57, %v2113_v11  ;;  %v2102_v6 = vadd.f32 %v3137_v59, %v2101_v41  ;;  %v5962_v11 = vld [vmem:[#allocation26_spill] sm:$0xff]  ;;  %v5975_v53 = vld [vmem:[#allocation45_spill] sm:$0xff] }
 0x781   :  { %v5963_v57 = vld [vmem:[#allocation42_spill] sm:$0xff]  ;;  %v5976_v41 = vld [vmem:[#allocation41_spill] sm:$0xff] }
 0x782   :  { %3140 = vtanh.f32 %v5135_v62  ;;  %v2106_v20 = vsel %vm2105_vm2, %v3137_v59, %v2102_v6  ;;  %v5965_v59 = vld [vmem:[#allocation27_spill] sm:$0xff] }
 0x783   :  { %v2111_v38 = vsel %vm2108_vm3, %v2110_v60, %v2106_v20  ;;  %v5977_v6 = vld [vmem:[#allocation39_spill] sm:$0xff]  ;;  %v5980_v20 = vld [vmem:[#allocation34_spill] sm:$0xff] }
 0x784   :  { %v5981_v60 = vld [vmem:[#allocation47_spill] sm:$0xff] }
 0x788   :  { %v3141_v21 = vpop.eup %3140 }
 0x789   :  { %v2117_v9 = vmul.f32 %v3141_v21, %v2111_v38  ;;  %v5982_v21 = vld [vmem:[#allocation48_spill] sm:$0xff] }
 0x78a   :  { %v5983_v38 = vld [vmem:[#allocation20_spill] sm:$0xff] }
 0x78b   :  { %2134 = vmatmul.f32.vlgmr.msra.gmra.mxu0 %v2117_v9  ;;  %2154 = vmatmul.f32.vlgmr.msra.gmra.mxu1 %v2117_v9 }
 0x78c   :  { %2174 = vmatmul.f32.vlgmr.msra.gmra.mxu2 %v2117_v9  ;;  %2194 = vmatmul.f32.vlgmr.msra.gmra.mxu3 %v2117_v9  ;;  %v5984_v9 = vld [vmem:[#allocation50_spill] sm:$0xff] }
 0x78d   :  { %2412 = vmatpush.msra.mxu0 %v4934_v2  ;;  %2432 = vmatpush.msra.mxu1 %v4937_v22 }
 0x78e   :  { %2452 = vmatpush.msra.mxu2 %v4940_v24  ;;  %2472 = vmatpush.msra.mxu3 %v4943_v25 }
 0x78f   :  { %2413 = vmatpush.msra.mxu0 %v4946_v27  ;;  %2433 = vmatpush.msra.mxu1 %v4949_v28 }
 0x790   :  { %2453 = vmatpush.msra.mxu2 %v4952_v31  ;;  %2473 = vmatpush.msra.mxu3 %v4955_v43 }
 0x791   :  { %2414 = vmatpush.msra.mxu0 %v4958_v32  ;;  %2434 = vmatpush.msra.mxu1 %v4961_v44 }
 0x792   :  { %2454 = vmatpush.msra.mxu2 %v4964_v18  ;;  %2474 = vmatpush.msra.mxu3 %v4967_v3 }
 0x793   :  { %2415 = vmatpush.msra.mxu0 %v4970_v55  ;;  %2435 = vmatpush.msra.mxu1 %v4973_v5 }
 0x794   :  { %2455 = vmatpush.msra.mxu2 %v4976_v33  ;;  %2475 = vmatpush.msra.mxu3 %v4979_v61 }
 0x795   :  { %2416 = vmatpush.msra.mxu0 %v4982_v46  ;;  %2436 = vmatpush.msra.mxu1 %v4985_v15 }
 0x796   :  { %2456 = vmatpush.msra.mxu2 %v4988_v34  ;;  %2476 = vmatpush.msra.mxu3 %v4991_v26 }
 0x797   :  { %2417 = vmatpush.msra.mxu0 %v4994_v50  ;;  %2437 = vmatpush.msra.mxu1 %v4997_v23 }
 0x798   :  { %2457 = vmatpush.msra.mxu2 %v5000_v39  ;;  %2477 = vmatpush.msra.mxu3 %v5003_v47 }
 0x799   :  { %2418 = vmatpush.msra.mxu0 %v5006_v30  ;;  %2438 = vmatpush.msra.mxu1 %v5009_v35 }
 0x79a   :  { %2458 = vmatpush.msra.mxu2 %v5012_v45  ;;  %2478 = vmatpush.msra.mxu3 %v5015_v12 }
 0x79b   :  { %2419 = vmatpush.msra.mxu0 %v5018_v19  ;;  %2439 = vmatpush.msra.mxu1 %v5021_v48 }
 0x79c   :  { %2459 = vmatpush.msra.mxu2 %v5024_v0  ;;  %2479 = vmatpush.msra.mxu3 %v5027_v29 }
 0x79d   :  { %2420 = vmatpush.msra.mxu0 %v5030_v37  ;;  %2440 = vmatpush.msra.mxu1 %v5033_v40 }
 0x79e   :  { %2460 = vmatpush.msra.mxu2 %v5036_v49  ;;  %2480 = vmatpush.msra.mxu3 %v5039_v54 }
 0x79f   :  { %2421 = vmatpush.msra.mxu0 %v5042_v42  ;;  %2441 = vmatpush.msra.mxu1 %v5045_v52 }
 0x7a0   :  { %2461 = vmatpush.msra.mxu2 %v5960_v63  ;;  %2481 = vmatpush.msra.mxu3 %v5961_v4 }
 0x7a1   :  { %2422 = vmatpush.msra.mxu0 %v5962_v11  ;;  %2442 = vmatpush.msra.mxu1 %v5963_v57 }
 0x7a2   :  { %2462 = vmatpush.msra.mxu2 %v5964_v36  ;;  %2482 = vmatpush.msra.mxu3 %v5965_v59 }
 0x7a3   :  { %2423 = vmatpush.msra.mxu0 %v5966_v13  ;;  %2443 = vmatpush.msra.mxu1 %v5967_v14 }
 0x7a4   :  { %2463 = vmatpush.msra.mxu2 %v5968_v7  ;;  %2483 = vmatpush.msra.mxu3 %v5969_v10  ;;  %v5991_v7 = vld [vmem:[#allocation56_spill] sm:$0xff] }
 0x7a5   :  { %2424 = vmatpush.msra.mxu0 %v5970_v58  ;;  %2444 = vmatpush.msra.mxu1 %v5971_v16 }
 0x7a6   :  { %2464 = vmatpush.msra.mxu2 %v5972_v56  ;;  %2484 = vmatpush.msra.mxu3 %v5973_v8  ;;  %v5989_v56 = vld [vmem:[#allocation54_spill] sm:$0xff] }
 0x7a7   :  { %2425 = vmatpush.msra.mxu0 %v5974_v51  ;;  %2445 = vmatpush.msra.mxu1 %v5975_v53  ;;  %v5985_v51 = vld [vmem:[#allocation49_spill] sm:$0xff]  ;;  %v5986_v53 = vld [vmem:[#allocation71_spill] sm:$0xff] }
 0x7a8   :  { %2465 = vmatpush.msra.mxu2 %v5976_v41  ;;  %2485 = vmatpush.msra.mxu3 %v5977_v6  ;;  %v5987_v41 = vld [vmem:[#allocation53_spill] sm:$0xff]  ;;  %v5988_v6 = vld [vmem:[#allocation72_spill] sm:$0xff] }
 0x7a9   :  { %2426 = vmatpush.msra.mxu0 %v5978_v1  ;;  %2446 = vmatpush.msra.mxu1 %v5979_v17  ;;  %v1471_v8 = vadd.f32 %v5987_v41, %v5986_v53  ;;  %v1512_v1 = vadd.f32 %v5989_v56, %v5988_v6 }
 0x7aa   :  { %2466 = vmatpush.msra.mxu2 %v5980_v20  ;;  %2486 = vmatpush.msra.mxu3 %v5981_v60 }
 0x7ab   :  { %2427 = vmatpush.msra.mxu0 %v5982_v21  ;;  %2447 = vmatpush.msra.mxu1 %v5983_v38  ;;  %v5990_v21 = vld [vmem:[#allocation75_spill] sm:$0xff] }
 0x7ac   :  { %2467 = vmatpush.msra.mxu2 %v5984_v9  ;;  %2487 = vmatpush.msra.mxu3 %v5985_v51  ;;  %v1594_v38 = vadd.f32 %v5991_v7, %v5990_v21 }
 0x808   :  { %v2135_v16 = vpop.f32.mrf.mxu0  ;;  %v2155_v17 = vpop.f32.mrf.mxu1 }
 0x809   :  { %v2198_v58 = vadd.f32 %v2135_v16, %v1471_v8  ;;  %v2199_v20 = vadd.f32 %v2155_v17, %v1512_v1  ;;  %v5992_v8 = vld [vmem:[#allocation77_spill] sm:$0xff] }
 0x80b   :  { %v2938_v10 = vmul.f32 -1.442695, %v2198_v58  ;;  %v2939_v60 = vmul.f32 -1.442695, %v2199_v20  ;;  %v5993_v58 = vld [vmem:[#allocation59_spill] sm:$0xff] }
 0x80c   :  { %v1553_v1 = vadd.f32 %v5993_v58, %v5992_v8 }
 0x80d   :  { %3142 = vpow2.f32 %v2938_v10 }
 0x80e   :  { %3144 = vpow2.f32 %v2939_v60 }
 0x80f   :  { %v2195_v9 = vpop.f32.mrf.mxu3  ;;  %v2175_v56 = vpop.f32.mrf.mxu2 }
 0x810   :  { %v2201_v14 = vadd.f32 %v2195_v9, %v1594_v38  ;;  %v2200_v20 = vadd.f32 %v2175_v56, %v1553_v1 }
 0x812   :  { %v2940_v51 = vmul.f32 -1.442695, %v2201_v14 }
 0x813   :  { %v3143_v13 = vpop.eup %3142 }
 0x814   :  { %v3145_v59 = vpop.eup %3144  ;;  %v2205_v41 = vadd.f32 1.0, %v3143_v13  ;;  %3146 = vpow2.f32 %v2940_v51 }
 0x815   :  { %v2224_v53 = vadd.f32 1.0, %v3145_v59 }
 0x816   :  { %3148 = vrcp.f32 %v2205_v41  ;;  %v2217_v21 = vand.u32 2147483648, %v2205_v41  ;;  %v2215_v51 = vand.u32 2147483647, %v2205_v41  ;;  %vm2211_vm6 = vweird.f32 %v2205_v41 }
 0x817   :  { %3150 = vrcp.f32 %v2224_v53  ;;  %v2236_v13 = vand.u32 2147483648, %v2224_v53  ;;  %v2234_v36 = vand.u32 2147483647, %v2224_v53  ;;  %vm2230_vm7 = vweird.f32 %v2224_v53 }
 0x818   :  { %v2218_v56 = vor.u32 1.1754944e-38, %v2217_v21  ;;  %vm2216_vm10 = vcmp.eq.f32.partialorder %v2215_v51, 8.507059e+37 }
 0x819   :  { %vm2235_vm11 = vcmp.eq.f32.partialorder %v2234_v36, 8.507059e+37 }
 0x81a   :  { %v3147_v16 = vpop.eup %3146 }
 0x81b   :  { %v2244_v10 = vadd.f32 1.0, %v3147_v16 }
 0x81c   :  { %v3149_v17 = vpop.eup %3148 }
 0x81d   :  { %v3151_v7 = vpop.eup %3150  ;;  %v2207_v60 = vmul.f32 %v3149_v17, %v2205_v41  ;;  %3152 = vrcp.f32 %v2244_v10  ;;  %vm2212_vm4 = vweird.f32 %v3149_v17  ;;  %vm2250_vm13 = vweird.f32 %v2244_v10 }
 0x81e   :  { %v2226_v38 = vmul.f32 %v3151_v7, %v2224_v53  ;;  %3154 = vtanh.f32 %v2200_v20  ;;  %vm2231_vm5 = vweird.f32 %v3151_v7  ;;  %vm2213_vm8 = vmor %vm2211_vm6, %vm2212_vm4  ;;  %v2254_v21 = vand.u32 2147483647, %v2244_v10 }
 0x81f   :  { %v2208_v14 = vsub.f32 1.0, %v2207_v60  ;;  %vm2232_vm9 = vmor %vm2230_vm7, %vm2231_vm5  ;;  %v2237_v60 = vor.u32 1.1754944e-38, %v2236_v13 }
 0x820   :  { %v2227_v9 = vsub.f32 1.0, %v2226_v38  ;;  %vm2255_vm15 = vcmp.eq.f32.partialorder %v2254_v21, 8.507059e+37  ;;  %v6013_v21 = vld [vmem:[#allocation46_spill] sm:$0xff] }
 0x821   :  { %v2209_v59 = vmul.f32 %v3149_v17, %v2208_v14 }
 0x822   :  { %v2228_v6 = vmul.f32 %v3151_v7, %v2227_v9 }
 0x823   :  { %v3153_v57 = vpop.eup %3152  ;;  %v2210_v58 = vadd.f32 %v3149_v17, %v2209_v59 }
 0x824   :  { %v2229_v16 = vadd.f32 %v3151_v7, %v2228_v6  ;;  %v2246_v1 = vmul.f32 %v3153_v57, %v2244_v10  ;;  %v3155_v20 = vpop.eup %3154  ;;  %vm2251_vm12 = vweird.f32 %v3153_v57  ;;  %v2256_v6 = vand.u32 2147483648, %v2244_v10  ;;  %v6000_v10 = vld [vmem:[#allocation28_spill] sm:$0xff] }
 0x825   :  { %v2214_v38 = vsel %vm2213_vm8, %v3149_v17, %v2210_v58  ;;  %vm2252_vm14 = vmor %vm2250_vm13, %vm2251_vm12  ;;  %v6001_v58 = vld [vmem:[#allocation29_spill] sm:$0xff] }
 0x826   :  { %v2219_v8 = vsel %vm2216_vm10, %v2218_v56, %v2214_v38  ;;  %v2233_v14 = vsel %vm2232_vm9, %v3151_v7, %v2229_v16  ;;  %v2247_v11 = vsub.f32 1.0, %v2246_v1  ;;  %v2257_v13 = vor.u32 1.1754944e-38, %v2256_v6  ;;  %v6002_v56 = vld [vmem:[#allocation35_spill] sm:$0xff]  ;;  %v6003_v16 = vld [vmem:[#allocation30_spill] sm:$0xff]  ;;  %v6004_v1 = vld [vmem:[#allocation32_spill] sm:$0xff] }
 0x827   :  { %v2238_v9 = vsel %vm2235_vm11, %v2237_v60, %v2233_v14  ;;  %v2261_v4 = vmul.f32 %v3155_v20, %v2219_v8  ;;  %v5999_v8 = vld [vmem:[#allocation27_spill] sm:$0xff]  ;;  %v6005_v60 = vld [vmem:[#allocation44_spill] sm:$0xff]  ;;  %v6006_v38 = vld [vmem:[#allocation37_spill] sm:$0xff] }
 0x828   :  { %v2260_v63 = vmul.f32 %v2238_v9, %v5135_v62  ;;  %v2248_v59 = vmul.f32 %v3153_v57, %v2247_v11  ;;  %v5994_v62 = vld [vmem:[#allocation43_spill] sm:$0xff]  ;;  %v5997_v11 = vld [vmem:[#allocation42_spill] sm:$0xff]  ;;  %v6007_v20 = vld [vmem:[#allocation33_spill] sm:$0xff] }
 0x829   :  { %v6008_v14 = vld [vmem:[#allocation36_spill] sm:$0xff]  ;;  %v6009_v9 = vld [vmem:[#allocation45_spill] sm:$0xff] }
 0x82a   :  { %v5211_v41 = vadd.f32 %v2261_v4, %v2260_v63  ;;  %v2249_v53 = vadd.f32 %v3153_v57, %v2248_v59  ;;  %v5995_v63 = vld [vmem:[#allocation25_spill] sm:$0xff]  ;;  %v5996_v4 = vld [vmem:[#allocation26_spill] sm:$0xff]  ;;  %v6012_v6 = vld [vmem:[#allocation40_spill] sm:$0xff] }
 0x82b   :  { %v6010_v59 = vld [vmem:[#allocation41_spill] sm:$0xff] }
 0x82c   :  { %3156 = vtanh.f32 %v5211_v41  ;;  %v2253_v17 = vsel %vm2252_vm14, %v3153_v57, %v2249_v53  ;;  %v5998_v57 = vld [vmem:[#allocation31_spill] sm:$0xff] }
 0x82d   :  { %v2258_v7 = vsel %vm2255_vm15, %v2257_v13, %v2253_v17  ;;  %v6011_v53 = vld [vmem:[#allocation39_spill] sm:$0xff]  ;;  %v6014_v17 = vld [vmem:[#allocation34_spill] sm:$0xff] }
 0x82e   :  { %v6015_v13 = vld [vmem:[#allocation47_spill] sm:$0xff] }
 0x832   :  { %v3157_v36 = vpop.eup %3156 }
 0x833   :  { %v2264_v51 = vmul.f32 %v3157_v36, %v2258_v7  ;;  %v6016_v36 = vld [vmem:[#allocation48_spill] sm:$0xff] }
 0x834   :  { %v6017_v7 = vld [vmem:[#allocation20_spill] sm:$0xff] }
 0x835   :  { %2281 = vmatmul.f32.vlgmr.msrb.gmra.mxu0 %v2264_v51  ;;  %2301 = vmatmul.f32.vlgmr.msrb.gmra.mxu1 %v2264_v51 }
 0x836   :  { %2321 = vmatmul.f32.vlgmr.msrb.gmra.mxu2 %v2264_v51  ;;  %2341 = vmatmul.f32.vlgmr.msrb.gmra.mxu3 %v2264_v51  ;;  %v6018_v51 = vld [vmem:[#allocation50_spill] sm:$0xff] }
 0x837   :  { %2559 = vmatpush.msrb.mxu0 %v4934_v2  ;;  %2579 = vmatpush.msrb.mxu1 %v4937_v22 }
 0x838   :  { %2599 = vmatpush.msrb.mxu2 %v4940_v24  ;;  %2619 = vmatpush.msrb.mxu3 %v4943_v25 }
 0x839   :  { %2560 = vmatpush.msrb.mxu0 %v4946_v27  ;;  %2580 = vmatpush.msrb.mxu1 %v4949_v28 }
 0x83a   :  { %2600 = vmatpush.msrb.mxu2 %v4952_v31  ;;  %2620 = vmatpush.msrb.mxu3 %v4955_v43 }
 0x83b   :  { %2561 = vmatpush.msrb.mxu0 %v4958_v32  ;;  %2581 = vmatpush.msrb.mxu1 %v4961_v44 }
 0x83c   :  { %2601 = vmatpush.msrb.mxu2 %v4964_v18  ;;  %2621 = vmatpush.msrb.mxu3 %v4967_v3 }
 0x83d   :  { %2562 = vmatpush.msrb.mxu0 %v4970_v55  ;;  %2582 = vmatpush.msrb.mxu1 %v4973_v5 }
 0x83e   :  { %2602 = vmatpush.msrb.mxu2 %v4976_v33  ;;  %2622 = vmatpush.msrb.mxu3 %v4979_v61 }
 0x83f   :  { %2563 = vmatpush.msrb.mxu0 %v4982_v46  ;;  %2583 = vmatpush.msrb.mxu1 %v4985_v15 }
 0x840   :  { %2603 = vmatpush.msrb.mxu2 %v4988_v34  ;;  %2623 = vmatpush.msrb.mxu3 %v4991_v26 }
 0x841   :  { %2564 = vmatpush.msrb.mxu0 %v4994_v50  ;;  %2584 = vmatpush.msrb.mxu1 %v4997_v23 }
 0x842   :  { %2604 = vmatpush.msrb.mxu2 %v5000_v39  ;;  %2624 = vmatpush.msrb.mxu3 %v5003_v47 }
 0x843   :  { %2565 = vmatpush.msrb.mxu0 %v5006_v30  ;;  %2585 = vmatpush.msrb.mxu1 %v5009_v35 }
 0x844   :  { %2605 = vmatpush.msrb.mxu2 %v5012_v45  ;;  %2625 = vmatpush.msrb.mxu3 %v5015_v12 }
 0x845   :  { %2566 = vmatpush.msrb.mxu0 %v5018_v19  ;;  %2586 = vmatpush.msrb.mxu1 %v5021_v48 }
 0x846   :  { %2606 = vmatpush.msrb.mxu2 %v5024_v0  ;;  %2626 = vmatpush.msrb.mxu3 %v5027_v29 }
 0x847   :  { %2567 = vmatpush.msrb.mxu0 %v5030_v37  ;;  %2587 = vmatpush.msrb.mxu1 %v5033_v40 }
 0x848   :  { %2607 = vmatpush.msrb.mxu2 %v5036_v49  ;;  %2627 = vmatpush.msrb.mxu3 %v5039_v54 }
 0x849   :  { %2568 = vmatpush.msrb.mxu0 %v5042_v42  ;;  %2588 = vmatpush.msrb.mxu1 %v5045_v52 }
 0x84a   :  { %2608 = vmatpush.msrb.mxu2 %v5994_v62  ;;  %2628 = vmatpush.msrb.mxu3 %v5995_v63 }
 0x84b   :  { %2569 = vmatpush.msrb.mxu0 %v5996_v4  ;;  %2589 = vmatpush.msrb.mxu1 %v5997_v11 }
 0x84c   :  { %2609 = vmatpush.msrb.mxu2 %v5998_v57  ;;  %2629 = vmatpush.msrb.mxu3 %v5999_v8 }
 0x84d   :  { %2570 = vmatpush.msrb.mxu0 %v6000_v10  ;;  %2590 = vmatpush.msrb.mxu1 %v6001_v58 }
 0x84e   :  { %2610 = vmatpush.msrb.mxu2 %v6002_v56  ;;  %2630 = vmatpush.msrb.mxu3 %v6003_v16  ;;  %v6025_v56 = vld [vmem:[#allocation60_spill] sm:$0xff] }
 0x84f   :  { %2571 = vmatpush.msrb.mxu0 %v6004_v1  ;;  %2591 = vmatpush.msrb.mxu1 %v6005_v60 }
 0x850   :  { %2611 = vmatpush.msrb.mxu2 %v6006_v38  ;;  %2631 = vmatpush.msrb.mxu3 %v6007_v20  ;;  %v6023_v38 = vld [vmem:[#allocation58_spill] sm:$0xff] }
 0x851   :  { %2572 = vmatpush.msrb.mxu0 %v6008_v14  ;;  %2592 = vmatpush.msrb.mxu1 %v6009_v9  ;;  %v6019_v14 = vld [vmem:[#allocation49_spill] sm:$0xff]  ;;  %v6020_v9 = vld [vmem:[#allocation71_spill] sm:$0xff] }
 0x852   :  { %2612 = vmatpush.msrb.mxu2 %v6010_v59  ;;  %2632 = vmatpush.msrb.mxu3 %v6011_v53  ;;  %v6021_v59 = vld [vmem:[#allocation57_spill] sm:$0xff]  ;;  %v6022_v53 = vld [vmem:[#allocation72_spill] sm:$0xff] }
 0x853   :  { %2573 = vmatpush.msrb.mxu0 %v6012_v6  ;;  %2593 = vmatpush.msrb.mxu1 %v6013_v21  ;;  %v1474_v20 = vadd.f32 %v6021_v59, %v6020_v9  ;;  %v1515_v6 = vadd.f32 %v6023_v38, %v6022_v53 }
 0x854   :  { %2613 = vmatpush.msrb.mxu2 %v6014_v17  ;;  %2633 = vmatpush.msrb.mxu3 %v6015_v13 }
 0x855   :  { %2574 = vmatpush.msrb.mxu0 %v6016_v36  ;;  %2594 = vmatpush.msrb.mxu1 %v6017_v7  ;;  %v6024_v36 = vld [vmem:[#allocation75_spill] sm:$0xff] }
 0x856   :  { %2614 = vmatpush.msrb.mxu2 %v6018_v51  ;;  %2634 = vmatpush.msrb.mxu3 %v6019_v14  ;;  %v1597_v7 = vadd.f32 %v6025_v56, %v6024_v36 }
 0x8b2   :  { %v2282_v60 = vpop.f32.mrf.mxu0  ;;  %v2302_v21 = vpop.f32.mrf.mxu1 }
 0x8b3   :  { %v2345_v1 = vadd.f32 %v2282_v60, %v1474_v20  ;;  %v2346_v17 = vadd.f32 %v2302_v21, %v1515_v6  ;;  %v6026_v20 = vld [vmem:[#allocation77_spill] sm:$0xff] }
 0x8b5   :  { %v2941_v16 = vmul.f32 -1.442695, %v2345_v1  ;;  %v2942_v13 = vmul.f32 -1.442695, %v2346_v17  ;;  %v6027_v1 = vld [vmem:[#allocation63_spill] sm:$0xff] }
 0x8b6   :  { %v1556_v6 = vadd.f32 %v6027_v1, %v6026_v20 }
 0x8b7   :  { %3158 = vpow2.f32 %v2941_v16 }
 0x8b8   :  { %3160 = vpow2.f32 %v2942_v13 }
 0x8b9   :  { %v2342_v51 = vpop.f32.mrf.mxu3  ;;  %v2322_v38 = vpop.f32.mrf.mxu2 }
 0x8ba   :  { %v2348_v58 = vadd.f32 %v2342_v51, %v1597_v7  ;;  %v2347_v17 = vadd.f32 %v2322_v38, %v1556_v6 }
 0x8bc   :  { %v2943_v14 = vmul.f32 -1.442695, %v2348_v58 }
 0x8bd   :  { %v3159_v10 = vpop.eup %3158 }
 0x8be   :  { %v3161_v8 = vpop.eup %3160  ;;  %v2352_v59 = vadd.f32 1.0, %v3159_v10  ;;  %3162 = vpow2.f32 %v2943_v14 }
 0x8bf   :  { %v2371_v9 = vadd.f32 1.0, %v3161_v8 }
 0x8c0   :  { %3164 = vrcp.f32 %v2352_v59  ;;  %v2364_v36 = vand.u32 2147483648, %v2352_v59  ;;  %v2362_v14 = vand.u32 2147483647, %v2352_v59  ;;  %vm2358_vm2 = vweird.f32 %v2352_v59 }
 0x8c1   :  { %3166 = vrcp.f32 %v2371_v9  ;;  %v2383_v10 = vand.u32 2147483648, %v2371_v9  ;;  %v2381_v57 = vand.u32 2147483647, %v2371_v9  ;;  %vm2377_vm3 = vweird.f32 %v2371_v9 }
 0x8c2   :  { %v2365_v38 = vor.u32 1.1754944e-38, %v2364_v36  ;;  %vm2363_vm6 = vcmp.eq.f32.partialorder %v2362_v14, 8.507059e+37 }
 0x8c3   :  { %vm2382_vm7 = vcmp.eq.f32.partialorder %v2381_v57, 8.507059e+37 }
 0x8c4   :  { %v3163_v60 = vpop.eup %3162 }
 0x8c5   :  { %v2391_v16 = vadd.f32 1.0, %v3163_v60 }
 0x8c6   :  { %v3165_v21 = vpop.eup %3164 }
 0x8c7   :  { %v3167_v56 = vpop.eup %3166  ;;  %v2354_v13 = vmul.f32 %v3165_v21, %v2352_v59  ;;  %3168 = vrcp.f32 %v2391_v16  ;;  %vm2359_vm0 = vweird.f32 %v3165_v21  ;;  %vm2397_vm9 = vweird.f32 %v2391_v16 }
 0x8c8   :  { %v2373_v7 = vmul.f32 %v3167_v56, %v2371_v9  ;;  %3170 = vtanh.f32 %v2347_v17  ;;  %vm2378_vm1 = vweird.f32 %v3167_v56  ;;  %vm2360_vm4 = vmor %vm2358_vm2, %vm2359_vm0  ;;  %v2401_v36 = vand.u32 2147483647, %v2391_v16 }
 0x8c9   :  { %v2355_v58 = vsub.f32 1.0, %v2354_v13  ;;  %vm2379_vm5 = vmor %vm2377_vm3, %vm2378_vm1  ;;  %v2384_v13 = vor.u32 1.1754944e-38, %v2383_v10 }
 0x8ca   :  { %v2374_v51 = vsub.f32 1.0, %v2373_v7  ;;  %vm2402_vm11 = vcmp.eq.f32.partialorder %v2401_v36, 8.507059e+37 }
 0x8cb   :  { %v2356_v8 = vmul.f32 %v3165_v21, %v2355_v58 }
 0x8cc   :  { %v2375_v53 = vmul.f32 %v3167_v56, %v2374_v51 }
 0x8cd   :  { %v3169_v11 = vpop.eup %3168  ;;  %v2357_v1 = vadd.f32 %v3165_v21, %v2356_v8 }
 0x8ce   :  { %v2376_v60 = vadd.f32 %v3167_v56, %v2375_v53  ;;  %v2393_v6 = vmul.f32 %v3169_v11, %v2391_v16  ;;  %v3171_v17 = vpop.eup %3170  ;;  %vm2398_vm8 = vweird.f32 %v3169_v11  ;;  %v2403_v53 = vand.u32 2147483648, %v2391_v16 }
 0x8cf   :  { %v2361_v7 = vsel %vm2360_vm4, %v3165_v21, %v2357_v1  ;;  %vm2399_vm10 = vmor %vm2397_vm9, %vm2398_vm8 }
 0x8d0   :  { %v2366_v20 = vsel %vm2363_vm6, %v2365_v38, %v2361_v7  ;;  %v2380_v58 = vsel %vm2379_vm5, %v3167_v56, %v2376_v60  ;;  %v2394_v4 = vsub.f32 1.0, %v2393_v6  ;;  %v2404_v10 = vor.u32 1.1754944e-38, %v2403_v53  ;;  %v6060_v7 = vld [vmem:[#allocation77_spill] sm:$0xff] }
 0x8d1   :  { %v2385_v51 = vsel %vm2382_vm7, %v2384_v13, %v2380_v58  ;;  %v2408_v63 = vmul.f32 %v3171_v17, %v2366_v20  ;;  %v6061_v17 = vld [vmem:[#allocation67_spill] sm:$0xff] }
 0x8d2   :  { %v2407_v62 = vmul.f32 %v2385_v51, %v5211_v41  ;;  %v2395_v8 = vmul.f32 %v3169_v11, %v2394_v4  ;;  %v6058_v41 = vld [vmem:[#allocation75_spill] sm:$0xff]  ;;  %v1559_v58 = vadd.f32 %v6061_v17, %v6060_v7 }
 0x8d4   :  { %v5287_v59 = vadd.f32 %v2408_v63, %v2407_v62  ;;  %v2396_v9 = vadd.f32 %v3169_v11, %v2395_v8  ;;  %v6059_v62 = vld [vmem:[#allocation64_spill] sm:$0xff] }
 0x8d5   :  { %v1600_v63 = vadd.f32 %v6059_v62, %v6058_v41 }
 0x8d6   :  { %3172 = vtanh.f32 %v5287_v59  ;;  %v2400_v21 = vsel %vm2399_vm10, %v3169_v11, %v2396_v9 }
 0x8d7   :  { %v2405_v56 = vsel %vm2402_vm11, %v2404_v10, %v2400_v21 }
 0x8dc   :  { %v3173_v57 = vpop.eup %3172 }
 0x8dd   :  { %v2411_v14 = vmul.f32 %v3173_v57, %v2405_v56 }
 0x8df   :  { %2428 = vmatmul.f32.vlgmr.msra.gmra.mxu0 %v2411_v14  ;;  %2448 = vmatmul.f32.vlgmr.msra.gmra.mxu1 %v2411_v14 }
 0x8e0   :  { %2468 = vmatmul.f32.vlgmr.msra.gmra.mxu2 %v2411_v14  ;;  %2488 = vmatmul.f32.vlgmr.msra.gmra.mxu3 %v2411_v14 }
 0x8e1   :  { %2706 = vmatpush.msra.mxu0 %v4934_v2  ;;  %2726 = vmatpush.msra.mxu1 %v4937_v22  ;;  %v6028_v2 = vld [vmem:[#allocation43_spill] sm:$0xff]  ;;  %v6029_v22 = vld [vmem:[#allocation25_spill] sm:$0xff] }
 0x8e2   :  { %2746 = vmatpush.msra.mxu2 %v4940_v24  ;;  %2766 = vmatpush.msra.mxu3 %v4943_v25  ;;  %v6030_v24 = vld [vmem:[#allocation26_spill] sm:$0xff] }
 0x8e3   :  { %2707 = vmatpush.msra.mxu0 %v4946_v27  ;;  %2727 = vmatpush.msra.mxu1 %v4949_v28  ;;  %v6031_v25 = vld [vmem:[#allocation42_spill] sm:$0xff]  ;;  %v6032_v27 = vld [vmem:[#allocation31_spill] sm:$0xff] }
 0x8e4   :  { %2747 = vmatpush.msra.mxu2 %v4952_v31  ;;  %2767 = vmatpush.msra.mxu3 %v4955_v43  ;;  %v6033_v28 = vld [vmem:[#allocation27_spill] sm:$0xff]  ;;  %v6034_v31 = vld [vmem:[#allocation28_spill] sm:$0xff]  ;;  %v6035_v43 = vld [vmem:[#allocation29_spill] sm:$0xff] }
 0x8e5   :  { %2708 = vmatpush.msra.mxu0 %v4958_v32  ;;  %2728 = vmatpush.msra.mxu1 %v4961_v44  ;;  %v6036_v32 = vld [vmem:[#allocation35_spill] sm:$0xff]  ;;  %v6037_v44 = vld [vmem:[#allocation30_spill] sm:$0xff] }
 0x8e6   :  { %2748 = vmatpush.msra.mxu2 %v4964_v18  ;;  %2768 = vmatpush.msra.mxu3 %v4967_v3  ;;  %v6038_v18 = vld [vmem:[#allocation32_spill] sm:$0xff] }
 0x8e7   :  { %2709 = vmatpush.msra.mxu0 %v4970_v55  ;;  %2729 = vmatpush.msra.mxu1 %v4973_v5  ;;  %v6039_v3 = vld [vmem:[#allocation44_spill] sm:$0xff]  ;;  %v6040_v55 = vld [vmem:[#allocation37_spill] sm:$0xff] }
 0x8e8   :  { %2749 = vmatpush.msra.mxu2 %v4976_v33  ;;  %2769 = vmatpush.msra.mxu3 %v4979_v61  ;;  %v6041_v5 = vld [vmem:[#allocation33_spill] sm:$0xff]  ;;  %v6042_v33 = vld [vmem:[#allocation36_spill] sm:$0xff] }
 0x8e9   :  { %2710 = vmatpush.msra.mxu0 %v4982_v46  ;;  %2730 = vmatpush.msra.mxu1 %v4985_v15  ;;  %v6043_v61 = vld [vmem:[#allocation45_spill] sm:$0xff]  ;;  %v6045_v15 = vld [vmem:[#allocation39_spill] sm:$0xff] }
 0x8ea   :  { %2750 = vmatpush.msra.mxu2 %v4988_v34  ;;  %2770 = vmatpush.msra.mxu3 %v4991_v26  ;;  %v6044_v46 = vld [vmem:[#allocation41_spill] sm:$0xff]  ;;  %v6046_v34 = vld [vmem:[#allocation40_spill] sm:$0xff]  ;;  %v6047_v26 = vld [vmem:[#allocation46_spill] sm:$0xff] }
 0x8eb   :  { %2711 = vmatpush.msra.mxu0 %v4994_v50  ;;  %2731 = vmatpush.msra.mxu1 %v4997_v23  ;;  %v6048_v50 = vld [vmem:[#allocation34_spill] sm:$0xff]  ;;  %v6049_v23 = vld [vmem:[#allocation47_spill] sm:$0xff] }
 0x8ec   :  { %2751 = vmatpush.msra.mxu2 %v5000_v39  ;;  %2771 = vmatpush.msra.mxu3 %v5003_v47  ;;  %v6050_v39 = vld [vmem:[#allocation48_spill] sm:$0xff] }
 0x8ed   :  { %2712 = vmatpush.msra.mxu0 %v5006_v30  ;;  %2732 = vmatpush.msra.mxu1 %v5009_v35  ;;  %v6051_v47 = vld [vmem:[#allocation20_spill] sm:$0xff]  ;;  %v6052_v30 = vld [vmem:[#allocation50_spill] sm:$0xff]  ;;  %v6053_v35 = vld [vmem:[#allocation49_spill] sm:$0xff] }
 0x8ee   :  { %2752 = vmatpush.msra.mxu2 %v5012_v45  ;;  %2772 = vmatpush.msra.mxu3 %v5015_v12  ;;  %v6054_v45 = vld [vmem:[#allocation71_spill] sm:$0xff]  ;;  %v6055_v12 = vld [vmem:[#allocation61_spill] sm:$0xff] }
 0x8ef   :  { %2713 = vmatpush.msra.mxu0 %v5018_v19  ;;  %2733 = vmatpush.msra.mxu1 %v5021_v48  ;;  %v1477_v19 = vadd.f32 %v6055_v12, %v6054_v45  ;;  %v6056_v48 = vld [vmem:[#allocation72_spill] sm:$0xff] }
 0x8f0   :  { %2753 = vmatpush.msra.mxu2 %v5024_v0  ;;  %2773 = vmatpush.msra.mxu3 %v5027_v29  ;;  %v6057_v0 = vld [vmem:[#allocation62_spill] sm:$0xff] }
 0x8f1   :  { %2714 = vmatpush.msra.mxu0 %v5030_v37  ;;  %2734 = vmatpush.msra.mxu1 %v5033_v40  ;;  %v1518_v29 = vadd.f32 %v6057_v0, %v6056_v48 }
 0x8f2   :  { %2754 = vmatpush.msra.mxu2 %v5036_v49  ;;  %2774 = vmatpush.msra.mxu3 %v5039_v54 }
 0x8f3   :  { %2715 = vmatpush.msra.mxu0 %v5042_v42  ;;  %2735 = vmatpush.msra.mxu1 %v5045_v52 }
 0x8f4   :  { %2755 = vmatpush.msra.mxu2 %v6028_v2  ;;  %2775 = vmatpush.msra.mxu3 %v6029_v22 }
 0x8f5   :  { %2716 = vmatpush.msra.mxu0 %v6030_v24  ;;  %2736 = vmatpush.msra.mxu1 %v6031_v25 }
 0x8f6   :  { %2756 = vmatpush.msra.mxu2 %v6032_v27  ;;  %2776 = vmatpush.msra.mxu3 %v6033_v28 }
 0x8f7   :  { %2717 = vmatpush.msra.mxu0 %v6034_v31  ;;  %2737 = vmatpush.msra.mxu1 %v6035_v43 }
 0x8f8   :  { %2757 = vmatpush.msra.mxu2 %v6036_v32  ;;  %2777 = vmatpush.msra.mxu3 %v6037_v44 }
 0x8f9   :  { %2718 = vmatpush.msra.mxu0 %v6038_v18  ;;  %2738 = vmatpush.msra.mxu1 %v6039_v3 }
 0x8fa   :  { %2758 = vmatpush.msra.mxu2 %v6040_v55  ;;  %2778 = vmatpush.msra.mxu3 %v6041_v5 }
 0x8fb   :  { %2719 = vmatpush.msra.mxu0 %v6042_v33  ;;  %2739 = vmatpush.msra.mxu1 %v6043_v61 }
 0x8fc   :  { %2759 = vmatpush.msra.mxu2 %v6044_v46  ;;  %2779 = vmatpush.msra.mxu3 %v6045_v15 }
 0x8fd   :  { %2720 = vmatpush.msra.mxu0 %v6046_v34  ;;  %2740 = vmatpush.msra.mxu1 %v6047_v26 }
 0x8fe   :  { %2760 = vmatpush.msra.mxu2 %v6048_v50  ;;  %2780 = vmatpush.msra.mxu3 %v6049_v23 }
 0x8ff   :  { %2721 = vmatpush.msra.mxu0 %v6050_v39  ;;  %2741 = vmatpush.msra.mxu1 %v6051_v47 }
 0x900   :  { %2761 = vmatpush.msra.mxu2 %v6052_v30  ;;  %2781 = vmatpush.msra.mxu3 %v6053_v35 }
 0x95c   :  { %v2429_v37 = vpop.f32.mrf.mxu0  ;;  %v2449_v40 = vpop.f32.mrf.mxu1 }
 0x95d   :  { %v2492_v49 = vadd.f32 %v2429_v37, %v1477_v19  ;;  %v2493_v54 = vadd.f32 %v2449_v40, %v1518_v29  ;;  %v6063_v29 = vld [vmem:[#allocation66_spill] sm:$0xff] }
 0x95e   :  { %v1521_v37 = vadd.f32 %v6063_v29, %v6056_v48 }
 0x95f   :  { %v2944_v42 = vmul.f32 -1.442695, %v2492_v49  ;;  %v2945_v52 = vmul.f32 -1.442695, %v2493_v54 }
 0x961   :  { %3174 = vpow2.f32 %v2944_v42 }
 0x962   :  { %3176 = vpow2.f32 %v2945_v52 }
 0x963   :  { %v2489_v4 = vpop.f32.mrf.mxu3  ;;  %v2469_v6 = vpop.f32.mrf.mxu2 }
 0x964   :  { %v2495_v11 = vadd.f32 %v2489_v4, %v1600_v63  ;;  %v2494_v9 = vadd.f32 %v2469_v6, %v1559_v58  ;;  %v6064_v63 = vld [vmem:[#allocation68_spill] sm:$0xff]  ;;  %v6065_v58 = vld [vmem:[#allocation73_spill] sm:$0xff] }
 0x965   :  { %v1603_v4 = vadd.f32 %v6064_v63, %v6058_v41 }
 0x966   :  { %v2946_v20 = vmul.f32 -1.442695, %v2495_v11 }
 0x967   :  { %v3175_v16 = vpop.eup %3174 }
 0x968   :  { %v3177_v1 = vpop.eup %3176  ;;  %v2499_v38 = vadd.f32 1.0, %v3175_v16  ;;  %3178 = vpow2.f32 %v2946_v20 }
 0x969   :  { %v2518_v60 = vadd.f32 1.0, %v3177_v1 }
 0x96a   :  { %3180 = vrcp.f32 %v2499_v38  ;;  %v2511_v56 = vand.u32 2147483648, %v2499_v38  ;;  %v2509_v22 = vand.u32 2147483647, %v2499_v38  ;;  %vm2505_vm14 = vweird.f32 %v2499_v38 }
 0x96b   :  { %3182 = vrcp.f32 %v2518_v60  ;;  %v2530_v14 = vand.u32 2147483648, %v2518_v60  ;;  %v2528_v25 = vand.u32 2147483647, %v2518_v60  ;;  %vm2524_vm15 = vweird.f32 %v2518_v60 }
 0x96c   :  { %v2512_v31 = vor.u32 1.1754944e-38, %v2511_v56  ;;  %vm2510_vm2 = vcmp.eq.f32.partialorder %v2509_v22, 8.507059e+37 }
 0x96d   :  { %v2531_v44 = vor.u32 1.1754944e-38, %v2530_v14  ;;  %vm2529_vm3 = vcmp.eq.f32.partialorder %v2528_v25, 8.507059e+37 }
 0x96e   :  { %v3179_v13 = vpop.eup %3178 }
 0x96f   :  { %v2538_v51 = vadd.f32 1.0, %v3179_v13 }
 0x970   :  { %v3181_v8 = vpop.eup %3180 }
 0x971   :  { %v3183_v53 = vpop.eup %3182  ;;  %v2501_v36 = vmul.f32 %v3181_v8, %v2499_v38  ;;  %3184 = vrcp.f32 %v2538_v51  ;;  %vm2506_vm12 = vweird.f32 %v3181_v8  ;;  %v2550_v23 = vand.u32 2147483648, %v2538_v51 }
 0x972   :  { %v2520_v21 = vmul.f32 %v3183_v53, %v2518_v60  ;;  %3186 = vtanh.f32 %v2494_v9  ;;  %vm2525_vm13 = vweird.f32 %v3183_v53  ;;  %vm2507_vm0 = vmor %vm2505_vm14, %vm2506_vm12  ;;  %vm2544_vm5 = vweird.f32 %v2538_v51 }
 0x973   :  { %v2502_v10 = vsub.f32 1.0, %v2501_v36  ;;  %vm2526_vm1 = vmor %vm2524_vm15, %vm2525_vm13  ;;  %v2548_v39 = vand.u32 2147483647, %v2538_v51  ;;  %v2551_v30 = vor.u32 1.1754944e-38, %v2550_v23 }
 0x974   :  { %v2521_v57 = vsub.f32 1.0, %v2520_v21 }
 0x975   :  { %v2503_v2 = vmul.f32 %v3181_v8, %v2502_v10  ;;  %vm2549_vm7 = vcmp.eq.f32.partialorder %v2548_v39, 8.507059e+37 }
 0x976   :  { %v2522_v24 = vmul.f32 %v3183_v53, %v2521_v57 }
 0x977   :  { %v3185_v27 = vpop.eup %3184  ;;  %v2504_v28 = vadd.f32 %v3181_v8, %v2503_v2 }
 0x978   :  { %v2523_v43 = vadd.f32 %v3183_v53, %v2522_v24  ;;  %v2540_v32 = vmul.f32 %v3185_v27, %v2538_v51  ;;  %v3187_v3 = vpop.eup %3186  ;;  %vm2545_vm4 = vweird.f32 %v3185_v27  ;;  %v1562_v51 = vadd.f32 %v6065_v58, %v6060_v7 }
 0x979   :  { %v2508_v18 = vsel %vm2507_vm0, %v3181_v8, %v2504_v28  ;;  %vm2546_vm6 = vmor %vm2544_vm5, %vm2545_vm4 }
 0x97a   :  { %v2513_v55 = vsel %vm2510_vm2, %v2512_v31, %v2508_v18  ;;  %v2527_v5 = vsel %vm2526_vm1, %v3183_v53, %v2523_v43  ;;  %v2541_v33 = vsub.f32 1.0, %v2540_v32 }
 0x97b   :  { %v2532_v61 = vsel %vm2529_vm3, %v2531_v44, %v2527_v5  ;;  %v2555_v46 = vmul.f32 %v3187_v3, %v2513_v55 }
 0x97c   :  { %v2554_v15 = vmul.f32 %v2532_v61, %v5287_v59  ;;  %v2542_v34 = vmul.f32 %v3185_v27, %v2541_v33  ;;  %v6062_v59 = vld [vmem:[#allocation65_spill] sm:$0xff] }
 0x97d   :  { %v1480_v0 = vadd.f32 %v6062_v59, %v6054_v45 }
 0x97e   :  { %v5363_v26 = vadd.f32 %v2555_v46, %v2554_v15  ;;  %v2543_v50 = vadd.f32 %v3185_v27, %v2542_v34 }
 0x980   :  { %3188 = vtanh.f32 %v5363_v26  ;;  %v2547_v47 = vsel %vm2546_vm6, %v3185_v27, %v2543_v50 }
 0x981   :  { %v2552_v12 = vsel %vm2549_vm7, %v2551_v30, %v2547_v47 }
 0x986   :  { %v3189_v35 = vpop.eup %3188 }
 0x987   :  { %v2558_v19 = vmul.f32 %v3189_v35, %v2552_v12 }
 0x989   :  { %2575 = vmatmul.f32.vlgmr.msrb.gmra.mxu0 %v2558_v19  ;;  %2595 = vmatmul.f32.vlgmr.msrb.gmra.mxu1 %v2558_v19 }
 0x98a   :  { %2615 = vmatmul.f32.vlgmr.msrb.gmra.mxu2 %v2558_v19  ;;  %2635 = vmatmul.f32.vlgmr.msrb.gmra.mxu3 %v2558_v19 }
 0xa06   :  { %v2576_v40 = vpop.f32.mrf.mxu0  ;;  %v2596_v49 = vpop.f32.mrf.mxu1 }
 0xa07   :  { %v2639_v54 = vadd.f32 %v2576_v40, %v1480_v0  ;;  %v2640_v42 = vadd.f32 %v2596_v49, %v1521_v37  ;;  %v6067_v37 = vld [vmem:[#allocation70_spill] sm:$0xff] }
 0xa08   :  { %v1524_v40 = vadd.f32 %v6067_v37, %v6056_v48 }
 0xa09   :  { %v2947_v52 = vmul.f32 -1.442695, %v2639_v54  ;;  %v2948_v62 = vmul.f32 -1.442695, %v2640_v42 }
 0xa0b   :  { %3190 = vpow2.f32 %v2947_v52 }
 0xa0c   :  { %3192 = vpow2.f32 %v2948_v62 }
 0xa0d   :  { %v2636_v11 = vpop.f32.mrf.mxu3  ;;  %v2616_v13 = vpop.f32.mrf.mxu2 }
 0xa0e   :  { %v2642_v20 = vadd.f32 %v2636_v11, %v1603_v4  ;;  %v2641_v53 = vadd.f32 %v2616_v13, %v1562_v51  ;;  %v6068_v4 = vld [vmem:[#allocation74_spill] sm:$0xff] }
 0xa0f   :  { %v1606_v11 = vadd.f32 %v6068_v4, %v6058_v41 }
 0xa10   :  { %v2949_v16 = vmul.f32 -1.442695, %v2642_v20 }
 0xa11   :  { %v3191_v1 = vpop.eup %3190 }
 0xa12   :  { %v3193_v38 = vpop.eup %3192  ;;  %v2646_v60 = vadd.f32 1.0, %v3191_v1  ;;  %3194 = vpow2.f32 %v2949_v16 }
 0xa13   :  { %v2665_v6 = vadd.f32 1.0, %v3193_v38 }
 0xa14   :  { %3196 = vrcp.f32 %v2646_v60  ;;  %v2658_v14 = vand.u32 2147483648, %v2646_v60  ;;  %v2656_v24 = vand.u32 2147483647, %v2646_v60  ;;  %vm2652_vm10 = vweird.f32 %v2646_v60 }
 0xa15   :  { %3198 = vrcp.f32 %v2665_v6  ;;  %v2677_v2 = vand.u32 2147483648, %v2665_v6  ;;  %v2675_v27 = vand.u32 2147483647, %v2665_v6  ;;  %vm2671_vm11 = vweird.f32 %v2665_v6 }
 0xa16   :  { %v2659_v43 = vor.u32 1.1754944e-38, %v2658_v14  ;;  %vm2657_vm14 = vcmp.eq.f32.partialorder %v2656_v24, 8.507059e+37 }
 0xa17   :  { %v2678_v18 = vor.u32 1.1754944e-38, %v2677_v2  ;;  %vm2676_vm15 = vcmp.eq.f32.partialorder %v2675_v27, 8.507059e+37 }
 0xa18   :  { %v3195_v17 = vpop.eup %3194 }
 0xa19   :  { %v2685_v8 = vadd.f32 1.0, %v3195_v17  ;;  %v6069_v17 = vld [vmem:[#allocation76_spill] sm:$0xff] }
 0xa1a   :  { %v3197_v9 = vpop.eup %3196  ;;  %v1565_v58 = vadd.f32 %v6069_v17, %v6060_v7 }
 0xa1b   :  { %v3199_v36 = vpop.eup %3198  ;;  %v2648_v21 = vmul.f32 %v3197_v9, %v2646_v60  ;;  %3200 = vrcp.f32 %v2685_v8  ;;  %vm2653_vm8 = vweird.f32 %v3197_v9  ;;  %v2697_v47 = vand.u32 2147483648, %v2685_v8 }
 0xa1c   :  { %v2667_v10 = vmul.f32 %v3199_v36, %v2665_v6  ;;  %3202 = vtanh.f32 %v2641_v53  ;;  %vm2672_vm9 = vweird.f32 %v3199_v36  ;;  %vm2654_vm12 = vmor %vm2652_vm10, %vm2653_vm8  ;;  %vm2691_vm1 = vweird.f32 %v2685_v8 }
 0xa1d   :  { %v2649_v57 = vsub.f32 1.0, %v2648_v21  ;;  %vm2673_vm13 = vmor %vm2671_vm11, %vm2672_vm9  ;;  %v2695_v30 = vand.u32 2147483647, %v2685_v8  ;;  %v2698_v12 = vor.u32 1.1754944e-38, %v2697_v47 }
 0xa1e   :  { %v2668_v56 = vsub.f32 1.0, %v2667_v10 }
 0xa1f   :  { %v2650_v22 = vmul.f32 %v3197_v9, %v2649_v57  ;;  %vm2696_vm3 = vcmp.eq.f32.partialorder %v2695_v30, 8.507059e+37 }
 0xa20   :  { %v2669_v25 = vmul.f32 %v3199_v36, %v2668_v56 }
 0xa21   :  { %v3201_v28 = vpop.eup %3200  ;;  %v2651_v31 = vadd.f32 %v3197_v9, %v2650_v22 }
 0xa22   :  { %v2670_v32 = vadd.f32 %v3199_v36, %v2669_v25  ;;  %v2687_v44 = vmul.f32 %v3201_v28, %v2685_v8  ;;  %v3203_v55 = vpop.eup %3202  ;;  %vm2692_vm0 = vweird.f32 %v3201_v28 }
 0xa23   :  { %v2655_v3 = vsel %vm2654_vm12, %v3197_v9, %v2651_v31  ;;  %vm2693_vm2 = vmor %vm2691_vm1, %vm2692_vm0 }
 0xa24   :  { %v2660_v5 = vsel %vm2657_vm14, %v2659_v43, %v2655_v3  ;;  %v2674_v33 = vsel %vm2673_vm13, %v3199_v36, %v2670_v32  ;;  %v2688_v61 = vsub.f32 1.0, %v2687_v44 }
 0xa25   :  { %v2679_v46 = vsel %vm2676_vm15, %v2678_v18, %v2674_v33  ;;  %v2702_v15 = vmul.f32 %v3203_v55, %v2660_v5 }
 0xa26   :  { %v2701_v34 = vmul.f32 %v2679_v46, %v5363_v26  ;;  %v2689_v50 = vmul.f32 %v3201_v28, %v2688_v61  ;;  %v6066_v26 = vld [vmem:[#allocation69_spill] sm:$0xff] }
 0xa27   :  { %v1483_v29 = vadd.f32 %v6066_v26, %v6054_v45 }
 0xa28   :  { %v5375_v23 = vadd.f32 %v2702_v15, %v2701_v34  ;;  %v2690_v39 = vadd.f32 %v3201_v28, %v2689_v50 }
 0xa2a   :  { %3204 = vtanh.f32 %v5375_v23  ;;  %v2694_v35 = vsel %vm2693_vm2, %v3201_v28, %v2690_v39 }
 0xa2b   :  { %v2699_v59 = vsel %vm2696_vm3, %v2698_v12, %v2694_v35 }
 0xa30   :  { %v3205_v19 = vpop.eup %3204 }
 0xa31   :  { %v2705_v0 = vmul.f32 %v3205_v19, %v2699_v59 }
 0xa33   :  { %2722 = vmatmul.f32.vlgmr.msra.gmra.mxu0 %v2705_v0  ;;  %2742 = vmatmul.f32.vlgmr.msra.gmra.mxu1 %v2705_v0 }
 0xa34   :  { %2762 = vmatmul.f32.vlgmr.msra.gmra.mxu2 %v2705_v0  ;;  %2782 = vmatmul.f32.vlgmr.msra.gmra.mxu3 %v2705_v0 }
 0xab0   :  { %v2723_v49 = vpop.f32.mrf.mxu0  ;;  %v2743_v54 = vpop.f32.mrf.mxu1 }
 0xab1   :  { %v2786_v42 = vadd.f32 %v2723_v49, %v1483_v29  ;;  %v2787_v52 = vadd.f32 %v2743_v54, %v1524_v40 }
 0xab3   :  { %v2950_v62 = vmul.f32 -1.442695, %v2786_v42  ;;  %v2951_v63 = vmul.f32 -1.442695, %v2787_v52 }
 0xab5   :  { %3206 = vpow2.f32 %v2950_v62 }
 0xab6   :  { %3208 = vpow2.f32 %v2951_v63 }
 0xab7   :  { %v2783_v20 = vpop.f32.mrf.mxu3  ;;  %v2763_v48 = vpop.f32.mrf.mxu2 }
 0xab8   :  { %v2789_v16 = vadd.f32 %v2783_v20, %v1606_v11  ;;  %v2788_v9 = vadd.f32 %v2763_v48, %v1565_v58 }
 0xaba   :  { %v2952_v1 = vmul.f32 -1.442695, %v2789_v16 }
 0xabb   :  { %v3207_v38 = vpop.eup %3206 }
 0xabc   :  { %v3209_v60 = vpop.eup %3208  ;;  %v2793_v45 = vadd.f32 1.0, %v3207_v38  ;;  %3210 = vpow2.f32 %v2952_v1 }
 0xabd   :  { %v2812_v6 = vadd.f32 1.0, %v3209_v60 }
 0xabe   :  { %3212 = vrcp.f32 %v2793_v45  ;;  %v2805_v57 = vand.u32 2147483648, %v2793_v45  ;;  %v2803_v2 = vand.u32 2147483647, %v2793_v45  ;;  %vm2799_vm6 = vweird.f32 %v2793_v45 }
 0xabf   :  { %3214 = vrcp.f32 %v2812_v6  ;;  %v2824_v56 = vand.u32 2147483648, %v2812_v6  ;;  %v2822_v24 = vand.u32 2147483647, %v2812_v6  ;;  %vm2818_vm7 = vweird.f32 %v2812_v6 }
 0xac0   :  { %v2806_v27 = vor.u32 1.1754944e-38, %v2805_v57  ;;  %vm2804_vm10 = vcmp.eq.f32.partialorder %v2803_v2, 8.507059e+37 }
 0xac1   :  { %v2825_v43 = vor.u32 1.1754944e-38, %v2824_v56  ;;  %vm2823_vm11 = vcmp.eq.f32.partialorder %v2822_v24, 8.507059e+37 }
 0xac2   :  { %v3211_v13 = vpop.eup %3210 }
 0xac3   :  { %v2832_v51 = vadd.f32 1.0, %v3211_v13 }
 0xac4   :  { %v3213_v8 = vpop.eup %3212 }
 0xac5   :  { %v3215_v41 = vpop.eup %3214  ;;  %v2795_v53 = vmul.f32 %v3213_v8, %v2793_v45  ;;  %3216 = vrcp.f32 %v2832_v51  ;;  %vm2800_vm4 = vweird.f32 %v3213_v8  ;;  %v2844_v50 = vand.u32 2147483648, %v2832_v51 }
 0xac6   :  { %v2814_v36 = vmul.f32 %v3215_v41, %v2812_v6  ;;  %3218 = vtanh.f32 %v2788_v9  ;;  %vm2819_vm5 = vweird.f32 %v3215_v41  ;;  %vm2801_vm8 = vmor %vm2799_vm6, %vm2800_vm4  ;;  %vm2838_vm13 = vweird.f32 %v2832_v51 }
 0xac7   :  { %v2796_v21 = vsub.f32 1.0, %v2795_v53  ;;  %vm2820_vm9 = vmor %vm2818_vm7, %vm2819_vm5  ;;  %v2842_v39 = vand.u32 2147483647, %v2832_v51  ;;  %v2845_v30 = vor.u32 1.1754944e-38, %v2844_v50 }
 0xac8   :  { %v2815_v10 = vsub.f32 1.0, %v2814_v36 }
 0xac9   :  { %v2797_v14 = vmul.f32 %v3213_v8, %v2796_v21  ;;  %vm2843_vm15 = vcmp.eq.f32.partialorder %v2842_v39, 8.507059e+37 }
 0xaca   :  { %v2816_v22 = vmul.f32 %v3215_v41, %v2815_v10 }
 0xacb   :  { %v3217_v25 = vpop.eup %3216  ;;  %v2798_v7 = vadd.f32 %v3213_v8, %v2797_v14 }
 0xacc   :  { %v2817_v28 = vadd.f32 %v3215_v41, %v2816_v22  ;;  %v2834_v31 = vmul.f32 %v3217_v25, %v2832_v51  ;;  %v3219_v44 = vpop.eup %3218  ;;  %vm2839_vm12 = vweird.f32 %v3217_v25 }
 0xacd   :  { %v2802_v32 = vsel %vm2801_vm8, %v3213_v8, %v2798_v7  ;;  %vm2840_vm14 = vmor %vm2838_vm13, %vm2839_vm12 }
 0xace   :  { %v2807_v18 = vsel %vm2804_vm10, %v2806_v27, %v2802_v32  ;;  %v2821_v3 = vsel %vm2820_vm9, %v3215_v41, %v2817_v28  ;;  %v2835_v55 = vsub.f32 1.0, %v2834_v31 }
 0xacf   :  { %v2826_v5 = vsel %vm2823_vm11, %v2825_v43, %v2821_v3  ;;  %v2849_v33 = vmul.f32 %v3219_v44, %v2807_v18 }
 0xad0   :  { %v2848_v61 = vmul.f32 %v2826_v5, %v5375_v23  ;;  %v2836_v46 = vmul.f32 %v3217_v25, %v2835_v55 }
 0xad2   :  { %v2850_v15 = vadd.f32 %v2849_v33, %v2848_v61  ;;  %v2837_v34 = vadd.f32 %v3217_v25, %v2836_v46 }
 0xad4   :  { %3220 = vtanh.f32 %v2850_v15  ;;  %2865 = vst [vmem:[#allocation13 + $0x8] sm:$0xff] %v2850_v15  ;;  %v2841_v47 = vsel %vm2840_vm14, %v3217_v25, %v2837_v34 }
 0xad5   :  { %2891 = dma.vmem_to_hbm [thread:$0]  %s2884_s3, 256, %s2886_s17, [#allocation14], %s3514_s18, %s3514_s18, %s3515_s19   ;;  %v2846_v35 = vsel %vm2843_vm15, %v2845_v30, %v2841_v47 }
 0xada   :  { %v3221_v23 = vpop.eup %3220 }
 0xadb   :  { %v2852_v12 = vmul.f32 %v3221_v23, %v2846_v35 }
 0xadd   :  { %2861 = vst [vmem:[#allocation12 + $0x8] sm:$0xff] %v2852_v12 }
 0xade   :  { %2878 = dma.vmem_to_hbm [thread:$0]  %s2871_s20, 256, %s2873_s23, [#allocation6], %s3514_s18, %s3514_s18, %s3515_s19  }
 0xadf   :  { %3500 = dma.done.wait [#allocation6], 256  }
 0xae0   :  { %3501 = vsyncadd [#allocation6], 4294967040 }
 0xae1   :  { %3502 = dma.done.wait [#allocation14], 256  }
 0xae2   :  { %3503 = vsyncadd [#allocation14], 4294967040 }
 0xae3   :  { %2900 = vsyncpa [#allocation5], 1 }
 0xae4   :  { %2901 = vsyncpa [#allocation8], 1 }
 0xae5   :  { %2902 = vsyncpa [#allocation11], 1 }
 0xae6   :  { %2903 = vsyncpa [#allocation6], 1 }
 0xae7   :  { %2904 = vsyncpa [#allocation14], 1 }

</bundles_post_ra>
